<compile_context>
chip_gen: v6e
topology: v6e:2x2x1
jax: 0.10.0
libtpu: 0.0.40
codegen_flags: <defaults>
</compile_context>

<pallas_src>
import math
import functools

import jax
import jax.numpy as jnp
from jax import lax
from jax.experimental import pallas as pl
from jax.experimental.pallas import tpu as pltpu

EPS = 1e-5  # PyTorch LayerNorm default eps
P_HI = lax.Precision.HIGHEST


# ---------------------------------------------------------------------------
# Math helpers (used both inside the Pallas kernel and in the JAX reference)
# ---------------------------------------------------------------------------
def _layernorm(x, gamma, beta):
    mu = jnp.mean(x, axis=-1, keepdims=True)
    var = jnp.mean((x - mu) ** 2, axis=-1, keepdims=True)
    return (x - mu) * lax.rsqrt(var + EPS) * gamma + beta


def _gelu_exact(x):
    # nn.GELU() default is the exact erf formulation.
    # TODO(synk): the tanh-approx GELU would run on the otherwise-idle EUP slot;
    # kept exact here to preserve PyTorch semantics.
    return 0.5 * x * (1.0 + lax.erf(x * (1.0 / math.sqrt(2.0))))


# ---------------------------------------------------------------------------
# Fused Pallas kernel.  grid = (B, L):
#   axis 0 (parallel)  : batch element
#   axis 1 (arbitrary) : transformer layer (weights streamed per layer)
# ---------------------------------------------------------------------------
def fused_fractal_kernel(xp_ref, wproj_ref, pevec_ref, wqkv_ref, bqkv_ref,
                         wout_ref, w1_ref, b1_ref, w2_ref, dvec_ref,
                         o_ref, x_ref, oc_ref,
                         *, num_heads, approx_recip, compute_dtype, precision):
    # xp_ref   : (1, N, C*p*p)   input patches (compute dtype)
    # wproj_ref: (Cpp, D)        patch-embed weight
    # pevec_ref: (5, 1, D)       [proj_b, pe_ln_g, pe_ln_b, norm_g, norm_b] (f32)
    # wqkv_ref : (1, D, 3D)      merged QKV weight of the CURRENT layer
    #                            (1/sqrt(hd) folded into the q columns)
    # bqkv_ref : (1, 1, 3D)      merged QKV bias (f32, q part pre-scaled)
    # wout_ref : (1, D, D)       attention output projection
    # w1_ref   : (1, D, Hd)      MLP fc1 weight; b1_ref: (1, 1, Hd) bias (f32)
    # w2_ref   : (1, Hd, D)      MLP fc2 weight
    # dvec_ref : (1, 6, 1, D)    [ln1_g, ln1_b, bout, ln2_g, ln2_b, b2] (f32)
    # o_ref    : (1, N, D)       output (written only at the last layer)
    # x_ref    : VMEM (N, D) f32 resident activation (across layer grid steps)
    # oc_ref   : VMEM (N, D) cd  head-concat slab for the output projection
    N, D = x_ref.shape
    hd = D // num_heads
    l = pl.program_id(1)
    cd = compute_dtype

    def mxu(a, b):
        return jnp.dot(a.astype(cd), b, preferred_element_type=jnp.float32,
                       precision=precision)

    # ---- PatchEmbed (stride-p conv == per-patch projection) + LayerNorm ----
    @pl.when(l == 0)
    def _():
        y = mxu(xp_ref[0], wproj_ref[...]) + pevec_ref[0]
        x_ref[...] = _layernorm(y, pevec_ref[1], pevec_ref[2])

    x = x_ref[...]                                           # (N, D) f32

    # ---------------- pre-norm multi-head self-attention --------------------
    xn = _layernorm(x, dvec_ref[0, 0], dvec_ref[0, 1])
    # Merged QKV: one full-width matmul, single cast to the compute dtype.
    qkv = (mxu(xn, wqkv_ref[0]) + bqkv_ref[0]).astype(cd)    # (N, 3D)
    q = qkv[:, 0 * D:1 * D]
    k = qkv[:, 1 * D:2 * D]
    v = qkv[:, 2 * D:3 * D]

    for h in range(num_heads):            # static unroll; heads are independent
        sl = slice(h * hd, (h + 1) * hd)
        qh, kh, vh = q[:, sl], k[:, sl], v[:, sl]
        # scores = (q * scale) . k^T   (scale already folded into q weights)
        s = lax.dot_general(qh, kh, (((1,), (1,)), ((), ())),
                            preferred_element_type=jnp.float32,
                            precision=precision)             # (N, N) f32
        s = s - jnp.max(s, axis=-1, keepdims=True)
        p = jnp.exp(s)
        denom = jnp.sum(p, axis=-1, keepdims=True)
        if approx_recip:
            p = p * pl.reciprocal(denom, approx=True)
        else:
            p = p / denom
        oh = jnp.dot(p.astype(cd), vh, preferred_element_type=jnp.float32,
                     precision=precision)                    # (N, hd)
        oc_ref[:, sl] = oh.astype(cd)     # head concat via scratch column slab

    # Single full-width output projection (contraction depth = nh*hd = D).
    x = x + mxu(oc_ref[...], wout_ref[0]) + dvec_ref[0, 2]

    # ------------------------------ pre-norm MLP ----------------------------
    xn2 = _layernorm(x, dvec_ref[0, 3], dvec_ref[0, 4])
    h1 = _gelu_exact(mxu(xn2, w1_ref[0]) + b1_ref[0])
    x = x + mxu(h1, w2_ref[0]) + dvec_ref[0, 5]

    x_ref[...] = x                                           # carry to layer l+1

    # ---- final LayerNorm; output block is written back once per batch ------
    @pl.when(l == pl.num_programs(1) - 1)
    def _():
        o_ref[0] = _layernorm(x, pevec_ref[3], pevec_ref[4])


# ---------------------------------------------------------------------------
# Wrapper: layout plumbing + parameter packing + single pallas_call
# ---------------------------------------------------------------------------
@functools.partial(jax.jit, static_argnames=("patch_size", "num_heads", "precise"))
def fractal_enhancer_forward(x, params, *, patch_size, num_heads, precise=False):
    B, C, H, W = x.shape
    p = patch_size
    Hp, Wp = H // p, W // p
    N = Hp * Wp
    Cpp = C * p * p

    D = params["proj_w_t"].shape[1]
    L = params["wqkv_t"].shape[0]
    Hd = params["w1_t"].shape[2]
    nh = num_heads
    hd = D // nh

    cd = jnp.float32 if precise else jnp.bfloat16
    prec = P_HI if precise else None

    # --- NCHW -> (B, N, C*p*p) patch extraction (plain-JAX layout glue) ---
    xp = x.reshape(B, C, Hp, p, Wp, p)
    xp = jnp.transpose(xp, (0, 2, 4, 1, 3, 5)).reshape(B, N, Cpp).astype(cd)

    # --- pack / pre-layout parameters for the fused kernel ---
    wproj = params["proj_w_t"].astype(cd)                                 # (Cpp, D)
    pe_vecs = jnp.concatenate(
        [params["proj_b"], params["pe_ln_g"], params["pe_ln_b"],
         params["norm_g"], params["norm_b"]], axis=0)[:, None, :]         # (5, 1, D)

    # fold the 1/sqrt(hd) softmax scale into the q columns of Wqkv / bqkv
    scale = 1.0 / math.sqrt(hd)
    wqkv = params["wqkv_t"].at[:, :, :D].multiply(scale).astype(cd)       # (L, D, 3D)
    bqkv = params["bqkv"].at[:, :D].multiply(scale)[:, None, :]           # (L, 1, 3D)
    wout = params["wout_t"].astype(cd)                                    # (L, D, D)
    w1 = params["w1_t"].astype(cd)                                        # (L, D, Hd)
    w2 = params["w2_t"].astype(cd)                                        # (L, Hd, D)
    b1 = params["b1"][:, None, :]                                         # (L, 1, Hd)
    dvecs = jnp.stack([params["ln1_g"], params["ln1_b"], params["bout"],
                       params["ln2_g"], params["ln2_b"], params["b2"]],
                      axis=1)[:, :, None, :]                              # (L, 6, 1, D)

    kernel = functools.partial(fused_fractal_kernel, num_heads=nh,
                               approx_recip=not precise,
                               compute_dtype=cd, precision=prec)

    y = pl.pallas_call(
        kernel,
        out_shape=jax.ShapeDtypeStruct((B, N, D), jnp.float32),
        grid=(B, L),
        in_specs=[
            pl.BlockSpec((1, N, Cpp), lambda b, l: (b, 0, 0)),      # xp
            pl.BlockSpec((Cpp, D), lambda b, l: (0, 0)),            # wproj
            pl.BlockSpec((5, 1, D), lambda b, l: (0, 0, 0)),        # pe vecs
            pl.BlockSpec((1, D, 3 * D), lambda b, l: (l, 0, 0)),    # wqkv (per layer)
            pl.BlockSpec((1, 1, 3 * D), lambda b, l: (l, 0, 0)),    # bqkv
            pl.BlockSpec((1, D, D), lambda b, l: (l, 0, 0)),        # wout
            pl.BlockSpec((1, D, Hd), lambda b, l: (l, 0, 0)),       # w1
            pl.BlockSpec((1, 1, Hd), lambda b, l: (l, 0, 0)),       # b1
            pl.BlockSpec((1, Hd, D), lambda b, l: (l, 0, 0)),       # w2
            pl.BlockSpec((1, 6, 1, D), lambda b, l: (l, 0, 0, 0)),  # layer vecs
        ],
        out_specs=pl.BlockSpec((1, N, D), lambda b, l: (b, 0, 0)),
        scratch_shapes=[pltpu.VMEM((N, D), jnp.float32),            # activation
                        pltpu.VMEM((N, D), cd)],                    # head concat
        compiler_params=pltpu.CompilerParams(
            dimension_semantics=("parallel", "arbitrary"),
            vmem_limit_bytes=48 * 1024 * 1024),
    )(xp, wproj, pe_vecs, wqkv, bqkv, wout, w1, b1, w2, dvecs)

    # patch un-embed: (B, N, D) -> (B, D, Hp, Wp)
    return jnp.transpose(y, (0, 2, 1)).reshape(B, D, Hp, Wp)


# ---------------------------------------------------------------------------
# Pure-JAX f32 reference (HIGHEST matmul precision) for correctness checking
# ---------------------------------------------------------------------------
def reference_forward(x, params, *, patch_size, num_heads):
    B, C, H, W = x.shape
    p = patch_size
    Hp, Wp = H // p, W // p
    N = Hp * Wp
    xp = x.reshape(B, C, Hp, p, Wp, p)
    xp = jnp.transpose(xp, (0, 2, 4, 1, 3, 5)).reshape(B, N, C * p * p)

    y = jnp.dot(xp, params["proj_w_t"], precision=P_HI) + params["proj_b"]
    y = _layernorm(y, params["pe_ln_g"], params["pe_ln_b"])
    D = y.shape[-1]
    hd = D // num_heads
    L = params["wqkv_t"].shape[0]

    for l in range(L):
        xn = _layernorm(y, params["ln1_g"][l], params["ln1_b"][l])
        qkv = jnp.dot(xn, params["wqkv_t"][l], precision=P_HI) + params["bqkv"][l]
        q, k, v = qkv[..., :D], qkv[..., D:2 * D], qkv[..., 2 * D:]

        def split_heads(t):
            return jnp.transpose(t.reshape(B, N, num_heads, hd), (0, 2, 1, 3))

        qh, kh, vh = split_heads(q), split_heads(k), split_heads(v)
        s = jnp.einsum("bhnd,bhmd->bhnm", qh, kh, precision=P_HI) / math.sqrt(hd)
        pa = jax.nn.softmax(s, axis=-1)
        o = jnp.einsum("bhnm,bhmd->bhnd", pa, vh, precision=P_HI)
        o = jnp.transpose(o, (0, 2, 1, 3)).reshape(B, N, D)
        o = jnp.dot(o, params["wout_t"][l], precision=P_HI) + params["bout"][l]
        y = y + o

        xn2 = _layernorm(y, params["ln2_g"][l], params["ln2_b"][l])
        h1 = _gelu_exact(jnp.dot(xn2, params["w1_t"][l], precision=P_HI)
                         + params["b1"][l])
        y = y + jnp.dot(h1, params["w2_t"][l], precision=P_HI) + params["b2"][l]

    y = _layernorm(y, params["norm_g"], params["norm_b"])
    return jnp.transpose(y, (0, 2, 1)).reshape(B, D, Hp, Wp)


# ---------------------------------------------------------------------------
# Deterministic parameter construction (per-layer params stacked along axis 0)
# ---------------------------------------------------------------------------
def init_params(key, in_channels, embed_dim, patch_size, num_layers,
                mlp_ratio=2.0, scale=0.1):
    D = embed_dim
    hidden = int(D * mlp_ratio)
    keys = iter(jax.random.split(key, 8 + 12 * num_layers))

    def rnd(shape, s=scale):
        return s * jax.random.normal(next(keys), shape, jnp.float32)

    params = {}
    conv_w = rnd((D, in_channels, patch_size, patch_size))  # nn.Conv2d weight
    params["proj_w_t"] = conv_w.reshape(D, -1).T            # (C*p*p, D)
    params["proj_b"] = rnd((1, D))
    params["pe_ln_g"] = 1.0 + rnd((1, D))
    params["pe_ln_b"] = rnd((1, D))
    params["norm_g"] = 1.0 + rnd((1, D))
    params["norm_b"] = rnd((1, D))

    def stack(fn):
        return jnp.stack([fn() for _ in range(num_layers)], axis=0)

    params["ln1_g"] = stack(lambda: 1.0 + rnd((D,)))
    params["ln1_b"] = stack(lambda: rnd((D,)))
    params["wqkv_t"] = stack(lambda: rnd((3 * D, D)).T)     # (L, D, 3D)
    params["bqkv"] = stack(lambda: rnd((3 * D,)))           # (L, 3D)
    params["wout_t"] = stack(lambda: rnd((D, D)).T)         # (L, D, D)
    params["bout"] = stack(lambda: rnd((D,)))               # (L, D)
    params["ln2_g"] = stack(lambda: 1.0 + rnd((D,)))
    params["ln2_b"] = stack(lambda: rnd((D,)))
    params["w1_t"] = stack(lambda: rnd((hidden, D)).T)      # (L, D, hidden)
    params["b1"] = stack(lambda: rnd((hidden,)))            # (L, hidden)
    params["w2_t"] = stack(lambda: rnd((D, hidden)).T)      # (L, hidden, D)
    params["b2"] = stack(lambda: rnd((D,)))                 # (L, D)
    return params


# ---------------------------------------------------------------------------
if __name__ == "__main__":
    # Small config consistent with the module: in_channels=4, img 16x16,
    # patch 4 -> 4x4 = 16 patches, embed_dim=32, depths=(2,2) -> 4 blocks,
    # num_heads=4 (head_dim=8), mlp_ratio=2.0.
    B, C, H, W = 2, 4, 16, 16
    patch_size = 4
    embed_dim = 32
    depths = (2, 2)
    num_heads = 4
    num_layers = sum(depths)

    key = jax.random.PRNGKey(0)
    kx, kp = jax.random.split(key)
    x = jax.random.normal(kx, (B, C, H, W), jnp.float32)
    params = init_params(kp, C, embed_dim, patch_size, num_layers)

    ref = jax.block_until_ready(
        reference_forward(x, params, patch_size=patch_size,
                          num_heads=num_heads))

    # 1) precise mode: same kernel, pure f32 + exact reciprocal -> tight check
    #    (catches any weight-packing / indexing / grid bug).
    out_precise = jax.block_until_ready(
        fractal_enhancer_forward(x, params, patch_size=patch_size,
                                 num_heads=num_heads, precise=True))
    assert out_precise.shape == (B, embed_dim, H // patch_size, W // patch_size)
    assert jnp.allclose(out_precise, ref, rtol=5e-3, atol=5e-3), \
        "precise-mode mismatch vs reference"

    # 2) fast mode: bf16 MXU operands + approx-reciprocal softmax -> loose check.
    out_fast = jax.block_until_ready(
        fractal_enhancer_forward(x, params, patch_size=patch_size,
                                 num_heads=num_heads, precise=False))
    assert out_fast.shape == (B, embed_dim, H // patch_size, W // patch_size)
    assert jnp.allclose(out_fast, ref, rtol=5e-2, atol=5e-2), \
        "fast-mode mismatch vs reference"

    print("KERNEL_OK")
</pallas_src>

<mosaic_0001>
module attributes {stable_mosaic.version = 11 : i64} {
  func.func @fused_fractal_kernel(%arg0: i32, %arg1: i32, %arg2: memref<1x16x64xf32, #tpu.memory_space<vmem>>, %arg3: memref<64x32xf32, #tpu.memory_space<vmem>>, %arg4: memref<5x1x32xf32, #tpu.memory_space<vmem>>, %arg5: memref<1x32x96xf32, #tpu.memory_space<vmem>>, %arg6: memref<1x1x96xf32, #tpu.memory_space<vmem>>, %arg7: memref<1x32x32xf32, #tpu.memory_space<vmem>>, %arg8: memref<1x32x64xf32, #tpu.memory_space<vmem>>, %arg9: memref<1x1x64xf32, #tpu.memory_space<vmem>>, %arg10: memref<1x64x32xf32, #tpu.memory_space<vmem>>, %arg11: memref<1x6x1x32xf32, #tpu.memory_space<vmem>>, %arg12: memref<1x16x32xf32, #tpu.memory_space<vmem>>, %arg13: memref<16x32xf32, #tpu.memory_space<vmem>>, %arg14: memref<16x32xf32, #tpu.memory_space<vmem>>) attributes {dimension_semantics = [#tpu.dimension_semantics<parallel>, #tpu.dimension_semantics<arbitrary>], iteration_bounds = array<i64: 2, 4>, scalar_prefetch = 0 : i64, scratch_operands = 2 : i64, tpu.core_type = #tpu.core_type<tc>, window_params = [{transform_indices = @transform_0, window_bounds = array<i64: 1, 16, 64>}, {pipeline_mode = #tpu.pipeline_mode<synchronous>, transform_indices = @transform_1, window_bounds = array<i64: 64, 32>}, {pipeline_mode = #tpu.pipeline_mode<synchronous>, transform_indices = @transform_2, window_bounds = array<i64: 5, 1, 32>}, {transform_indices = @transform_3, window_bounds = array<i64: 1, 32, 96>}, {transform_indices = @transform_4, window_bounds = array<i64: 1, 1, 96>}, {transform_indices = @transform_5, window_bounds = array<i64: 1, 32, 32>}, {transform_indices = @transform_6, window_bounds = array<i64: 1, 32, 64>}, {transform_indices = @transform_7, window_bounds = array<i64: 1, 1, 64>}, {transform_indices = @transform_8, window_bounds = array<i64: 1, 64, 32>}, {transform_indices = @transform_9, window_bounds = array<i64: 1, 6, 1, 32>}, {transform_indices = @transform_10, window_bounds = array<i64: 1, 16, 32>}]} {
    %c0_i32 = arith.constant 0 : i32
    %0 = arith.cmpi eq, %arg1, %c0_i32 : i32
    %1 = arith.extui %0 : i1 to i32
    %c0_i32_0 = arith.constant 0 : i32
    %2 = arith.cmpi ne, %1, %c0_i32_0 : i32
    scf.if %2 {
      %c0_81 = arith.constant 0 : index
      %c0_82 = arith.constant 0 : index
      %c0_83 = arith.constant 0 : index
      %162 = vector.load %arg2[%c0_81, %c0_82, %c0_83] : memref<1x16x64xf32, #tpu.memory_space<vmem>>, vector<1x16x64xf32>
      %163 = vector.shape_cast %162 : vector<1x16x64xf32> to vector<16x64xf32>
      %c0_84 = arith.constant 0 : index
      %c0_85 = arith.constant 0 : index
      %164 = vector.load %arg3[%c0_84, %c0_85] : memref<64x32xf32, #tpu.memory_space<vmem>>, vector<64x32xf32>
      %cst_86 = arith.constant dense<0.000000e+00> : vector<16x32xf32>
      %165 = tpu.matmul %163, %164, %cst_86 {dimension_numbers = #tpu.dot_dimension_numbers<[1], [0], [0], [1], [0, 0, 1, 1], [], []>, precision = #tpu.contract_precision<fp32>} : vector<16x64xf32>, vector<64x32xf32>, vector<16x32xf32> -> vector<16x32xf32>
      %c0_87 = arith.constant 0 : index
      %c0_88 = arith.constant 0 : index
      %c0_89 = arith.constant 0 : index
      %166 = vector.load %arg4[%c0_87, %c0_88, %c0_89] : memref<5x1x32xf32, #tpu.memory_space<vmem>>, vector<1x1x32xf32>
      %167 = vector.shape_cast %166 : vector<1x1x32xf32> to vector<1x32xf32>
      %168 = vector.broadcast %167 : vector<1x32xf32> to vector<16x32xf32>
      %169 = arith.addf %165, %168 : vector<16x32xf32>
      %c1_90 = arith.constant 1 : index
      %c0_91 = arith.constant 0 : index
      %c0_92 = arith.constant 0 : index
      %170 = vector.load %arg4[%c1_90, %c0_91, %c0_92] : memref<5x1x32xf32, #tpu.memory_space<vmem>>, vector<1x1x32xf32>
      %171 = vector.shape_cast %170 : vector<1x1x32xf32> to vector<1x32xf32>
      %c2_93 = arith.constant 2 : index
      %c0_94 = arith.constant 0 : index
      %c0_95 = arith.constant 0 : index
      %172 = vector.load %arg4[%c2_93, %c0_94, %c0_95] : memref<5x1x32xf32, #tpu.memory_space<vmem>>, vector<1x1x32xf32>
      %173 = vector.shape_cast %172 : vector<1x1x32xf32> to vector<1x32xf32>
      %cst_96 = arith.constant dense<0.000000e+00> : vector<16xf32>
      %174 = vector.multi_reduction <add>, %169, %cst_96 [1] : vector<16x32xf32> to vector<16xf32>
      %175 = vector.shape_cast %174 : vector<16xf32> to vector<16x1xf32>
      %cst_97 = arith.constant 3.200000e+01 : f32
      %176 = vector.broadcast %cst_97 : f32 to vector<16x1xf32>
      %177 = arith.divf %175, %176 : vector<16x1xf32>
      %178 = vector.broadcast %177 : vector<16x1xf32> to vector<16x32xf32>
      %179 = arith.subf %169, %178 : vector<16x32xf32>
      %180 = arith.mulf %179, %179 : vector<16x32xf32>
      %cst_98 = arith.constant dense<0.000000e+00> : vector<16xf32>
      %181 = vector.multi_reduction <add>, %180, %cst_98 [1] : vector<16x32xf32> to vector<16xf32>
      %182 = vector.shape_cast %181 : vector<16xf32> to vector<16x1xf32>
      %cst_99 = arith.constant 3.200000e+01 : f32
      %183 = vector.broadcast %cst_99 : f32 to vector<16x1xf32>
      %184 = arith.divf %182, %183 : vector<16x1xf32>
      %185 = vector.broadcast %177 : vector<16x1xf32> to vector<16x32xf32>
      %186 = arith.subf %169, %185 : vector<16x32xf32>
      %cst_100 = arith.constant 9.99999974E-6 : f32
      %187 = vector.broadcast %cst_100 : f32 to vector<16x1xf32>
      %188 = arith.addf %184, %187 : vector<16x1xf32>
      %189 = math.rsqrt %188 : vector<16x1xf32>
      %190 = vector.broadcast %189 : vector<16x1xf32> to vector<16x32xf32>
      %191 = arith.mulf %186, %190 : vector<16x32xf32>
      %192 = vector.broadcast %171 : vector<1x32xf32> to vector<16x32xf32>
      %193 = arith.mulf %191, %192 : vector<16x32xf32>
      %194 = vector.broadcast %173 : vector<1x32xf32> to vector<16x32xf32>
      %195 = arith.addf %193, %194 : vector<16x32xf32>
      %c0_101 = arith.constant 0 : index
      %c0_102 = arith.constant 0 : index
      %196 = vector.load %arg13[%c0_101, %c0_102] : memref<16x32xf32, #tpu.memory_space<vmem>>, vector<16x32xf32>
      tpu.vector_store %arg13[%c0_101, %c0_102], %195 {strides = array<i32>} : memref<16x32xf32, #tpu.memory_space<vmem>>, vector<16x32xf32>,
    } else {
    }
    %c0 = arith.constant 0 : index
    %c0_1 = arith.constant 0 : index
    %3 = vector.load %arg13[%c0, %c0_1] : memref<16x32xf32, #tpu.memory_space<vmem>>, vector<16x32xf32>
    %c0_2 = arith.constant 0 : index
    %c0_3 = arith.constant 0 : index
    %c0_4 = arith.constant 0 : index
    %c0_5 = arith.constant 0 : index
    %4 = vector.load %arg11[%c0_2, %c0_3, %c0_4, %c0_5] : memref<1x6x1x32xf32, #tpu.memory_space<vmem>>, vector<1x1x1x32xf32>
    %5 = vector.shape_cast %4 : vector<1x1x1x32xf32> to vector<1x32xf32>
    %c0_6 = arith.constant 0 : index
    %c1 = arith.constant 1 : index
    %c0_7 = arith.constant 0 : index
    %c0_8 = arith.constant 0 : index
    %6 = vector.load %arg11[%c0_6, %c1, %c0_7, %c0_8] : memref<1x6x1x32xf32, #tpu.memory_space<vmem>>, vector<1x1x1x32xf32>
    %7 = vector.shape_cast %6 : vector<1x1x1x32xf32> to vector<1x32xf32>
    %cst = arith.constant dense<0.000000e+00> : vector<16xf32>
    %8 = vector.multi_reduction <add>, %3, %cst [1] : vector<16x32xf32> to vector<16xf32>
    %9 = vector.shape_cast %8 : vector<16xf32> to vector<16x1xf32>
    %cst_9 = arith.constant 3.200000e+01 : f32
    %10 = vector.broadcast %cst_9 : f32 to vector<16x1xf32>
    %11 = arith.divf %9, %10 : vector<16x1xf32>
    %12 = vector.broadcast %11 : vector<16x1xf32> to vector<16x32xf32>
    %13 = arith.subf %3, %12 : vector<16x32xf32>
    %14 = arith.mulf %13, %13 : vector<16x32xf32>
    %cst_10 = arith.constant dense<0.000000e+00> : vector<16xf32>
    %15 = vector.multi_reduction <add>, %14, %cst_10 [1] : vector<16x32xf32> to vector<16xf32>
    %16 = vector.shape_cast %15 : vector<16xf32> to vector<16x1xf32>
    %cst_11 = arith.constant 3.200000e+01 : f32
    %17 = vector.broadcast %cst_11 : f32 to vector<16x1xf32>
    %18 = arith.divf %16, %17 : vector<16x1xf32>
    %19 = vector.broadcast %11 : vector<16x1xf32> to vector<16x32xf32>
    %20 = arith.subf %3, %19 : vector<16x32xf32>
    %cst_12 = arith.constant 9.99999974E-6 : f32
    %21 = vector.broadcast %cst_12 : f32 to vector<16x1xf32>
    %22 = arith.addf %18, %21 : vector<16x1xf32>
    %23 = math.rsqrt %22 : vector<16x1xf32>
    %24 = vector.broadcast %23 : vector<16x1xf32> to vector<16x32xf32>
    %25 = arith.mulf %20, %24 : vector<16x32xf32>
    %26 = vector.broadcast %5 : vector<1x32xf32> to vector<16x32xf32>
    %27 = arith.mulf %25, %26 : vector<16x32xf32>
    %28 = vector.broadcast %7 : vector<1x32xf32> to vector<16x32xf32>
    %29 = arith.addf %27, %28 : vector<16x32xf32>
    %c0_13 = arith.constant 0 : index
    %c0_14 = arith.constant 0 : index
    %c0_15 = arith.constant 0 : index
    %30 = vector.load %arg5[%c0_13, %c0_14, %c0_15] : memref<1x32x96xf32, #tpu.memory_space<vmem>>, vector<1x32x96xf32>
    %31 = vector.shape_cast %30 : vector<1x32x96xf32> to vector<32x96xf32>
    %cst_16 = arith.constant dense<0.000000e+00> : vector<16x96xf32>
    %32 = tpu.matmul %29, %31, %cst_16 {dimension_numbers = #tpu.dot_dimension_numbers<[1], [0], [0], [1], [0, 0, 1, 1], [], []>, precision = #tpu.contract_precision<fp32>} : vector<16x32xf32>, vector<32x96xf32>, vector<16x96xf32> -> vector<16x96xf32>
    %c0_17 = arith.constant 0 : index
    %c0_18 = arith.constant 0 : index
    %c0_19 = arith.constant 0 : index
    %33 = vector.load %arg6[%c0_17, %c0_18, %c0_19] : memref<1x1x96xf32, #tpu.memory_space<vmem>>, vector<1x1x96xf32>
    %34 = vector.shape_cast %33 : vector<1x1x96xf32> to vector<1x96xf32>
    %35 = vector.broadcast %34 : vector<1x96xf32> to vector<16x96xf32>
    %36 = arith.addf %32, %35 : vector<16x96xf32>
    %37 = vector.extract_strided_slice %36 {offsets = [0, 0], sizes = [16, 32], strides = [1, 1]} : vector<16x96xf32> to vector<16x32xf32>
    %38 = vector.extract_strided_slice %36 {offsets = [0, 32], sizes = [16, 32], strides = [1, 1]} : vector<16x96xf32> to vector<16x32xf32>
    %39 = vector.extract_strided_slice %36 {offsets = [0, 64], sizes = [16, 32], strides = [1, 1]} : vector<16x96xf32> to vector<16x32xf32>
    %40 = vector.extract_strided_slice %37 {offsets = [0, 0], sizes = [16, 8], strides = [1, 1]} : vector<16x32xf32> to vector<16x8xf32>
    %41 = vector.extract_strided_slice %38 {offsets = [0, 0], sizes = [16, 8], strides = [1, 1]} : vector<16x32xf32> to vector<16x8xf32>
    %42 = vector.extract_strided_slice %39 {offsets = [0, 0], sizes = [16, 8], strides = [1, 1]} : vector<16x32xf32> to vector<16x8xf32>
    %cst_20 = arith.constant dense<0.000000e+00> : vector<16x16xf32>
    %43 = tpu.matmul %40, %41, %cst_20 {dimension_numbers = #tpu.dot_dimension_numbers<[1], [1], [0], [0], [0, 0, 1, 0], [], []>, precision = #tpu.contract_precision<fp32>} : vector<16x8xf32>, vector<16x8xf32>, vector<16x16xf32> -> vector<16x16xf32>
    %cst_21 = arith.constant dense<0xFF800000> : vector<16xf32>
    %44 = vector.multi_reduction <maximumf>, %43, %cst_21 [1] : vector<16x16xf32> to vector<16xf32>
    %45 = vector.shape_cast %44 : vector<16xf32> to vector<16x1xf32>
    %46 = vector.broadcast %45 : vector<16x1xf32> to vector<16x16xf32>
    %47 = arith.subf %43, %46 : vector<16x16xf32>
    %48 = math.exp %47 : vector<16x16xf32>
    %cst_22 = arith.constant dense<0.000000e+00> : vector<16xf32>
    %49 = vector.multi_reduction <add>, %48, %cst_22 [1] : vector<16x16xf32> to vector<16xf32>
    %50 = vector.shape_cast %49 : vector<16xf32> to vector<16x1xf32>
    %51 = vector.broadcast %50 : vector<16x1xf32> to vector<16x16xf32>
    %52 = arith.divf %48, %51 : vector<16x16xf32>
    %cst_23 = arith.constant dense<0.000000e+00> : vector<16x8xf32>
    %53 = tpu.matmul %52, %42, %cst_23 {dimension_numbers = #tpu.dot_dimension_numbers<[1], [0], [0], [1], [0, 0, 1, 1], [], []>, precision = #tpu.contract_precision<fp32>} : vector<16x16xf32>, vector<16x8xf32>, vector<16x8xf32> -> vector<16x8xf32>
    %c0_24 = arith.constant 0 : index
    %c0_25 = arith.constant 0 : index
    %54 = vector.load %arg14[%c0_24, %c0_25] : memref<16x32xf32, #tpu.memory_space<vmem>>, vector<16x8xf32>
    tpu.vector_store %arg14[%c0_24, %c0_25], %53 {strides = array<i32>} : memref<16x32xf32, #tpu.memory_space<vmem>>, vector<16x8xf32>,
    %55 = vector.extract_strided_slice %37 {offsets = [0, 8], sizes = [16, 8], strides = [1, 1]} : vector<16x32xf32> to vector<16x8xf32>
    %56 = vector.extract_strided_slice %38 {offsets = [0, 8], sizes = [16, 8], strides = [1, 1]} : vector<16x32xf32> to vector<16x8xf32>
    %57 = vector.extract_strided_slice %39 {offsets = [0, 8], sizes = [16, 8], strides = [1, 1]} : vector<16x32xf32> to vector<16x8xf32>
    %cst_26 = arith.constant dense<0.000000e+00> : vector<16x16xf32>
    %58 = tpu.matmul %55, %56, %cst_26 {dimension_numbers = #tpu.dot_dimension_numbers<[1], [1], [0], [0], [0, 0, 1, 0], [], []>, precision = #tpu.contract_precision<fp32>} : vector<16x8xf32>, vector<16x8xf32>, vector<16x16xf32> -> vector<16x16xf32>
    %cst_27 = arith.constant dense<0xFF800000> : vector<16xf32>
    %59 = vector.multi_reduction <maximumf>, %58, %cst_27 [1] : vector<16x16xf32> to vector<16xf32>
    %60 = vector.shape_cast %59 : vector<16xf32> to vector<16x1xf32>
    %61 = vector.broadcast %60 : vector<16x1xf32> to vector<16x16xf32>
    %62 = arith.subf %58, %61 : vector<16x16xf32>
    %63 = math.exp %62 : vector<16x16xf32>
    %cst_28 = arith.constant dense<0.000000e+00> : vector<16xf32>
    %64 = vector.multi_reduction <add>, %63, %cst_28 [1] : vector<16x16xf32> to vector<16xf32>
    %65 = vector.shape_cast %64 : vector<16xf32> to vector<16x1xf32>
    %66 = vector.broadcast %65 : vector<16x1xf32> to vector<16x16xf32>
    %67 = arith.divf %63, %66 : vector<16x16xf32>
    %cst_29 = arith.constant dense<0.000000e+00> : vector<16x8xf32>
    %68 = tpu.matmul %67, %57, %cst_29 {dimension_numbers = #tpu.dot_dimension_numbers<[1], [0], [0], [1], [0, 0, 1, 1], [], []>, precision = #tpu.contract_precision<fp32>} : vector<16x16xf32>, vector<16x8xf32>, vector<16x8xf32> -> vector<16x8xf32>
    %c0_30 = arith.constant 0 : index
    %c8 = arith.constant 8 : index
    %69 = vector.load %arg14[%c0_30, %c8] : memref<16x32xf32, #tpu.memory_space<vmem>>, vector<16x8xf32>
    tpu.vector_store %arg14[%c0_30, %c8], %68 {strides = array<i32>} : memref<16x32xf32, #tpu.memory_space<vmem>>, vector<16x8xf32>,
    %70 = vector.extract_strided_slice %37 {offsets = [0, 16], sizes = [16, 8], strides = [1, 1]} : vector<16x32xf32> to vector<16x8xf32>
    %71 = vector.extract_strided_slice %38 {offsets = [0, 16], sizes = [16, 8], strides = [1, 1]} : vector<16x32xf32> to vector<16x8xf32>
    %72 = vector.extract_strided_slice %39 {offsets = [0, 16], sizes = [16, 8], strides = [1, 1]} : vector<16x32xf32> to vector<16x8xf32>
    %cst_31 = arith.constant dense<0.000000e+00> : vector<16x16xf32>
    %73 = tpu.matmul %70, %71, %cst_31 {dimension_numbers = #tpu.dot_dimension_numbers<[1], [1], [0], [0], [0, 0, 1, 0], [], []>, precision = #tpu.contract_precision<fp32>} : vector<16x8xf32>, vector<16x8xf32>, vector<16x16xf32> -> vector<16x16xf32>
    %cst_32 = arith.constant dense<0xFF800000> : vector<16xf32>
    %74 = vector.multi_reduction <maximumf>, %73, %cst_32 [1] : vector<16x16xf32> to vector<16xf32>
    %75 = vector.shape_cast %74 : vector<16xf32> to vector<16x1xf32>
    %76 = vector.broadcast %75 : vector<16x1xf32> to vector<16x16xf32>
    %77 = arith.subf %73, %76 : vector<16x16xf32>
    %78 = math.exp %77 : vector<16x16xf32>
    %cst_33 = arith.constant dense<0.000000e+00> : vector<16xf32>
    %79 = vector.multi_reduction <add>, %78, %cst_33 [1] : vector<16x16xf32> to vector<16xf32>
    %80 = vector.shape_cast %79 : vector<16xf32> to vector<16x1xf32>
    %81 = vector.broadcast %80 : vector<16x1xf32> to vector<16x16xf32>
    %82 = arith.divf %78, %81 : vector<16x16xf32>
    %cst_34 = arith.constant dense<0.000000e+00> : vector<16x8xf32>
    %83 = tpu.matmul %82, %72, %cst_34 {dimension_numbers = #tpu.dot_dimension_numbers<[1], [0], [0], [1], [0, 0, 1, 1], [], []>, precision = #tpu.contract_precision<fp32>} : vector<16x16xf32>, vector<16x8xf32>, vector<16x8xf32> -> vector<16x8xf32>
    %c0_35 = arith.constant 0 : index
    %c16 = arith.constant 16 : index
    %84 = vector.load %arg14[%c0_35, %c16] : memref<16x32xf32, #tpu.memory_space<vmem>>, vector<16x8xf32>
    tpu.vector_store %arg14[%c0_35, %c16], %83 {strides = array<i32>} : memref<16x32xf32, #tpu.memory_space<vmem>>, vector<16x8xf32>,
    %85 = vector.extract_strided_slice %37 {offsets = [0, 24], sizes = [16, 8], strides = [1, 1]} : vector<16x32xf32> to vector<16x8xf32>
    %86 = vector.extract_strided_slice %38 {offsets = [0, 24], sizes = [16, 8], strides = [1, 1]} : vector<16x32xf32> to vector<16x8xf32>
    %87 = vector.extract_strided_slice %39 {offsets = [0, 24], sizes = [16, 8], strides = [1, 1]} : vector<16x32xf32> to vector<16x8xf32>
    %cst_36 = arith.constant dense<0.000000e+00> : vector<16x16xf32>
    %88 = tpu.matmul %85, %86, %cst_36 {dimension_numbers = #tpu.dot_dimension_numbers<[1], [1], [0], [0], [0, 0, 1, 0], [], []>, precision = #tpu.contract_precision<fp32>} : vector<16x8xf32>, vector<16x8xf32>, vector<16x16xf32> -> vector<16x16xf32>
    %cst_37 = arith.constant dense<0xFF800000> : vector<16xf32>
    %89 = vector.multi_reduction <maximumf>, %88, %cst_37 [1] : vector<16x16xf32> to vector<16xf32>
    %90 = vector.shape_cast %89 : vector<16xf32> to vector<16x1xf32>
    %91 = vector.broadcast %90 : vector<16x1xf32> to vector<16x16xf32>
    %92 = arith.subf %88, %91 : vector<16x16xf32>
    %93 = math.exp %92 : vector<16x16xf32>
    %cst_38 = arith.constant dense<0.000000e+00> : vector<16xf32>
    %94 = vector.multi_reduction <add>, %93, %cst_38 [1] : vector<16x16xf32> to vector<16xf32>
    %95 = vector.shape_cast %94 : vector<16xf32> to vector<16x1xf32>
    %96 = vector.broadcast %95 : vector<16x1xf32> to vector<16x16xf32>
    %97 = arith.divf %93, %96 : vector<16x16xf32>
    %cst_39 = arith.constant dense<0.000000e+00> : vector<16x8xf32>
    %98 = tpu.matmul %97, %87, %cst_39 {dimension_numbers = #tpu.dot_dimension_numbers<[1], [0], [0], [1], [0, 0, 1, 1], [], []>, precision = #tpu.contract_precision<fp32>} : vector<16x16xf32>, vector<16x8xf32>, vector<16x8xf32> -> vector<16x8xf32>
    %c0_40 = arith.constant 0 : index
    %c24 = arith.constant 24 : index
    %99 = vector.load %arg14[%c0_40, %c24] : memref<16x32xf32, #tpu.memory_space<vmem>>, vector<16x8xf32>
    tpu.vector_store %arg14[%c0_40, %c24], %98 {strides = array<i32>} : memref<16x32xf32, #tpu.memory_space<vmem>>, vector<16x8xf32>,
    %c0_41 = arith.constant 0 : index
    %c0_42 = arith.constant 0 : index
    %100 = vector.load %arg14[%c0_41, %c0_42] : memref<16x32xf32, #tpu.memory_space<vmem>>, vector<16x32xf32>
    %c0_43 = arith.constant 0 : index
    %c0_44 = arith.constant 0 : index
    %c0_45 = arith.constant 0 : index
    %101 = vector.load %arg7[%c0_43, %c0_44, %c0_45] : memref<1x32x32xf32, #tpu.memory_space<vmem>>, vector<1x32x32xf32>
    %102 = vector.shape_cast %101 : vector<1x32x32xf32> to vector<32x32xf32>
    %cst_46 = arith.constant dense<0.000000e+00> : vector<16x32xf32>
    %103 = tpu.matmul %100, %102, %cst_46 {dimension_numbers = #tpu.dot_dimension_numbers<[1], [0], [0], [1], [0, 0, 1, 1], [], []>, precision = #tpu.contract_precision<fp32>} : vector<16x32xf32>, vector<32x32xf32>, vector<16x32xf32> -> vector<16x32xf32>
    %104 = arith.addf %3, %103 : vector<16x32xf32>
    %c0_47 = arith.constant 0 : index
    %c2 = arith.constant 2 : index
    %c0_48 = arith.constant 0 : index
    %c0_49 = arith.constant 0 : index
    %105 = vector.load %arg11[%c0_47, %c2, %c0_48, %c0_49] : memref<1x6x1x32xf32, #tpu.memory_space<vmem>>, vector<1x1x1x32xf32>
    %106 = vector.shape_cast %105 : vector<1x1x1x32xf32> to vector<1x32xf32>
    %107 = vector.broadcast %106 : vector<1x32xf32> to vector<16x32xf32>
    %108 = arith.addf %104, %107 : vector<16x32xf32>
    %c0_50 = arith.constant 0 : index
    %c3 = arith.constant 3 : index
    %c0_51 = arith.constant 0 : index
    %c0_52 = arith.constant 0 : index
    %109 = vector.load %arg11[%c0_50, %c3, %c0_51, %c0_52] : memref<1x6x1x32xf32, #tpu.memory_space<vmem>>, vector<1x1x1x32xf32>
    %110 = vector.shape_cast %109 : vector<1x1x1x32xf32> to vector<1x32xf32>
    %c0_53 = arith.constant 0 : index
    %c4 = arith.constant 4 : index
    %c0_54 = arith.constant 0 : index
    %c0_55 = arith.constant 0 : index
    %111 = vector.load %arg11[%c0_53, %c4, %c0_54, %c0_55] : memref<1x6x1x32xf32, #tpu.memory_space<vmem>>, vector<1x1x1x32xf32>
    %112 = vector.shape_cast %111 : vector<1x1x1x32xf32> to vector<1x32xf32>
    %cst_56 = arith.constant dense<0.000000e+00> : vector<16xf32>
    %113 = vector.multi_reduction <add>, %108, %cst_56 [1] : vector<16x32xf32> to vector<16xf32>
    %114 = vector.shape_cast %113 : vector<16xf32> to vector<16x1xf32>
    %cst_57 = arith.constant 3.200000e+01 : f32
    %115 = vector.broadcast %cst_57 : f32 to vector<16x1xf32>
    %116 = arith.divf %114, %115 : vector<16x1xf32>
    %117 = vector.broadcast %116 : vector<16x1xf32> to vector<16x32xf32>
    %118 = arith.subf %108, %117 : vector<16x32xf32>
    %119 = arith.mulf %118, %118 : vector<16x32xf32>
    %cst_58 = arith.constant dense<0.000000e+00> : vector<16xf32>
    %120 = vector.multi_reduction <add>, %119, %cst_58 [1] : vector<16x32xf32> to vector<16xf32>
    %121 = vector.shape_cast %120 : vector<16xf32> to vector<16x1xf32>
    %cst_59 = arith.constant 3.200000e+01 : f32
    %122 = vector.broadcast %cst_59 : f32 to vector<16x1xf32>
    %123 = arith.divf %121, %122 : vector<16x1xf32>
    %124 = vector.broadcast %116 : vector<16x1xf32> to vector<16x32xf32>
    %125 = arith.subf %108, %124 : vector<16x32xf32>
    %cst_60 = arith.constant 9.99999974E-6 : f32
    %126 = vector.broadcast %cst_60 : f32 to vector<16x1xf32>
    %127 = arith.addf %123, %126 : vector<16x1xf32>
    %128 = math.rsqrt %127 : vector<16x1xf32>
    %129 = vector.broadcast %128 : vector<16x1xf32> to vector<16x32xf32>
    %130 = arith.mulf %125, %129 : vector<16x32xf32>
    %131 = vector.broadcast %110 : vector<1x32xf32> to vector<16x32xf32>
    %132 = arith.mulf %130, %131 : vector<16x32xf32>
    %133 = vector.broadcast %112 : vector<1x32xf32> to vector<16x32xf32>
    %134 = arith.addf %132, %133 : vector<16x32xf32>
    %c0_61 = arith.constant 0 : index
    %c0_62 = arith.constant 0 : index
    %c0_63 = arith.constant 0 : index
    %135 = vector.load %arg8[%c0_61, %c0_62, %c0_63] : memref<1x32x64xf32, #tpu.memory_space<vmem>>, vector<1x32x64xf32>
    %136 = vector.shape_cast %135 : vector<1x32x64xf32> to vector<32x64xf32>
    %cst_64 = arith.constant dense<0.000000e+00> : vector<16x64xf32>
    %137 = tpu.matmul %134, %136, %cst_64 {dimension_numbers = #tpu.dot_dimension_numbers<[1], [0], [0], [1], [0, 0, 1, 1], [], []>, precision = #tpu.contract_precision<fp32>} : vector<16x32xf32>, vector<32x64xf32>, vector<16x64xf32> -> vector<16x64xf32>
    %c0_65 = arith.constant 0 : index
    %c0_66 = arith.constant 0 : index
    %c0_67 = arith.constant 0 : index
    %138 = vector.load %arg9[%c0_65, %c0_66, %c0_67] : memref<1x1x64xf32, #tpu.memory_space<vmem>>, vector<1x1x64xf32>
    %139 = vector.shape_cast %138 : vector<1x1x64xf32> to vector<1x64xf32>
    %140 = vector.broadcast %139 : vector<1x64xf32> to vector<16x64xf32>
    %141 = arith.addf %137, %140 : vector<16x64xf32>
    %cst_68 = arith.constant 5.000000e-01 : f32
    %142 = vector.broadcast %cst_68 : f32 to vector<16x64xf32>
    %143 = arith.mulf %142, %141 : vector<16x64xf32>
    %cst_69 = arith.constant 0.707106769 : f32
    %144 = vector.broadcast %cst_69 : f32 to vector<16x64xf32>
    %145 = arith.mulf %141, %144 : vector<16x64xf32>
    %146 = math.erf %145 : vector<16x64xf32>
    %cst_70 = arith.constant 1.000000e+00 : f32
    %147 = vector.broadcast %cst_70 : f32 to vector<16x64xf32>
    %148 = arith.addf %147, %146 : vector<16x64xf32>
    %149 = arith.mulf %143, %148 : vector<16x64xf32>
    %c0_71 = arith.constant 0 : index
    %c0_72 = arith.constant 0 : index
    %c0_73 = arith.constant 0 : index
    %150 = vector.load %arg10[%c0_71, %c0_72, %c0_73] : memref<1x64x32xf32, #tpu.memory_space<vmem>>, vector<1x64x32xf32>
    %151 = vector.shape_cast %150 : vector<1x64x32xf32> to vector<64x32xf32>
    %cst_74 = arith.constant dense<0.000000e+00> : vector<16x32xf32>
    %152 = tpu.matmul %149, %151, %cst_74 {dimension_numbers = #tpu.dot_dimension_numbers<[1], [0], [0], [1], [0, 0, 1, 1], [], []>, precision = #tpu.contract_precision<fp32>} : vector<16x64xf32>, vector<64x32xf32>, vector<16x32xf32> -> vector<16x32xf32>
    %153 = arith.addf %108, %152 : vector<16x32xf32>
    %c0_75 = arith.constant 0 : index
    %c5 = arith.constant 5 : index
    %c0_76 = arith.constant 0 : index
    %c0_77 = arith.constant 0 : index
    %154 = vector.load %arg11[%c0_75, %c5, %c0_76, %c0_77] : memref<1x6x1x32xf32, #tpu.memory_space<vmem>>, vector<1x1x1x32xf32>
    %155 = vector.shape_cast %154 : vector<1x1x1x32xf32> to vector<1x32xf32>
    %156 = vector.broadcast %155 : vector<1x32xf32> to vector<16x32xf32>
    %157 = arith.addf %153, %156 : vector<16x32xf32>
    %c0_78 = arith.constant 0 : index
    %c0_79 = arith.constant 0 : index
    %158 = vector.load %arg13[%c0_78, %c0_79] : memref<16x32xf32, #tpu.memory_space<vmem>>, vector<16x32xf32>
    tpu.vector_store %arg13[%c0_78, %c0_79], %157 {strides = array<i32>} : memref<16x32xf32, #tpu.memory_space<vmem>>, vector<16x32xf32>,
    %c3_i32 = arith.constant 3 : i32
    %159 = arith.cmpi eq, %arg1, %c3_i32 : i32
    %160 = arith.extui %159 : i1 to i32
    %c0_i32_80 = arith.constant 0 : i32
    %161 = arith.cmpi ne, %160, %c0_i32_80 : i32
    scf.if %161 {
      %c3_81 = arith.constant 3 : index
      %c0_82 = arith.constant 0 : index
      %c0_83 = arith.constant 0 : index
      %162 = vector.load %arg4[%c3_81, %c0_82, %c0_83] : memref<5x1x32xf32, #tpu.memory_space<vmem>>, vector<1x1x32xf32>
      %163 = vector.shape_cast %162 : vector<1x1x32xf32> to vector<1x32xf32>
      %c4_84 = arith.constant 4 : index
      %c0_85 = arith.constant 0 : index
      %c0_86 = arith.constant 0 : index
      %164 = vector.load %arg4[%c4_84, %c0_85, %c0_86] : memref<5x1x32xf32, #tpu.memory_space<vmem>>, vector<1x1x32xf32>
      %165 = vector.shape_cast %164 : vector<1x1x32xf32> to vector<1x32xf32>
      %cst_87 = arith.constant dense<0.000000e+00> : vector<16xf32>
      %166 = vector.multi_reduction <add>, %157, %cst_87 [1] : vector<16x32xf32> to vector<16xf32>
      %167 = vector.shape_cast %166 : vector<16xf32> to vector<16x1xf32>
      %cst_88 = arith.constant 3.200000e+01 : f32
      %168 = vector.broadcast %cst_88 : f32 to vector<16x1xf32>
      %169 = arith.divf %167, %168 : vector<16x1xf32>
      %170 = vector.broadcast %169 : vector<16x1xf32> to vector<16x32xf32>
      %171 = arith.subf %157, %170 : vector<16x32xf32>
      %172 = arith.mulf %171, %171 : vector<16x32xf32>
      %cst_89 = arith.constant dense<0.000000e+00> : vector<16xf32>
      %173 = vector.multi_reduction <add>, %172, %cst_89 [1] : vector<16x32xf32> to vector<16xf32>
      %174 = vector.shape_cast %173 : vector<16xf32> to vector<16x1xf32>
      %cst_90 = arith.constant 3.200000e+01 : f32
      %175 = vector.broadcast %cst_90 : f32 to vector<16x1xf32>
      %176 = arith.divf %174, %175 : vector<16x1xf32>
      %177 = vector.broadcast %169 : vector<16x1xf32> to vector<16x32xf32>
      %178 = arith.subf %157, %177 : vector<16x32xf32>
      %cst_91 = arith.constant 9.99999974E-6 : f32
      %179 = vector.broadcast %cst_91 : f32 to vector<16x1xf32>
      %180 = arith.addf %176, %179 : vector<16x1xf32>
      %181 = math.rsqrt %180 : vector<16x1xf32>
      %182 = vector.broadcast %181 : vector<16x1xf32> to vector<16x32xf32>
      %183 = arith.mulf %178, %182 : vector<16x32xf32>
      %184 = vector.broadcast %163 : vector<1x32xf32> to vector<16x32xf32>
      %185 = arith.mulf %183, %184 : vector<16x32xf32>
      %186 = vector.broadcast %165 : vector<1x32xf32> to vector<16x32xf32>
      %187 = arith.addf %185, %186 : vector<16x32xf32>
      %c0_92 = arith.constant 0 : index
      %c0_93 = arith.constant 0 : index
      %c0_94 = arith.constant 0 : index
      %188 = vector.load %arg12[%c0_92, %c0_93, %c0_94] : memref<1x16x32xf32, #tpu.memory_space<vmem>>, vector<1x16x32xf32>
      %189 = vector.shape_cast %188 : vector<1x16x32xf32> to vector<16x32xf32>
      %190 = vector.shape_cast %187 : vector<16x32xf32> to vector<1x16x32xf32>
      tpu.vector_store %arg12[%c0_92, %c0_93, %c0_94], %190 {strides = array<i32>} : memref<1x16x32xf32, #tpu.memory_space<vmem>>, vector<1x16x32xf32>,
    } else {
    }
    return
  }
  func.func @transform_0(%arg0: i32, %arg1: i32) -> (i32, i32, i32) {
    %c0_i32 = arith.constant 0 : i32
    %c0_i32_0 = arith.constant 0 : i32
    %c0_i32_1 = arith.constant 0 : i32
    return %arg0, %c0_i32, %c0_i32_0 : i32, i32, i32
  }
  func.func @transform_1(%arg0: i32, %arg1: i32) -> (i32, i32) {
    %c0_i32 = arith.constant 0 : i32
    %c0_i32_0 = arith.constant 0 : i32
    %c0_i32_1 = arith.constant 0 : i32
    return %c0_i32, %c0_i32_0 : i32, i32
  }
  func.func @transform_2(%arg0: i32, %arg1: i32) -> (i32, i32, i32) {
    %c0_i32 = arith.constant 0 : i32
    %c0_i32_0 = arith.constant 0 : i32
    %c0_i32_1 = arith.constant 0 : i32
    %c0_i32_2 = arith.constant 0 : i32
    return %c0_i32, %c0_i32_0, %c0_i32_1 : i32, i32, i32
  }
  func.func @transform_3(%arg0: i32, %arg1: i32) -> (i32, i32, i32) {
    %c0_i32 = arith.constant 0 : i32
    %c0_i32_0 = arith.constant 0 : i32
    %c0_i32_1 = arith.constant 0 : i32
    return %arg1, %c0_i32, %c0_i32_0 : i32, i32, i32
  }
  func.func @transform_4(%arg0: i32, %arg1: i32) -> (i32, i32, i32) {
    %c0_i32 = arith.constant 0 : i32
    %c0_i32_0 = arith.constant 0 : i32
    %c0_i32_1 = arith.constant 0 : i32
    return %arg1, %c0_i32, %c0_i32_0 : i32, i32, i32
  }
  func.func @transform_5(%arg0: i32, %arg1: i32) -> (i32, i32, i32) {
    %c0_i32 = arith.constant 0 : i32
    %c0_i32_0 = arith.constant 0 : i32
    %c0_i32_1 = arith.constant 0 : i32
    return %arg1, %c0_i32, %c0_i32_0 : i32, i32, i32
  }
  func.func @transform_6(%arg0: i32, %arg1: i32) -> (i32, i32, i32) {
    %c0_i32 = arith.constant 0 : i32
    %c0_i32_0 = arith.constant 0 : i32
    %c0_i32_1 = arith.constant 0 : i32
    return %arg1, %c0_i32, %c0_i32_0 : i32, i32, i32
  }
  func.func @transform_7(%arg0: i32, %arg1: i32) -> (i32, i32, i32) {
    %c0_i32 = arith.constant 0 : i32
    %c0_i32_0 = arith.constant 0 : i32
    %c0_i32_1 = arith.constant 0 : i32
    return %arg1, %c0_i32, %c0_i32_0 : i32, i32, i32
  }
  func.func @transform_8(%arg0: i32, %arg1: i32) -> (i32, i32, i32) {
    %c0_i32 = arith.constant 0 : i32
    %c0_i32_0 = arith.constant 0 : i32
    %c0_i32_1 = arith.constant 0 : i32
    return %arg1, %c0_i32, %c0_i32_0 : i32, i32, i32
  }
  func.func @transform_9(%arg0: i32, %arg1: i32) -> (i32, i32, i32, i32) {
    %c0_i32 = arith.constant 0 : i32
    %c0_i32_0 = arith.constant 0 : i32
    %c0_i32_1 = arith.constant 0 : i32
    %c0_i32_2 = arith.constant 0 : i32
    return %arg1, %c0_i32, %c0_i32_0, %c0_i32_1 : i32, i32, i32, i32
  }
  func.func @transform_10(%arg0: i32, %arg1: i32) -> (i32, i32, i32) {
    %c0_i32 = arith.constant 0 : i32
    %c0_i32_0 = arith.constant 0 : i32
    %c0_i32_1 = arith.constant 0 : i32
    return %arg0, %c0_i32, %c0_i32_0 : i32, i32, i32
  }
}

</mosaic_0001>

<bundles_post_ra>
// kernel: fractal_enhancer_forward.1
= control target key start
LH: loop header
LB: loop body
LE: loop exit
PB: predicated region body
PF: predicated region fallthrough
CT: control target
= control target key end

     0   :  { %s10746_s0 = inlined_call_operand.vmem [shape: f32[2,16,64], index: 0, kind: input, shape index: {}]   ;;  %s10747_s1 = inlined_call_operand.vmem [shape: f32[64,32], index: 1, kind: input, shape index: {}]   ;;  %s10748_s2 = inlined_call_operand.vmem [shape: f32[5,1,32], index: 2, kind: input, shape index: {}]   ;;  %s10749_s3 = inlined_call_operand.vmem [shape: f32[4,32,96], index: 3, kind: input, shape index: {}]   ;;  %s10750_s4 = inlined_call_operand.vmem [shape: f32[4,1,96], index: 4, kind: input, shape index: {}]   ;;  %s10751_s5 = inlined_call_operand.vmem [shape: f32[4,32,32], index: 5, kind: input, shape index: {}]   ;;  %s10752_s6 = inlined_call_operand.vmem [shape: f32[4,32,64], index: 6, kind: input, shape index: {}]   ;;  %s10753_s7 = inlined_call_operand.vmem [shape: f32[4,1,64], index: 7, kind: input, shape index: {}]   ;;  %s10754_s8 = inlined_call_operand.vmem [shape: f32[4,64,32], index: 8, kind: input, shape index: {}]   ;;  %s10755_s9 = inlined_call_operand.vmem [shape: f32[4,6,1,32], index: 9, kind: input, shape index: {}]   ;;  %s10756_s10 = inlined_call_operand.hbm [shape: f32[2,16,32], index: 10, kind: output, shape index: {}]  }
   0x1   :  { %10769 = sst [smem:[#allocation17_spill]] %s10746_s0 }
   0x2   :  { %10770 = sst [smem:[#allocation18_spill]] %s10749_s3 }
   0x3   :  { %10771 = sst [smem:[#allocation19_spill]] %s10751_s5 }
   0x4   :  { %10772 = sst [smem:[#allocation20_spill]] %s10756_s10 }
   0x5   :  { %15 = vsyncpa [#allocation5], 0 }
   0x6   :  { %17 = vsyncpa [#allocation5 + $0x1], 0  ;;  %s9516_s13 = smov 0   ;;  %s9518_s14 = smov 0  }
   0x7   :  { %s9520_s15 = smov 0   ;;  %s9522_s16 = smov 0  }
   0x8   :  { %s9524_s17 = smov 0   ;;  %s9526_s18 = smov 0  }
   0x9   :  { %s9528_s19 = smov 0   ;;  %s9530_s20 = smov 0  }
   0xa LB: > { %10773 = sst [smem:[#allocation7_spill]] %s9415_s13  ;;  %s7977_s21 = sadd.s32 4294967295, %s9443_s20   ;;  %s9443_s20 = sphi %s9530_s20, %s23_s20   ;;  %s9439_s19 = sphi %s9528_s19, %s10800_s19   ;;  %s9435_s18 = sphi %s9526_s18, %s10799_s18   ;;  %s9431_s17 = sphi %s9524_s17, %s10798_s17   ;;  %s9427_s16 = sphi %s9522_s16, %s10797_s16   ;;  %s9423_s15 = sphi %s9520_s15, %s10796_s15   ;;  %s9419_s14 = sphi %s9518_s14, %s10802_s14   ;;  %s9415_s13 = sphi %s9516_s13, %s10801_s13  }
   0xb   : > { %10774 = sst [smem:[#allocation8_spill]] %s9423_s15  ;;  %s7978_s22 = sadd.s32 4294967294, %s9443_s20  }
   0xc   : > { %10775 = sst [smem:[#allocation9_spill]] %s9435_s18  ;;  %s32_s23 = sadd.s32 1, %s9435_s18 }
   0xd   : > { %10776 = sst [smem:[#allocation10_spill]] %s9439_s19  ;;  %p33_p0 = scmp.ge.s32.totalorder %s32_s23, 4 }
   0xe   : > { %10777 = sst [smem:[#allocation11_spill]] %s9443_s20  ;;  %s35_s24 = sadd.s32 1, %s9439_s19 }
   0xf   : > { %p302_p1 = scmp.ne.s32.totalorder %s9423_s15, %s9419_s14  ;;  %p303_p2 = scmp.eq.s32.totalorder %s7977_s21, 7 }
  0x10   : > { %s10804_s23 = smov (%p33_p0, %s32_s23), 0  ;;  %s10806_s24 = smov (!%p33_p0, %s35_s24), %s9439_s19 }
  0x11   : > { %10778 = sst [smem:[#allocation12_spill]] %s10804_s23  ;;  %p9565_p3 = por %p303_p2, %p302_p1 }
  0x12   : > { %p308_p4 = scmp.ne.s32.totalorder %s9419_s14, %s9415_s13  ;;  %p37_p5 = scmp.ge.s32.totalorder %s10806_s24, 2 }
  0x13   : > { %s10779_s25 = scalar_select %p9565_p3, 1, 0 }
  0x14   : > { %p309_p6 = scmp.eq.s32.totalorder %s7978_s22, 7  ;;  %p7981_p7 = scmp.ge.s32.totalorder %s9443_s20, 1 }
  0x15   : > { %10780 = sst [smem:[#allocation13_spill]] %s10779_s25  ;;  %p392_p8 = scmp.lt.s32.totalorder %s9443_s20, 9 }
  0x16   : > { %s10808_s24 = smov (%p37_p5, %s10806_s24), 0  ;;  %p9575_p9 = por %p309_p6, %p308_p4 }
  0x17   : > { %10781 = sst [smem:[#allocation14_spill]] %s10808_s24  ;;  %p393_p10 = pnand %p7981_p7, %p392_p8 }
  0x18   : > { %s10782_s26 = scalar_select %p9575_p9, 1, 0 }
  0x19   : > { %s289_s27 = ssub.s32 %s9439_s19, %s10808_s24  ;;  %s292_s28 = sadd.s32 1, %s9423_s15 }
  0x1a   : > { %10783 = sst [smem:[#allocation15_spill]] %s10782_s26  ;;  %p290_p11 = scmp.eq.s32.totalorder %s289_s27, 0 }
  0x1b   : > { %396 = sbr.rel (%p393_p10) target bundleno = 5218 (0x1462), region = 60  ;;  %s10760_s30 = sand.u32 (!%p393_p10), 1, %s9419_s14  }
  0x1c   : > { %s9583_s29 = scalar_select %p290_p11, %s9423_s15, %s292_s28  }
  0x1d   : > { %p460_p12 = scmp.lt.s32.totalorder (!%p393_p10), %s9431_s17, 1  ;;  %s7982_s11 = sshll.u32 (!%p393_p10), %s10760_s30, 4 }
  0x1e   : > { %10784 = sst [smem:[#allocation16_spill]] %s9583_s29  ;;  %p465_p13 = scmp.lt.s32.totalorder (!%p393_p10), %s9427_s16, 3 }
  0x1f   : > { %s10785_s0 = sld [smem:[#allocation17_spill]] (!%p393_p10)  ;;  %p7993_p0 = scmp.ne.s32.totalorder (!%p393_p10), %s9427_s16, 0 }
  0x20   : > { %s461_s12 = scalar_select %p460_p12, %s9431_s17, 1 }
  0x21   : > { %s9592_s21 = scalar_select %p465_p13, %s9427_s16, 3 }
  0x22   : > { %s8022_s22 = sshll.u32 %s461_s12, 4  ;;  %s10786_s3 = sld [smem:[#allocation18_spill]] }
  0x23   : > { %s8023_s23 = sshll.u32 %s9592_s21, 5  ;;  %s10787_s5 = sld [smem:[#allocation19_spill]] }
  0x24   : > { %s485_s18 = scalar_lea.vmem %s10753_s7, %s9592_s21  ;;  %s8026_s19 = sshll.u32 %s9592_s21, 6 }
  0x25   : > { %s9597_s24 = scalar_lea.vmem %s10785_s0, %s8022_s22  ;;  %s9617_s22 = scalar_lea.vmem %s10752_s6, %s8023_s23 }
  0x26   : > { %s9627_s15 = scalar_lea.vmem %s10754_s8, %s8026_s19  ;;  %s9210_s29 = smul.u32 6, %s9592_s21 }
  0x27   : > { %498 = sbr.rel (%p7993_p0) target bundleno = 617 (0x269), region = 64 }
  0x28   : > { %s9603_s30 = scalar_lea.vmem %s10786_s3, %s8023_s23  ;;  %s9633_s20 = scalar_lea.vmem %s10755_s9, %s9210_s29 }
  0x29   : > { %s9612_s10 = scalar_lea.vmem %s10787_s5, %s8023_s23  ;;  %s9635_s5 = scalar_lea.vmem [#allocation4], %s7982_s11 }
  0x2c   : > { %v508_v0 = vld [vmem:[%s10747_s1 + $0x38] sm:$0xff]  ;;  %v507_v1 = vld [vmem:[%s10747_s1 + $0x30] sm:$0xff]  ;;  %v506_v2 = vld [vmem:[%s10747_s1 + $0x28] sm:$0xff]  ;;  %vm516_vm0 = vcmask 523264   ;;  %vm1107_vm1 = vcmask 261120  }
  0x2d   : > { %v9647_v3 = vand.u32 4294901760, %v508_v0  ;;  %v9649_v4 = vand.u32 4294901760, %v507_v1  ;;  %v9651_v5 = vand.u32 4294901760, %v506_v2  ;;  %v505_v6 = vld [vmem:[%s10747_s1 + $0x20] sm:$0xff]  ;;  %v504_v7 = vld [vmem:[%s10747_s1 + $0x18] sm:$0xff]  ;;  %v503_v8 = vld [vmem:[%s10747_s1 + $0x10] sm:$0xff] }
  0x2e   : > { %v9662_v9 = vand.u32 4294901760, %v505_v6  ;;  %v9664_v10 = vand.u32 4294901760, %v504_v7  ;;  %v9666_v11 = vand.u32 4294901760, %v503_v8  ;;  %v502_v12 = vld [vmem:[%s10747_s1 + $0x8] sm:$0xff]  ;;  %v501_v13 = vld [vmem:[%s10747_s1] sm:$0xff] }
  0x2f   : > { %v499_v14 = vld [vmem:[%s9597_s24] sm:$0xff]  ;;  %8448 = vmatprep.subr.mxu0 %v9647_v3  ;;  %v9677_v15 = vsub.f32 %v508_v0, %v9647_v3  ;;  %v9680_v16 = vsub.f32 %v507_v1, %v9649_v4  ;;  %v9682_v17 = vand.u32 4294901760, %v502_v12  ;;  %v9685_v18 = vsub.f32 %v506_v2, %v9651_v5  ;;  %v500_v19 = vld [vmem:[%s9597_s24 + $0x8] sm:$0xff] }
  0x30   : > { %8449 = vmatpush3.msra.mxu0 %v9647_v3  ;;  %v9689_v20 = vand.u32 4294901760, %v501_v13  ;;  %v9692_v21 = vsub.f32 %v505_v6, %v9662_v9  ;;  %v518_v22 = vsel %vm516_vm0, %v499_v14, 0  ;;  %v521_v23 = vsel %vm516_vm0, %v500_v19, 0  ;;  %v7994_v1 = vld [vmem:[%s10748_s2] ss:$0 sm:$0xff] }
  0x31   : > { %8450 = vmatprep.subr.mxu0 %v9649_v4  ;;  %v9698_v24 = vand.u32 4294901760, %v9677_v15  ;;  %v9701_v25 = vand.u32 4294901760, %v9680_v16  ;;  %v9704_v26 = vand.u32 4294901760, %v9685_v18  ;;  %v9706_v27 = vand.u32 4294901760, %v518_v22 }
  0x32   : > { %8451 = vmatpush3.msra.mxu0 %v9649_v4  ;;  %v9710_v28 = vand.u32 4294901760, %v9692_v21  ;;  %v9712_v29 = vand.u32 4294901760, %v521_v23  ;;  %v9715_v30 = vsub.f32 %v504_v7, %v9664_v10  ;;  %v9718_v31 = vsub.f32 %v503_v8, %v9666_v11 }
  0x33   : > { %8452 = vmatprep.subr.mxu0 %v9651_v5  ;;  %v636_v32 = vsub.f32 %v9677_v15, %v9698_v24  ;;  %v643_v33 = vsub.f32 %v9680_v16, %v9701_v25  ;;  %v650_v34 = vsub.f32 %v9685_v18, %v9704_v26  ;;  %v9728_v35 = vsub.f32 %v518_v22, %v9706_v27 }
  0x34   : > { %8453 = vmatpush3.msra.mxu0 %v9651_v5  ;;  %v9732_v36 = vand.u32 4294901760, %v9715_v30  ;;  %v9735_v37 = vsub.f32 %v521_v23, %v9712_v29  ;;  %8483 = vmatprep.mubr.f32.mxu1 %v9706_v27  ;;  %v657_v40 = vsub.f32 %v9692_v21, %v9710_v28  ;;  %v9747_v44 = vand.u32 4294901760, %v9718_v31 }
  0x35   : > { %8454 = vmatprep.subr.mxu0 %v9662_v9  ;;  %v637_v38 = vand.u32 4294901760, %v636_v32  ;;  %v644_v39 = vand.u32 4294901760, %v643_v33  ;;  %v598_v41 = vand.u32 4294901760, %v9728_v35  ;;  %v651_v45 = vand.u32 4294901760, %v650_v34 }
  0x36   : > { %8455 = vmatpush3.msra.mxu0 %v9662_v9  ;;  %v664_v42 = vsub.f32 %v9715_v30, %v9732_v36  ;;  %v608_v43 = vand.u32 4294901760, %v9735_v37  ;;  %v676_v47 = vsub.f32 %v502_v12, %v9682_v17  ;;  %v683_v48 = vsub.f32 %v501_v13, %v9689_v20 }
  0x37   : > { %8456 = vmatprep.subr.mxu0 %v9664_v10  ;;  %8467 = vmatprep.subr.mxu1 %v637_v38  ;;  %v599_v46 = vsub.f32 %v9728_v35, %v598_v41  ;;  %v658_v50 = vand.u32 4294901760, %v657_v40  ;;  %v671_v52 = vsub.f32 %v9718_v31, %v9747_v44 }
  0x38   : > { %8457 = vmatpush3.msra.mxu0 %v9664_v10  ;;  %8468 = vmatpush3.msra.mxu1 %v637_v38  ;;  %v609_v49 = vsub.f32 %v9735_v37, %v608_v43  ;;  %v9760_v51 = vand.u32 4294901760, %v676_v47  ;;  %v9765_v53 = vand.u32 4294901760, %v683_v48  ;;  %v665_v55 = vand.u32 4294901760, %v664_v42  ;;  %v7997_v42 = vld [vmem:[%s10748_s2 + $0x1] ss:$0 sm:$0xff] }
  0x39   : > { %8458 = vmatprep.subr.mxu0 %v9666_v11  ;;  %8469 = vmatprep.subr.mxu1 %v644_v39  ;;  %v600_v54 = vand.u32 4294901760, %v599_v46  ;;  %v672_v58 = vand.u32 4294901760, %v671_v52 }
  0x3a   : > { %8459 = vmatpush3.msra.mxu0 %v9666_v11  ;;  %8470 = vmatpush3.msra.mxu1 %v644_v39  ;;  %v610_v56 = vand.u32 4294901760, %v609_v49  ;;  %v678_v57 = vsub.f32 %v676_v47, %v9760_v51  ;;  %v685_v59 = vsub.f32 %v683_v48, %v9765_v53 }
  0x3b   : > { %8460 = vmatprep.subr.mxu0 %v9682_v17  ;;  %8471 = vmatprep.subr.mxu1 %v651_v45 }
  0x3c   : > { %8461 = vmatpush3.msra.mxu0 %v9682_v17  ;;  %8472 = vmatpush3.msra.mxu1 %v651_v45  ;;  %v679_v60 = vand.u32 4294901760, %v678_v57  ;;  %v686_v61 = vand.u32 4294901760, %v685_v59 }
  0x3d   : > { %8462 = vmatprep.subr.mxu0 %v9689_v20  ;;  %8473 = vmatprep.subr.mxu1 %v658_v50 }
  0x3e   : > { %8463 = vmatpush3.msra.mxu0 %v9689_v20  ;;  %8474 = vmatpush3.msra.mxu1 %v658_v50 }
  0x3f   : > { %8464 = vmatprep.mubr.f32.mxu0 %v600_v54  ;;  %8475 = vmatprep.subr.mxu1 %v665_v55 }
  0x40   : > { %8486 = vmatprep.subr.mxu0 %v9677_v15  ;;  %8465 = vmatmul.mubr.f32.vlgmr.msra.gmra.mxu0 %v610_v56 }
  0x41   : > { %8476 = vmatpush3.msra.mxu1 %v665_v55  ;;  %8487 = vmatpush3.msra.mxu0 %v9677_v15 }
  0x42   : > { %8477 = vmatprep.subr.mxu1 %v672_v58  ;;  %8488 = vmatprep.subr.mxu0 %v9680_v16 }
  0x43   : > { %8478 = vmatpush3.msra.mxu1 %v672_v58  ;;  %8489 = vmatpush3.msra.mxu0 %v9680_v16 }
  0x44   : > { %8479 = vmatprep.subr.mxu1 %v679_v60  ;;  %8490 = vmatprep.subr.mxu0 %v9685_v18 }
  0x45   : > { %8480 = vmatpush3.msra.mxu1 %v679_v60  ;;  %8491 = vmatpush3.msra.mxu0 %v9685_v18 }
  0x46   : > { %8481 = vmatprep.subr.mxu1 %v686_v61  ;;  %8492 = vmatprep.subr.mxu0 %v9692_v21 }
  0x47   : > { %8482 = vmatpush3.msra.mxu1 %v686_v61  ;;  %8493 = vmatpush3.msra.mxu0 %v9692_v21 }
  0x48   : > { %8484 = vmatmul.mubr.f32.vlgmr.msra.gmra.mxu1 %v9712_v29  ;;  %8494 = vmatprep.subr.mxu0 %v9715_v30 }
  0x49   : > { %8505 = vmatprep.subr.mxu1 %v9647_v3  ;;  %8495 = vmatpush3.msra.mxu0 %v9715_v30 }
  0x4a   : > { %8506 = vmatpush3.msra.mxu1 %v9647_v3  ;;  %8496 = vmatprep.subr.mxu0 %v9718_v31 }
  0x4b   : > { %8507 = vmatprep.subr.mxu1 %v9649_v4  ;;  %8497 = vmatpush3.msra.mxu0 %v9718_v31 }
  0x4c   : > { %8508 = vmatpush3.msra.mxu1 %v9649_v4  ;;  %8498 = vmatprep.subr.mxu0 %v676_v47 }
  0x4d   : > { %8509 = vmatprep.subr.mxu1 %v9651_v5  ;;  %8499 = vmatpush3.msra.mxu0 %v676_v47 }
  0x4e   : > { %8510 = vmatpush3.msra.mxu1 %v9651_v5  ;;  %8500 = vmatprep.subr.mxu0 %v683_v48 }
  0x4f   : > { %8511 = vmatprep.subr.mxu1 %v9662_v9  ;;  %8501 = vmatpush3.msra.mxu0 %v683_v48 }
  0x50   : > { %8502 = vmatprep.mubr.f32.mxu0 %v9728_v35  ;;  %8512 = vmatpush3.msra.mxu1 %v9662_v9 }
  0x51   : > { %8503 = vmatmul.mubr.f32.vlgmr.msra.gmra.mxu0 %v9735_v37  ;;  %8513 = vmatprep.subr.mxu1 %v9664_v10 }
  0x52   : > { %8524 = vmatprep.subr.mxu0 %v9698_v24  ;;  %8514 = vmatpush3.msra.mxu1 %v9664_v10 }
  0x53   : > { %8525 = vmatpush3.msra.mxu0 %v9698_v24  ;;  %8515 = vmatprep.subr.mxu1 %v9666_v11 }
  0x54   : > { %8526 = vmatprep.subr.mxu0 %v9701_v25  ;;  %8516 = vmatpush3.msra.mxu1 %v9666_v11 }
  0x55   : > { %8527 = vmatpush3.msra.mxu0 %v9701_v25  ;;  %8517 = vmatprep.subr.mxu1 %v9682_v17 }
  0x56   : > { %8528 = vmatprep.subr.mxu0 %v9704_v26  ;;  %8518 = vmatpush3.msra.mxu1 %v9682_v17 }
  0x57   : > { %8529 = vmatpush3.msra.mxu0 %v9704_v26  ;;  %8519 = vmatprep.subr.mxu1 %v9689_v20 }
  0x58   : > { %8530 = vmatprep.subr.mxu0 %v9710_v28  ;;  %8520 = vmatpush3.msra.mxu1 %v9689_v20 }
  0x59   : > { %8521 = vmatprep.mubr.f32.mxu1 %v598_v41  ;;  %8531 = vmatpush3.msra.mxu0 %v9710_v28 }
  0x5a   : > { %8522 = vmatmul.mubr.f32.vlgmr.msra.gmra.mxu1 %v608_v43  ;;  %8532 = vmatprep.subr.mxu0 %v9732_v36 }
  0x5b   : > { %8543 = vmatprep.subr.mxu1 %v9647_v3  ;;  %8533 = vmatpush3.msra.mxu0 %v9732_v36 }
  0x5c   : > { %8544 = vmatpush3.msra.mxu1 %v9647_v3  ;;  %8534 = vmatprep.subr.mxu0 %v9747_v44 }
  0x5d   : > { %8545 = vmatprep.subr.mxu1 %v9649_v4  ;;  %8535 = vmatpush3.msra.mxu0 %v9747_v44  ;;  %v7998_v44 = vld [vmem:[%s10748_s2 + $0x2] ss:$0 sm:$0xff] }
  0x5e   : > { %8546 = vmatpush3.msra.mxu1 %v9649_v4  ;;  %8536 = vmatprep.subr.mxu0 %v9760_v51 }
  0x5f   : > { %8547 = vmatprep.subr.mxu1 %v9651_v5  ;;  %8537 = vmatpush3.msra.mxu0 %v9760_v51 }
  0x60   : > { %8548 = vmatpush3.msra.mxu1 %v9651_v5  ;;  %8538 = vmatprep.subr.mxu0 %v9765_v53 }
  0x61   : > { %8549 = vmatprep.subr.mxu1 %v9662_v9  ;;  %8539 = vmatpush3.msra.mxu0 %v9765_v53 }
  0x62   : > { %8540 = vmatprep.mubr.f32.mxu0 %v9706_v27  ;;  %8550 = vmatpush3.msra.mxu1 %v9662_v9 }
  0x63   : > { %8541 = vmatmul.mubr.f32.vlgmr.msra.gmra.mxu0 %v9712_v29  ;;  %8551 = vmatprep.subr.mxu1 %v9664_v10 }
  0x64   : > { %8552 = vmatpush3.msra.mxu1 %v9664_v10  ;;  %8559 = vmatprep.mubr.f32.mxu1 %v9706_v27 }
  0x65   : > { %8553 = vmatprep.subr.mxu1 %v9666_v11 }
  0x66   : > { %8554 = vmatpush3.msra.mxu1 %v9666_v11 }
  0x67   : > { %8555 = vmatprep.subr.mxu1 %v9682_v17 }
  0x68   : > { %8556 = vmatpush3.msra.mxu1 %v9682_v17 }
  0x69   : > { %8557 = vmatprep.subr.mxu1 %v9689_v20 }
  0x6a   : > { %8558 = vmatpush3.msra.mxu1 %v9689_v20 }
  0x6b   : > { %8560 = vmatmul.mubr.f32.vlgmr.msra.gmra.mxu1 %v9712_v29 }
 0x100   : > { %v8466_v62 = vpop.f32.mrf.mxu0 }
 0x101   : > { %v613_v7 = vadd.f32 %v8466_v62, %v7994_v1 }
 0x102   : > { %v602_v63 = vpop.f32.mrf.mxu0 }
 0x103   : > { %v603_v4 = vadd.f32 %v7994_v1, %v602_v63 }
 0x108   : > { %v8485_v0 = vpop.f32.mrf.mxu1 }
 0x109   : > { %v730_v11 = vadd.f32 %v8485_v0, %v613_v7 }
 0x10a   : > { %v723_v3 = vpop.f32.mrf.mxu1 }
 0x10b   : > { %v724_v9 = vadd.f32 %v723_v3, %v603_v4 }
 0x111   : > { %v8504_v2 = vpop.f32.mrf.mxu0 }
 0x112   : > { %v825_v14 = vadd.f32 %v8504_v2, %v730_v11 }
 0x113   : > { %v817_v5 = vpop.f32.mrf.mxu0 }
 0x114   : > { %v818_v12 = vadd.f32 %v817_v5, %v724_v9 }
 0x11a   : > { %v8523_v6 = vpop.f32.mrf.mxu1 }
 0x11b   : > { %v914_v17 = vadd.f32 %v8523_v6, %v825_v14 }
 0x11c   : > { %v905_v10 = vpop.f32.mrf.mxu1 }
 0x11d   : > { %v906_v15 = vadd.f32 %v905_v10, %v818_v12 }
 0x123   : > { %v8542_v8 = vpop.f32.mrf.mxu0 }
 0x124   : > { %v1015_v20 = vadd.f32 %v8542_v8, %v914_v17 }
 0x125   : > { %v1008_v13 = vpop.f32.mrf.mxu0 }
 0x126   : > { %v1009_v18 = vadd.f32 %v1008_v13, %v906_v15 }
 0x12b   : > { %v8561_v16 = vpop.f32.mrf.mxu1 }
 0x12c   : > { %v1100_v22 = vadd.f32 %v8561_v16, %v1015_v20 }
 0x12d   : > { %v1093_v19 = vpop.f32.mrf.mxu1 }
 0x12e   : > { %v1094_v21 = vadd.f32 %v1093_v19, %v1009_v18  ;;  %v1111_v24 = vsel %vm1107_vm1, %v1100_v22, 0.0 }
 0x130   : > { %v1108_v23 = vsel %vm1107_vm1, %v1094_v21, 0.0 }
 0x131   : > { %1109 = vadd.xlane.f32.xlu0 %v1108_v23 }
 0x135   : > { %1112 = vadd.xlane.f32.xlu0 %v1111_v24 }
 0x1ba   : > { %v1110_v25 = vpop.xlane.xlu0 %1109 }
 0x1bb   : > { %v1115_v26 = vmul.f32 0.03125, %v1110_v25 }
 0x1bd   : > { %v1117_v27 = vsub.f32 %v1094_v21, %v1115_v26 }
 0x1be   : > { %v1113_v28 = vpop.xlane.xlu0 %1112 }
 0x1bf   : > { %v1116_v29 = vmul.f32 0.03125, %v1113_v28  ;;  %v1119_v30 = vmul.f32 %v1117_v27, %v1117_v27 }
 0x1c1   : > { %v1118_v31 = vsub.f32 %v1100_v22, %v1116_v29  ;;  %v1121_v32 = vsel %vm1107_vm1, %v1119_v30, 0.0 }
 0x1c2   : > { %1122 = vadd.xlane.f32.xlu1 %v1121_v32 }
 0x1c3   : > { %v1120_v33 = vmul.f32 %v1118_v31, %v1118_v31 }
 0x1c5   : > { %v1124_v34 = vsel %vm1107_vm1, %v1120_v33, 0.0 }
 0x1c6   : > { %1125 = vadd.xlane.f32.xlu1 %v1124_v34 }
 0x24b   : > { %v1123_v35 = vpop.xlane.xlu1 %1122 }
 0x24c   : > { %v1127_v36 = vmul.f32 0.03125, %v1123_v35 }
 0x24e   : > { %v1129_v37 = vadd.f32 1e-05, %v1127_v36 }
 0x24f   : > { %v1126_v38 = vpop.xlane.xlu1 %1125 }
 0x250   : > { %9297 = vrsqrt.f32 %v1129_v37  ;;  %v1128_v39 = vmul.f32 0.03125, %v1126_v38 }
 0x252   : > { %v1130_v40 = vadd.f32 1e-05, %v1128_v39 }
 0x254   : > { %9299 = vrsqrt.f32 %v1130_v40 }
 0x25d   : > { %v9298_v41 = vpop.eup %9297 }
 0x25e   : > { %v1133_v43 = vmul.f32 %v9298_v41, %v1117_v27 }
 0x260   : > { %v1141_v45 = vmul.f32 %v7997_v42, %v1133_v43 }
 0x261   : > { %v9300_v46 = vpop.eup %9299 }
 0x262   : > { %v1149_v47 = vadd.f32 %v7998_v44, %v1141_v45  ;;  %v1134_v48 = vmul.f32 %v9300_v46, %v1118_v31 }
 0x264   : > { %1151 = vst.msk [vmem:[#allocation2] sm:$0xff] %vm1107_vm1, %v1149_v47  ;;  %v1142_v49 = vmul.f32 %v7997_v42, %v1134_v48 }
 0x266   : > { %v1150_v50 = vadd.f32 %v7998_v44, %v1142_v49 }
 0x268   : > { %1152 = vst.msk [vmem:[#allocation2 + $0x8] sm:$0xff] %vm1107_vm1, %v1150_v50 }
 0x269 PF: > { %vm1158_vm2 = vcmask 261120   ;;  %v1205_v1 = vld [vmem:[%s9603_s30 + $0x18] sm:$0xff]  ;;  %v1204_v2 = vld [vmem:[%s9603_s30 + $0x10] sm:$0xff]  ;;  %v1203_v3 = vld [vmem:[%s9603_s30 + $0x8] sm:$0xff]  ;;  %s10788_s29 = scalar_lea.vmem %s10750_s4, %s9592_s21  ;;  %s9445_s13 = smov 96   ;;  %vm1753_vm3 = vcmask 64512  }
 0x26a   : > { %v9870_v4 = vand.u32 4294901760, %v1205_v1  ;;  %v9872_v5 = vand.u32 4294901760, %v1204_v2  ;;  %v9874_v6 = vand.u32 4294901760, %v1203_v3  ;;  %v1202_v18 = vld [vmem:[%s9603_s30] sm:$0xff]  ;;  %vm2264_vm4 = vcmask 130048   ;;  %s9446_s23 = smov 64  }
 0x26b   : > { %v1153_v51 = vld [vmem:[#allocation2] sm:$0xff]  ;;  %v9907_v19 = vand.u32 4294901760, %v1202_v18  ;;  %s9447_s25 = smov 88   ;;  %s9448_s12 = smov 120   ;;  %vm3865_vm5 = vcmask 130112   ;;  %vm4930_vm6 = vcmask 195712  }
 0x26c   : > { %v1159_v53 = vsel %vm1158_vm2, %v1153_v51, 0.0  ;;  %v9877_v7 = vsub.f32 %v1205_v1, %v9870_v4  ;;  %v9880_v8 = vsub.f32 %v1204_v2, %v9872_v5  ;;  %v9883_v9 = vsub.f32 %v1203_v3, %v9874_v6  ;;  %8562 = vmatprep.subr.mxu0 %v9870_v4  ;;  %v8000_v32 = vld [vmem:[%s9633_s20] ss:$0 sm:$0xff]  ;;  %v8001_v34 = vld [vmem:[%s9633_s20 + $0x1] ss:$0 sm:$0xff]  ;;  %s9449_s0 = smov 56  }
 0x26d   : > { %1160 = vadd.xlane.f32.xlu0 %v1159_v53  ;;  %8563 = vmatpush3.msra.mxu0 %v9870_v4  ;;  %v9910_v21 = vsub.f32 %v1202_v18, %v9907_v19  ;;  %s9450_s24 = smov 80   ;;  %s9451_s3 = smov 112   ;;  %vm5995_vm7 = vcmask 261312   ;;  %vm7159_vm8 = vcmask 523264  }
 0x26e   : > { %v9888_v10 = vand.u32 4294901760, %v9877_v7  ;;  %v9891_v11 = vand.u32 4294901760, %v9880_v8  ;;  %v9894_v12 = vand.u32 4294901760, %v9883_v9  ;;  %8564 = vmatprep.subr.mxu0 %v9872_v5  ;;  %s9452_s27 = smov 48   ;;  %s9453_s26 = smov 72  }
 0x26f   : > { %v1154_v52 = vld [vmem:[#allocation2 + $0x8] sm:$0xff]  ;;  %8565 = vmatpush3.msra.mxu0 %v9872_v5  ;;  %v9915_v22 = vand.u32 4294901760, %v9910_v21  ;;  %s9454_s11 = smov 104   ;;  %s9455_s28 = smov 40  }
 0x270   : > { %v1162_v54 = vsel %vm1158_vm2, %v1154_v52, 0.0  ;;  %v1336_v13 = vsub.f32 %v9877_v7, %v9888_v10  ;;  %v1343_v14 = vsub.f32 %v9880_v8, %v9891_v11  ;;  %v1350_v15 = vsub.f32 %v9883_v9, %v9894_v12  ;;  %8566 = vmatprep.subr.mxu0 %v9874_v6  ;;  %s9456_s30 = smov 8   ;;  %s9457_s19 = smov 16  }
 0x271   : > { %1163 = vadd.xlane.f32.xlu0 %v1162_v54  ;;  %8567 = vmatpush3.msra.mxu0 %v9874_v6  ;;  %v1357_v23 = vsub.f32 %v9910_v21, %v9915_v22  ;;  %v8002_v54 = vld [vmem:[%s10788_s29] ss:$0 sm:$0xff]  ;;  %p8012_p1 = scmp.ne.s32.totalorder %s9427_s16, 3 }
 0x272   : > { %v1337_v16 = vand.u32 4294901760, %v1336_v13  ;;  %v1344_v17 = vand.u32 4294901760, %v1343_v14  ;;  %v1351_v20 = vand.u32 4294901760, %v1350_v15  ;;  %8568 = vmatprep.subr.mxu0 %v9907_v19 }
 0x273   : > { %8569 = vmatpush3.msra.mxu0 %v9907_v19  ;;  %v1358_v24 = vand.u32 4294901760, %v1357_v23 }
 0x274   : > { %8573 = vmatprep.subr.mxu1 %v1337_v16  ;;  %8584 = vmatprep.subr.mxu0 %v9877_v7 }
 0x275   : > { %8574 = vmatpush3.msra.mxu1 %v1337_v16 }
 0x276   : > { %8575 = vmatprep.subr.mxu1 %v1344_v17 }
 0x277   : > { %8576 = vmatpush3.msra.mxu1 %v1344_v17 }
 0x278   : > { %8577 = vmatprep.subr.mxu1 %v1351_v20 }
 0x279   : > { %8578 = vmatpush3.msra.mxu1 %v1351_v20 }
 0x27a   : > { %8579 = vmatprep.subr.mxu1 %v1358_v24 }
 0x27b   : > { %8580 = vmatpush3.msra.mxu1 %v1358_v24 }
 0x27c   : > { %8595 = vmatprep.subr.mxu1 %v9870_v4 }
 0x2f6   : > { %v1161_v55 = vpop.xlane.xlu0 %1160 }
 0x2f7   : > { %v1166_v56 = vmul.f32 0.03125, %v1161_v55 }
 0x2f9   : > { %v1168_v57 = vsub.f32 %v1153_v51, %v1166_v56 }
 0x2fa   : > { %v1164_v58 = vpop.xlane.xlu0 %1163 }
 0x2fb   : > { %v1167_v59 = vmul.f32 0.03125, %v1164_v58  ;;  %v1170_v60 = vmul.f32 %v1168_v57, %v1168_v57 }
 0x2fd   : > { %v9861_v61 = vsub.f32 %v1154_v52, %v1167_v59  ;;  %v1172_v62 = vsel %vm1158_vm2, %v1170_v60, 0.0 }
 0x2fe   : > { %1173 = vadd.xlane.f32.xlu1 %v1172_v62 }
 0x2ff   : > { %v1171_v63 = vmul.f32 %v9861_v61, %v9861_v61 }
 0x301   : > { %v1175_v0 = vsel %vm1158_vm2, %v1171_v63, 0.0 }
 0x302   : > { %1176 = vadd.xlane.f32.xlu1 %v1175_v0 }
 0x387   : > { %v1174_v25 = vpop.xlane.xlu1 %1173 }
 0x388   : > { %v1178_v26 = vmul.f32 0.03125, %v1174_v25 }
 0x38a   : > { %v1180_v27 = vadd.f32 1e-05, %v1178_v26 }
 0x38b   : > { %v1177_v28 = vpop.xlane.xlu1 %1176 }
 0x38c   : > { %9301 = vrsqrt.f32 %v1180_v27  ;;  %v1179_v29 = vmul.f32 0.03125, %v1177_v28 }
 0x38e   : > { %v1181_v30 = vadd.f32 1e-05, %v1179_v29 }
 0x390   : > { %9303 = vrsqrt.f32 %v1181_v30 }
 0x399   : > { %v9302_v31 = vpop.eup %9301 }
 0x39a   : > { %v1184_v33 = vmul.f32 %v9302_v31, %v1168_v57 }
 0x39c   : > { %v1192_v35 = vmul.f32 %v8000_v32, %v1184_v33 }
 0x39d   : > { %v9304_v36 = vpop.eup %9303 }
 0x39e   : > { %v1200_v37 = vadd.f32 %v8001_v34, %v1192_v35  ;;  %v1185_v38 = vmul.f32 %v9304_v36, %v9861_v61 }
 0x3a0   : > { %v1214_v39 = vsel %vm1158_vm2, %v1200_v37, 0  ;;  %v1193_v40 = vmul.f32 %v8000_v32, %v1185_v38 }
 0x3a1   : > { %v1288_v41 = vand.u32 4294901760, %v1214_v39 }
 0x3a2   : > { %v1201_v42 = vadd.f32 %v8001_v34, %v1193_v40 }
 0x3a3   : > { %8581 = vmatprep.mubr.f32.mxu1 %v1288_v41  ;;  %v1289_v43 = vsub.f32 %v1214_v39, %v1288_v41 }
 0x3a4   : > { %v1217_v44 = vsel %vm1158_vm2, %v1201_v42, 0 }
 0x3a5   : > { %v1298_v45 = vand.u32 4294901760, %v1217_v44  ;;  %v1290_v46 = vand.u32 4294901760, %v1289_v43 }
 0x3a7   : > { %v1299_v47 = vsub.f32 %v1217_v44, %v1298_v45  ;;  %8582 = vmatmul.mubr.f32.vlgmr.msra.gmra.mxu1 %v1298_v45  ;;  %v1291_v48 = vsub.f32 %v1289_v43, %v1290_v46 }
 0x3a8   : > { %8596 = vmatpush3.msra.mxu1 %v9870_v4  ;;  %8603 = vmatprep.mubr.f32.mxu1 %v1290_v46 }
 0x3a9   : > { %8597 = vmatprep.subr.mxu1 %v9872_v5  ;;  %v1292_v49 = vand.u32 4294901760, %v1291_v48  ;;  %v1300_v50 = vand.u32 4294901760, %v1299_v47 }
 0x3aa   : > { %8598 = vmatpush3.msra.mxu1 %v9872_v5 }
 0x3ab   : > { %8599 = vmatprep.subr.mxu1 %v9874_v6  ;;  %8570 = vmatprep.mubr.f32.mxu0 %v1292_v49  ;;  %v1301_v51 = vsub.f32 %v1299_v47, %v1300_v50 }
 0x3ac   : > { %8600 = vmatpush3.msra.mxu1 %v9874_v6 }
 0x3ad   : > { %8601 = vmatprep.subr.mxu1 %v9907_v19  ;;  %v1302_v52 = vand.u32 4294901760, %v1301_v51 }
 0x3ae   : > { %8602 = vmatpush3.msra.mxu1 %v9907_v19 }
 0x3af   : > { %8604 = vmatmul.mubr.f32.vlgmr.msra.gmra.mxu1 %v1300_v50  ;;  %8617 = vmatprep.subr.mxu1 %v9870_v4 }
 0x3b0   : > { %8571 = vmatmul.mubr.f32.vlgmr.msra.gmra.mxu0 %v1302_v52  ;;  %8618 = vmatpush3.msra.mxu1 %v9870_v4 }
 0x3b1   : > { %8585 = vmatpush3.msra.mxu0 %v9877_v7  ;;  %8625 = vmatprep.mubr.f32.mxu1 %v1288_v41 }
 0x3b2   : > { %8586 = vmatprep.subr.mxu0 %v9880_v8  ;;  %8592 = vmatprep.mubr.f32.mxu0 %v1289_v43 }
 0x3b3   : > { %8619 = vmatprep.subr.mxu1 %v9872_v5  ;;  %8587 = vmatpush3.msra.mxu0 %v9880_v8 }
 0x3b4   : > { %8620 = vmatpush3.msra.mxu1 %v9872_v5  ;;  %8588 = vmatprep.subr.mxu0 %v9883_v9 }
 0x3b5   : > { %8621 = vmatprep.subr.mxu1 %v9874_v6  ;;  %8589 = vmatpush3.msra.mxu0 %v9883_v9 }
 0x3b6   : > { %8622 = vmatpush3.msra.mxu1 %v9874_v6  ;;  %8590 = vmatprep.subr.mxu0 %v9910_v21 }
 0x3b7   : > { %8623 = vmatprep.subr.mxu1 %v9907_v19  ;;  %8591 = vmatpush3.msra.mxu0 %v9910_v21 }
 0x3b8   : > { %8624 = vmatpush3.msra.mxu1 %v9907_v19  ;;  %8593 = vmatmul.mubr.f32.vlgmr.msra.gmra.mxu0 %v1299_v47 }
 0x3b9   : > { %8606 = vmatprep.subr.mxu0 %v9888_v10  ;;  %8626 = vmatmul.mubr.f32.vlgmr.msra.gmra.mxu1 %v1298_v45 }
 0x3ba   : > { %8607 = vmatpush3.msra.mxu0 %v9888_v10  ;;  %8614 = vmatprep.mubr.f32.mxu0 %v1288_v41 }
 0x3bb   : > { %8608 = vmatprep.subr.mxu0 %v9891_v11 }
 0x3bc   : > { %8609 = vmatpush3.msra.mxu0 %v9891_v11 }
 0x3bd   : > { %8610 = vmatprep.subr.mxu0 %v9894_v12 }
 0x3be   : > { %8611 = vmatpush3.msra.mxu0 %v9894_v12 }
 0x3bf   : > { %8612 = vmatprep.subr.mxu0 %v9915_v22 }
 0x3c0   : > { %8613 = vmatpush3.msra.mxu0 %v9915_v22 }
 0x3c1   : > { %8615 = vmatmul.mubr.f32.vlgmr.msra.gmra.mxu0 %v1298_v45 }
 0x467   : > { %v8583_v55 = vpop.f32.mrf.mxu1 }
 0x469   : > { %v1395_v60 = vpop.f32.mrf.mxu1 }
 0x46f   : > { %v8605_v62 = vpop.f32.mrf.mxu1 }
 0x470   : > { %v8572_v53 = vpop.f32.mrf.mxu0 }
 0x471   : > { %v1305_v57 = vadd.f32 %v8572_v53, %v8002_v54  ;;  %v1565_v3 = vpop.f32.mrf.mxu1 }
 0x472   : > { %v1294_v56 = vpop.f32.mrf.mxu0 }
 0x473   : > { %v1295_v58 = vadd.f32 %v8002_v54, %v1294_v56  ;;  %v1402_v61 = vadd.f32 %v8583_v55, %v1305_v57 }
 0x475   : > { %v1396_v1 = vadd.f32 %v1395_v60, %v1295_v58 }
 0x478   : > { %v8594_v59 = vpop.f32.mrf.mxu0 }
 0x479   : > { %v1489_v0 = vadd.f32 %v8594_v59, %v1402_v61  ;;  %v8627_v5 = vpop.f32.mrf.mxu1 }
 0x47a   : > { %v1481_v63 = vpop.f32.mrf.mxu0 }
 0x47b   : > { %v1482_v2 = vadd.f32 %v1481_v63, %v1396_v1  ;;  %v1574_v4 = vadd.f32 %v8605_v62, %v1489_v0  ;;  %v1737_v12 = vpop.f32.mrf.mxu1 }
 0x47d   : > { %v1566_v8 = vadd.f32 %v1565_v3, %v1482_v2 }
 0x481   : > { %v8616_v6 = vpop.f32.mrf.mxu0 }
 0x482   : > { %v1663_v7 = vadd.f32 %v8616_v6, %v1574_v4 }
 0x483   : > { %v1656_v9 = vpop.f32.mrf.mxu0 }
 0x484   : > { %v9961_v10 = vadd.f32 %v8627_v5, %v1663_v7  ;;  %v1657_v11 = vadd.f32 %v1656_v9, %v1566_v8 }
 0x486   : > { %v9963_v13 = vadd.f32 %v1737_v12, %v1657_v11  ;;  %1751 = vrot.lane.b32.xlu0 %v9961_v10, %s9445_s13  ;;  %v1756_v20 = vsel %vm1753_vm3, %v9961_v10, 0 }
 0x487   : > { %v1839_v21 = vand.u32 4294901760, %v1756_v20 }
 0x488   : > { %1749 = vrot.lane.b32.xlu1 %v9963_v13, %s9445_s13  ;;  %v1754_v14 = vsel %vm1753_vm3, %v9963_v13, 0 }
 0x489   : > { %v1829_v15 = vand.u32 4294901760, %v1754_v14  ;;  %v1840_v22 = vsub.f32 %v1756_v20, %v1839_v21 }
 0x48b   : > { %8639 = vmatprep.mubr.f32.mxu1 %v1829_v15  ;;  %v1830_v16 = vsub.f32 %v1754_v14, %v1829_v15  ;;  %v1841_v27 = vand.u32 4294901760, %v1840_v22 }
 0x48d   : > { %v1831_v17 = vand.u32 4294901760, %v1830_v16  ;;  %v1842_v32 = vsub.f32 %v1840_v22, %v1841_v27 }
 0x48f   : > { %v1832_v18 = vsub.f32 %v1830_v16, %v1831_v17  ;;  %v1843_v36 = vand.u32 4294901760, %v1842_v32 }
 0x491   : > { %v1833_v19 = vand.u32 4294901760, %v1832_v18 }
 0x493   : > { %8632 = vmatprep.mubr.f32.mxu0 %v1833_v19 }
 0x4f8   : > { %v1752_v23 = vpop.permute.xlu0 %1751 }
 0x4f9   : > { %v1760_v24 = vsel %vm1753_vm3, %v1752_v23, 0 }
 0x4fa   : > { %v1791_v25 = vand.u32 4294901760, %v1760_v24  ;;  %v1750_v26 = vpop.permute.xlu1 %1749 }
 0x4fb   : > { %v1758_v28 = vsel %vm1753_vm3, %v1750_v26, 0 }
 0x4fc   : > { %v1879_v29 = vsub.f32 %v1760_v24, %v1791_v25  ;;  %v1794_v30 = vand.u32 4294901760, %v1758_v28  ;;  %8628 = vmatprep.subr.mxu0 %v1791_v25 }
 0x4fd   : > { %8629 = vmatpush3.xpose.msra.mxu0 %v1791_v25 }
 0x4fe   : > { %v1886_v31 = vsub.f32 %v1758_v28, %v1794_v30  ;;  %8630 = vmatprep.subr.mxu0 %v1794_v30  ;;  %v1880_v33 = vand.u32 4294901760, %v1879_v29 }
 0x500   : > { %v1881_v34 = vsub.f32 %v1879_v29, %v1880_v33  ;;  %v1887_v35 = vand.u32 4294901760, %v1886_v31 }
 0x501   : > { %8631 = vmatpush3.xpose.msra.mxu0 %v1794_v30 }
 0x502   : > { %8642 = vmatprep.subr.mxu0 %v1879_v29  ;;  %v1882_v37 = vand.u32 4294901760, %v1881_v34  ;;  %v1888_v38 = vsub.f32 %v1886_v31, %v1887_v35 }
 0x504   : > { %8633 = vmatmul.mubr.f32.vlgmr.msra.gmra.mxu0 %v1843_v36  ;;  %8635 = vmatprep.subr.mxu1 %v1882_v37  ;;  %v1889_v39 = vand.u32 4294901760, %v1888_v38 }
 0x505   : > { %8636 = vmatpush3.xpose.msra.mxu1 %v1882_v37  ;;  %8643 = vmatpush3.xpose.msra.mxu0 %v1879_v29 }
 0x506   : > { %8646 = vmatprep.mubr.f32.mxu0 %v1830_v16  ;;  %8637 = vmatprep.subr.mxu1 %v1889_v39 }
 0x507   : > { %8644 = vmatprep.subr.mxu0 %v1886_v31 }
 0x509   : > { %8638 = vmatpush3.xpose.msra.mxu1 %v1889_v39  ;;  %8645 = vmatpush3.xpose.msra.mxu0 %v1886_v31 }
 0x50a   : > { %8649 = vmatprep.subr.mxu1 %v1791_v25  ;;  %8656 = vmatprep.subr.mxu0 %v1880_v33 }
 0x50c   : > { %8640 = vmatmul.mubr.f32.vlgmr.msra.gmra.mxu1 %v1839_v21  ;;  %8647 = vmatmul.mubr.f32.vlgmr.msra.gmra.mxu0 %v1840_v22 }
 0x50d   : > { %8650 = vmatpush3.xpose.msra.mxu1 %v1791_v25  ;;  %8653 = vmatprep.mubr.f32.mxu1 %v1831_v17 }
 0x50e   : > { %8657 = vmatpush3.xpose.msra.mxu0 %v1880_v33  ;;  %8660 = vmatprep.mubr.f32.mxu0 %v1829_v15 }
 0x50f   : > { %8651 = vmatprep.subr.mxu1 %v1794_v30  ;;  %8658 = vmatprep.subr.mxu0 %v1887_v35 }
 0x511   : > { %8652 = vmatpush3.xpose.msra.mxu1 %v1794_v30 }
 0x512   : > { %8659 = vmatpush3.xpose.msra.mxu0 %v1887_v35  ;;  %8663 = vmatprep.subr.mxu1 %v1791_v25 }
 0x514   : > { %8654 = vmatmul.mubr.f32.vlgmr.msra.gmra.mxu1 %v1841_v27 }
 0x515   : > { %8661 = vmatmul.mubr.f32.vlgmr.msra.gmra.mxu0 %v1839_v21  ;;  %8664 = vmatpush3.xpose.msra.mxu1 %v1791_v25 }
 0x516   : > { %8667 = vmatprep.mubr.f32.mxu1 %v1829_v15  ;;  %8665 = vmatprep.subr.mxu1 %v1794_v30 }
 0x519   : > { %8666 = vmatpush3.xpose.msra.mxu1 %v1794_v30 }
 0x51c   : > { %8668 = vmatmul.mubr.f32.vlgmr.msra.gmra.mxu1 %v1839_v21 }
 0x5c4   : > { %v8634_v40 = vpop.f32.mrf.mxu0 }
 0x5c6   : > { %v1835_v42 = vpop.f32.mrf.mxu0 }
 0x5cc   : > { %v8641_v41 = vpop.f32.mrf.mxu1  ;;  %v8648_v45 = vpop.f32.mrf.mxu0 }
 0x5cd   : > { %v1933_v44 = vadd.f32 %v8641_v41, %v8634_v40 }
 0x5ce   : > { %v1926_v43 = vpop.f32.mrf.mxu1  ;;  %v2008_v49 = vpop.f32.mrf.mxu0 }
 0x5cf   : > { %v1927_v46 = vadd.f32 %v1926_v43, %v1835_v42  ;;  %v2016_v48 = vadd.f32 %v8648_v45, %v1933_v44 }
 0x5d1   : > { %v2009_v51 = vadd.f32 %v2008_v49, %v1927_v46 }
 0x5d4   : > { %v8655_v47 = vpop.f32.mrf.mxu1 }
 0x5d5   : > { %v2099_v52 = vadd.f32 %v8655_v47, %v2016_v48  ;;  %v8662_v53 = vpop.f32.mrf.mxu0 }
 0x5d6   : > { %v2090_v50 = vpop.f32.mrf.mxu1 }
 0x5d7   : > { %v2091_v54 = vadd.f32 %v2090_v50, %v2009_v51  ;;  %v2182_v55 = vadd.f32 %v8662_v53, %v2099_v52  ;;  %v2175_v56 = vpop.f32.mrf.mxu0 }
 0x5d9   : > { %v2176_v58 = vadd.f32 %v2175_v56, %v2091_v54 }
 0x5dc   : > { %v8669_v57 = vpop.f32.mrf.mxu1 }
 0x5dd   : > { %v2261_v59 = vadd.f32 %v8669_v57, %v2182_v55 }
 0x5de   : > { %v2254_v60 = vpop.f32.mrf.mxu1 }
 0x5df   : > { %v2255_v61 = vadd.f32 %v2254_v60, %v2176_v58  ;;  %v2268_v62 = vsel %vm2264_vm4, %v2261_v59, -inf }
 0x5e0   : > { %2269 = vmax.xlane.f32.xlu0 %v2268_v62 }
 0x5e1   : > { %v2265_v63 = vsel %vm2264_vm4, %v2255_v61, -inf }
 0x5e2   : > { %2266 = vmax.xlane.f32.xlu1 %v2265_v63 }
 0x669   : > { %v2270_v0 = vpop.xlane.xlu0 %2269 }
 0x66a   : > { %v2272_v1 = vsub.f32 %v2261_v59, %v2270_v0 }
 0x66b   : > { %v2267_v2 = vpop.xlane.xlu1 %2266 }
 0x66c   : > { %v2275_v3 = vmul.f32 1.442695, %v2272_v1  ;;  %v2271_v4 = vsub.f32 %v2255_v61, %v2267_v2 }
 0x66e   : > { %9305 = vpow2.f32 %v2275_v3  ;;  %v2273_v5 = vmul.f32 1.442695, %v2271_v4 }
 0x670   : > { %9307 = vpow2.f32 %v2273_v5 }
 0x67b   : > { %v9306_v6 = vpop.eup %9305 }
 0x67c   : > { %v2280_v7 = vsel %vm2264_vm4, %v9306_v6, 0.0 }
 0x67d   : > { %v9308_v8 = vpop.eup %9307  ;;  %2281 = vadd.xlane.f32.xlu1 %v2280_v7 }
 0x67e   : > { %v2277_v9 = vsel %vm2264_vm4, %v9308_v8, 0.0 }
 0x67f   : > { %2278 = vadd.xlane.f32.xlu0 %v2277_v9 }
 0x68e   : > { %2287 = vrot.lane.b32.xlu1 %v9963_v13, %s9446_s23 }
 0x692   : > { %2809 = vrot.lane.b32.xlu1 %v9961_v10, %s9447_s25 }
 0x695   : > { %2289 = vrot.lane.b32.xlu0 %v9961_v10, %s9446_s23 }
 0x696   : > { %2807 = vrot.lane.b32.xlu1 %v9963_v13, %s9447_s25 }
 0x699   : > { %2803 = vrot.lane.b32.xlu0 %v9963_v13, %s9448_s12 }
 0x69a   : > { %2805 = vrot.lane.b32.xlu1 %v9961_v10, %s9448_s12 }
 0x706   : > { %v2282_v11 = vpop.xlane.xlu1 %2281 }
 0x707   : > { %9309 = vrcp.f32 %v2282_v11 }
 0x708   : > { %v2279_v12 = vpop.xlane.xlu0 %2278 }
 0x709   : > { %9311 = vrcp.f32 %v2279_v12 }
 0x70a   : > { %v2288_v14 = vpop.permute.xlu1 %2287 }
 0x70b   : > { %v9983_v15 = vand.u32 4294901760, %v2288_v14 }
 0x70c   : > { %v2290_v16 = vpop.permute.xlu0 %2289 }
 0x70d   : > { %v9986_v17 = vsub.f32 %v2288_v14, %v9983_v15  ;;  %v2328_v18 = vand.u32 4294901760, %v2290_v16 }
 0x70e   : > { %v2810_v19 = vpop.permute.xlu1 %2809 }
 0x70f   : > { %v9988_v20 = vsub.f32 %v2290_v16, %v2328_v18  ;;  %8670 = vmatprep.subr.mxu0 %v2328_v18  ;;  %v9991_v21 = vand.u32 4294901760, %v9986_v17  ;;  %v2817_v22 = vsel %vm1753_vm3, %v2810_v19, 0 }
 0x710   : > { %8671 = vmatpush3.msra.mxu0 %v2328_v18  ;;  %v9999_v25 = vand.u32 4294901760, %v2817_v22  ;;  %v2804_v39 = vpop.permute.xlu0 %2803 }
 0x711   : > { %8672 = vmatprep.subr.mxu0 %v9983_v15  ;;  %v9996_v23 = vand.u32 4294901760, %v9988_v20  ;;  %v2425_v28 = vsub.f32 %v9986_v17, %v9991_v21  ;;  %v2811_v45 = vsel %vm1753_vm3, %v2804_v39, 0 }
 0x712   : > { %8673 = vmatpush3.msra.mxu0 %v9983_v15  ;;  %v2808_v24 = vpop.permute.xlu1 %2807  ;;  %v10010_v34 = vsub.f32 %v2817_v22, %v9999_v25  ;;  %v10028_v50 = vand.u32 4294901760, %v2811_v45 }
 0x713   : > { %v2815_v26 = vsel %vm1753_vm3, %v2808_v24, 0  ;;  %8684 = vmatprep.subr.mxu0 %v9988_v20  ;;  %v2418_v27 = vsub.f32 %v9988_v20, %v9996_v23  ;;  %v2426_v35 = vand.u32 4294901760, %v2425_v28 }
 0x714   : > { %v9310_v29 = vpop.eup %9309  ;;  %v10007_v33 = vand.u32 4294901760, %v2815_v26  ;;  %v10021_v44 = vand.u32 4294901760, %v10010_v34  ;;  %v2887_v58 = vsub.f32 %v2811_v45, %v10028_v50 }
 0x715   : > { %v2419_v30 = vand.u32 4294901760, %v2418_v27  ;;  %v2286_v31 = vmul.f32 %v9310_v29, %v9306_v6 }
 0x716   : > { %v9312_v32 = vpop.eup %9311  ;;  %v10017_v41 = vsub.f32 %v2815_v26, %v10007_v33  ;;  %v2806_v51 = vpop.permute.xlu1 %2805  ;;  %v2938_v52 = vsub.f32 %v10010_v34, %v10021_v44  ;;  %v2888_v63 = vand.u32 4294901760, %v2887_v58 }
 0x717   : > { %8677 = vmatprep.subr.mxu1 %v2419_v30  ;;  %v2284_v36 = vmul.f32 %v9312_v32, %v9308_v8  ;;  %v2297_v37 = vsel %vm2264_vm4, %v2286_v31, 0  ;;  %v2813_v55 = vsel %vm1753_vm3, %v2806_v51, 0 }
 0x718   : > { %8678 = vmatpush3.msra.mxu1 %v2419_v30  ;;  %v10013_v38 = vand.u32 4294901760, %v2297_v37  ;;  %v10026_v49 = vand.u32 4294901760, %v10017_v41  ;;  %v2939_v59 = vand.u32 4294901760, %v2938_v52  ;;  %v2896_v61 = vand.u32 4294901760, %v2813_v55 }
 0x719   : > { %8679 = vmatprep.subr.mxu1 %v2426_v35  ;;  %v2294_v40 = vsel %vm2264_vm4, %v2284_v36, 0  ;;  %v2889_v1 = vsub.f32 %v2887_v58, %v2888_v63 }
 0x71a   : > { %8680 = vmatpush3.msra.mxu1 %v2426_v35  ;;  %v2366_v42 = vand.u32 4294901760, %v2294_v40  ;;  %v2377_v43 = vsub.f32 %v2297_v37, %v10013_v38  ;;  %v2945_v57 = vsub.f32 %v10017_v41, %v10026_v49  ;;  %v2897_v0 = vsub.f32 %v2813_v55, %v2896_v61 }
 0x71b   : > { %8691 = vmatprep.subr.mxu1 %v2328_v18  ;;  %v2890_v3 = vand.u32 4294901760, %v2889_v1 }
 0x71c   : > { %8681 = vmatprep.mubr.f32.mxu1 %v2366_v42  ;;  %v2367_v46 = vsub.f32 %v2294_v40, %v2366_v42  ;;  %v2378_v47 = vand.u32 4294901760, %v2377_v43  ;;  %v2946_v62 = vand.u32 4294901760, %v2945_v57  ;;  %v2898_v2 = vand.u32 4294901760, %v2897_v0 }
 0x71d   : > { %8682 = vmatmul.mubr.f32.vlgmr.msra.gmra.mxu1 %v10013_v38 }
 0x71e   : > { %8692 = vmatpush3.msra.mxu1 %v2328_v18  ;;  %v2368_v48 = vand.u32 4294901760, %v2367_v46  ;;  %v2379_v53 = vsub.f32 %v2377_v43, %v2378_v47  ;;  %v2899_v4 = vsub.f32 %v2897_v0, %v2898_v2 }
 0x71f   : > { %8693 = vmatprep.subr.mxu1 %v9983_v15 }
 0x720   : > { %8694 = vmatpush3.msra.mxu1 %v9983_v15  ;;  %8695 = vmatprep.mubr.f32.mxu1 %v2368_v48  ;;  %v2369_v54 = vsub.f32 %v2367_v46, %v2368_v48  ;;  %v2380_v60 = vand.u32 4294901760, %v2379_v53  ;;  %v2900_v5 = vand.u32 4294901760, %v2899_v4 }
 0x721   : > { %8705 = vmatprep.subr.mxu1 %v2328_v18  ;;  %8696 = vmatmul.mubr.f32.vlgmr.msra.gmra.mxu1 %v2378_v47 }
 0x722   : > { %8706 = vmatpush3.msra.mxu1 %v2328_v18  ;;  %8709 = vmatprep.mubr.f32.mxu1 %v2366_v42  ;;  %v2370_v56 = vand.u32 4294901760, %v2369_v54 }
 0x723   : > { %8707 = vmatprep.subr.mxu1 %v9983_v15 }
 0x724   : > { %8708 = vmatpush3.msra.mxu1 %v9983_v15  ;;  %8674 = vmatprep.mubr.f32.mxu0 %v2370_v56 }
 0x725   : > { %8719 = vmatprep.subr.mxu1 %v2939_v59  ;;  %8675 = vmatmul.mubr.f32.vlgmr.msra.gmra.mxu0 %v2380_v60 }
 0x726   : > { %8685 = vmatpush3.msra.mxu0 %v9988_v20  ;;  %8710 = vmatmul.mubr.f32.vlgmr.msra.gmra.mxu1 %v10013_v38 }
 0x727   : > { %8720 = vmatpush3.xpose.msra.mxu1 %v2939_v59  ;;  %8686 = vmatprep.subr.mxu0 %v9986_v17 }
 0x728   : > { %8688 = vmatprep.mubr.f32.mxu0 %v2367_v46  ;;  %8721 = vmatprep.subr.mxu1 %v2946_v62 }
 0x729   : > { %8723 = vmatprep.mubr.f32.mxu1 %v10028_v50  ;;  %8687 = vmatpush3.msra.mxu0 %v9986_v17 }
 0x72a   : > { %8698 = vmatprep.subr.mxu0 %v9996_v23  ;;  %8689 = vmatmul.mubr.f32.vlgmr.msra.gmra.mxu0 %v2377_v43 }
 0x72b   : > { %8699 = vmatpush3.msra.mxu0 %v9996_v23  ;;  %8722 = vmatpush3.xpose.msra.mxu1 %v2946_v62 }
 0x72c   : > { %8700 = vmatprep.subr.mxu0 %v9991_v21  ;;  %8702 = vmatprep.mubr.f32.mxu0 %v2366_v42 }
 0x72d   : > { %8733 = vmatprep.subr.mxu1 %v9999_v25  ;;  %8701 = vmatpush3.msra.mxu0 %v9991_v21 }
 0x72e   : > { %8712 = vmatprep.subr.mxu0 %v9999_v25  ;;  %8724 = vmatmul.mubr.f32.vlgmr.msra.gmra.mxu1 %v2896_v61 }
 0x72f   : > { %8703 = vmatmul.mubr.f32.vlgmr.msra.gmra.mxu0 %v10013_v38  ;;  %8734 = vmatpush3.xpose.msra.mxu1 %v9999_v25 }
 0x730   : > { %8713 = vmatpush3.xpose.msra.mxu0 %v9999_v25  ;;  %8737 = vmatprep.mubr.f32.mxu1 %v2888_v63 }
 0x731   : > { %8714 = vmatprep.subr.mxu0 %v10007_v33  ;;  %8716 = vmatprep.mubr.f32.mxu0 %v2890_v3 }
 0x732   : > { %8735 = vmatprep.subr.mxu1 %v10007_v33 }
 0x733   : > { %8736 = vmatpush3.xpose.msra.mxu1 %v10007_v33 }
 0x734   : > { %8715 = vmatpush3.xpose.msra.mxu0 %v10007_v33  ;;  %8747 = vmatprep.subr.mxu1 %v9999_v25 }
 0x735   : > { %8726 = vmatprep.subr.mxu0 %v10010_v34 }
 0x736   : > { %8738 = vmatmul.mubr.f32.vlgmr.msra.gmra.mxu1 %v2898_v2 }
 0x737   : > { %8717 = vmatmul.mubr.f32.vlgmr.msra.gmra.mxu0 %v2900_v5  ;;  %8748 = vmatpush3.xpose.msra.mxu1 %v9999_v25 }
 0x738   : > { %8727 = vmatpush3.xpose.msra.mxu0 %v10010_v34  ;;  %8730 = vmatprep.mubr.f32.mxu0 %v2887_v58 }
 0x739   : > { %8751 = vmatprep.mubr.f32.mxu1 %v10028_v50  ;;  %8728 = vmatprep.subr.mxu0 %v10017_v41 }
 0x73a   : > { %8749 = vmatprep.subr.mxu1 %v10007_v33 }
 0x73b   : > { %8750 = vmatpush3.xpose.msra.mxu1 %v10007_v33 }
 0x73c   : > { %8729 = vmatpush3.xpose.msra.mxu0 %v10017_v41 }
 0x73d   : > { %8740 = vmatprep.subr.mxu0 %v10021_v44 }
 0x73e   : > { %8752 = vmatmul.mubr.f32.vlgmr.msra.gmra.mxu1 %v2896_v61 }
 0x73f   : > { %8731 = vmatmul.mubr.f32.vlgmr.msra.gmra.mxu0 %v2897_v0 }
 0x740   : > { %8741 = vmatpush3.xpose.msra.mxu0 %v10021_v44  ;;  %8744 = vmatprep.mubr.f32.mxu0 %v10028_v50 }
 0x741   : > { %8742 = vmatprep.subr.mxu0 %v10026_v49 }
 0x744   : > { %8743 = vmatpush3.xpose.msra.mxu0 %v10026_v49 }
 0x747   : > { %8745 = vmatmul.mubr.f32.vlgmr.msra.gmra.mxu0 %v2896_v61 }
 0x7dd   : > { %v8683_v6 = vpop.f32.mrf.mxu1 }
 0x7df   : > { %v2463_v7 = vpop.f32.mrf.mxu1 }
 0x7e1   : > { %v8697_v9 = vpop.f32.mrf.mxu1 }
 0x7e3   : > { %v2627_v15 = vpop.f32.mrf.mxu1 }
 0x7e5   : > { %v8676_v8 = vpop.f32.mrf.mxu0 }
 0x7e6   : > { %v2470_v12 = vadd.f32 %v8683_v6, %v8676_v8  ;;  %v8711_v21 = vpop.f32.mrf.mxu1 }
 0x7e7   : > { %v2372_v11 = vpop.f32.mrf.mxu0 }
 0x7e8   : > { %v2464_v16 = vadd.f32 %v2463_v7, %v2372_v11  ;;  %v2791_v28 = vpop.f32.mrf.mxu1 }
 0x7ea   : > { %v8690_v14 = vpop.f32.mrf.mxu0 }
 0x7eb   : > { %v2553_v17 = vadd.f32 %v8690_v14, %v2470_v12 }
 0x7ec   : > { %v2545_v18 = vpop.f32.mrf.mxu0 }
 0x7ed   : > { %v2546_v19 = vadd.f32 %v2545_v18, %v2464_v16  ;;  %v2636_v20 = vadd.f32 %v8697_v9, %v2553_v17 }
 0x7ee   : > { %v8725_v31 = vpop.f32.mrf.mxu1 }
 0x7ef   : > { %v8704_v22 = vpop.f32.mrf.mxu0  ;;  %v2628_v23 = vadd.f32 %v2627_v15, %v2546_v19 }
 0x7f0   : > { %v2719_v24 = vadd.f32 %v8704_v22, %v2636_v20  ;;  %v2983_v33 = vpop.f32.mrf.mxu1 }
 0x7f1   : > { %v2712_v25 = vpop.f32.mrf.mxu0 }
 0x7f2   : > { %v2798_v26 = vadd.f32 %v8711_v21, %v2719_v24  ;;  %v2713_v27 = vadd.f32 %v2712_v25, %v2628_v23 }
 0x7f4   : > { %2802 = vst.msk [vmem:[#allocation3 + $0x8] sm:$0xff] %vm1753_vm3, %v2798_v26  ;;  %v2792_v29 = vadd.f32 %v2791_v28, %v2713_v27 }
 0x7f6   : > { %2801 = vst.msk [vmem:[#allocation3] sm:$0xff] %vm1753_vm3, %v2792_v29  ;;  %v8739_v36 = vpop.f32.mrf.mxu1 }
 0x7f7   : > { %v8718_v30 = vpop.f32.mrf.mxu0 }
 0x7f8   : > { %v2990_v35 = vadd.f32 %v8725_v31, %v8718_v30  ;;  %v3147_v41 = vpop.f32.mrf.mxu1 }
 0x7f9   : > { %v2892_v32 = vpop.f32.mrf.mxu0 }
 0x7fa   : > { %v2984_v38 = vadd.f32 %v2983_v33, %v2892_v32 }
 0x7fe   : > { %v8753_v43 = vpop.f32.mrf.mxu1 }
 0x7ff   : > { %v8732_v34 = vpop.f32.mrf.mxu0 }
 0x800   : > { %v3073_v39 = vadd.f32 %v8732_v34, %v2990_v35  ;;  %v3311_v50 = vpop.f32.mrf.mxu1 }
 0x801   : > { %v3065_v37 = vpop.f32.mrf.mxu0 }
 0x802   : > { %v3066_v40 = vadd.f32 %v3065_v37, %v2984_v38  ;;  %v3156_v42 = vadd.f32 %v8739_v36, %v3073_v39 }
 0x804   : > { %v3148_v46 = vadd.f32 %v3147_v41, %v3066_v40 }
 0x807   : > { %v8746_v44 = vpop.f32.mrf.mxu0 }
 0x808   : > { %v3239_v45 = vadd.f32 %v8746_v44, %v3156_v42 }
 0x809   : > { %v3232_v47 = vpop.f32.mrf.mxu0 }
 0x80a   : > { %v3233_v48 = vadd.f32 %v3232_v47, %v3148_v46  ;;  %v3318_v49 = vadd.f32 %v8753_v43, %v3239_v45 }
 0x80c   : > { %v3324_v51 = vsel %vm2264_vm4, %v3318_v49, -inf  ;;  %v3312_v52 = vadd.f32 %v3311_v50, %v3233_v48 }
 0x80d   : > { %3325 = vmax.xlane.f32.xlu1 %v3324_v51 }
 0x80e   : > { %v3321_v53 = vsel %vm2264_vm4, %v3312_v52, -inf }
 0x80f   : > { %3322 = vmax.xlane.f32.xlu0 %v3321_v53 }
 0x81e   : > { %3343 = vrot.lane.b32.xlu1 %v9963_v13, %s9449_s0 }
 0x822   : > { %3874 = vrot.lane.b32.xlu1 %v9961_v10, %s9450_s24 }
 0x826   : > { %3872 = vrot.lane.b32.xlu1 %v9963_v13, %s9450_s24 }
 0x82a   : > { %3870 = vrot.lane.b32.xlu1 %v9961_v10, %s9451_s3 }
 0x896   : > { %v3326_v54 = vpop.xlane.xlu1 %3325 }
 0x897   : > { %v3328_v55 = vsub.f32 %v3318_v49, %v3326_v54 }
 0x898   : > { %v3323_v56 = vpop.xlane.xlu0 %3322 }
 0x899   : > { %v3331_v57 = vmul.f32 1.442695, %v3328_v55  ;;  %v3327_v58 = vsub.f32 %v3312_v52, %v3323_v56 }
 0x89a   : > { %v3344_v0 = vpop.permute.xlu1 %3343 }
 0x89b   : > { %9313 = vpow2.f32 %v3331_v57  ;;  %v3329_v59 = vmul.f32 1.442695, %v3327_v58  ;;  %v10084_v2 = vand.u32 4294901760, %v3344_v0 }
 0x89d   : > { %9315 = vpow2.f32 %v3329_v59  ;;  %v10087_v5 = vsub.f32 %v3344_v0, %v10084_v2 }
 0x89e   : > { %v3875_v4 = vpop.permute.xlu1 %3874 }
 0x89f   : > { %v3882_v8 = vsel %vm1753_vm3, %v3875_v4, 0  ;;  %v10093_v11 = vand.u32 4294901760, %v10087_v5 }
 0x8a0   : > { %v10099_v16 = vand.u32 4294901760, %v3882_v8 }
 0x8a1   : > { %v3481_v19 = vsub.f32 %v10087_v5, %v10093_v11 }
 0x8a2   : > { %v3873_v12 = vpop.permute.xlu1 %3872  ;;  %v10114_v26 = vsub.f32 %v3882_v8, %v10099_v16 }
 0x8a3   : > { %v3880_v17 = vsel %vm1753_vm3, %v3873_v12, 0  ;;  %v3482_v27 = vand.u32 4294901760, %v3481_v19 }
 0x8a4   : > { %v10109_v24 = vand.u32 4294901760, %v3880_v17  ;;  %v10122_v35 = vand.u32 4294901760, %v10114_v26 }
 0x8a6   : > { %v10119_v32 = vsub.f32 %v3880_v17, %v10109_v24  ;;  %v3871_v40 = vpop.permute.xlu1 %3870  ;;  %v4003_v42 = vsub.f32 %v10114_v26, %v10122_v35 }
 0x8a7   : > { %v3878_v45 = vsel %vm1753_vm3, %v3871_v40, 0 }
 0x8a8   : > { %v9314_v60 = vpop.eup %9313  ;;  %v10127_v39 = vand.u32 4294901760, %v10119_v32  ;;  %v4004_v49 = vand.u32 4294901760, %v4003_v42  ;;  %v3961_v51 = vand.u32 4294901760, %v3878_v45 }
 0x8a9   : > { %v3336_v61 = vsel %vm2264_vm4, %v9314_v60, 0.0 }
 0x8aa   : > { %v9316_v62 = vpop.eup %9315  ;;  %3337 = vadd.xlane.f32.xlu0 %v3336_v61  ;;  %v4010_v47 = vsub.f32 %v10119_v32, %v10127_v39  ;;  %v3962_v54 = vsub.f32 %v3878_v45, %v3961_v51 }
 0x8ab   : > { %v3333_v63 = vsel %vm2264_vm4, %v9316_v62, 0.0 }
 0x8ac   : > { %v4011_v52 = vand.u32 4294901760, %v4010_v47  ;;  %v3963_v56 = vand.u32 4294901760, %v3962_v54 }
 0x8ae   : > { %3334 = vadd.xlane.f32.xlu0 %v3333_v63  ;;  %v3964_v58 = vsub.f32 %v3962_v54, %v3963_v56 }
 0x8b0   : > { %v3965_v59 = vand.u32 4294901760, %v3964_v58 }
 0x8c4   : > { %3345 = vrot.lane.b32.xlu0 %v9961_v10, %s9449_s0 }
 0x8c8   : > { %3868 = vrot.lane.b32.xlu0 %v9963_v13, %s9451_s3 }
 0x933   : > { %v3338_v1 = vpop.xlane.xlu0 %3337 }
 0x934   : > { %9317 = vrcp.f32 %v3338_v1 }
 0x937   : > { %v3335_v3 = vpop.xlane.xlu0 %3334 }
 0x938   : > { %9319 = vrcp.f32 %v3335_v3 }
 0x93b   : > { %v3346_v6 = vpop.permute.xlu0 %3345 }
 0x93c   : > { %v3384_v7 = vand.u32 4294901760, %v3346_v6 }
 0x93e   : > { %v10090_v9 = vsub.f32 %v3346_v6, %v3384_v7  ;;  %8754 = vmatprep.subr.mxu0 %v3384_v7 }
 0x93f   : > { %8755 = vmatpush3.msra.mxu0 %v3384_v7  ;;  %v3869_v30 = vpop.permute.xlu0 %3868 }
 0x940   : > { %8756 = vmatprep.subr.mxu0 %v10084_v2  ;;  %v10097_v14 = vand.u32 4294901760, %v10090_v9  ;;  %v3876_v36 = vsel %vm1753_vm3, %v3869_v30, 0 }
 0x941   : > { %v9318_v15 = vpop.eup %9317  ;;  %8757 = vmatpush3.msra.mxu0 %v10084_v2  ;;  %v10129_v41 = vand.u32 4294901760, %v3876_v36 }
 0x942   : > { %8768 = vmatprep.subr.mxu0 %v10090_v9  ;;  %v3474_v18 = vsub.f32 %v10090_v9, %v10097_v14  ;;  %v3342_v20 = vmul.f32 %v9318_v15, %v9314_v60 }
 0x943   : > { %v3952_v48 = vsub.f32 %v3876_v36, %v10129_v41 }
 0x944   : > { %v3475_v21 = vand.u32 4294901760, %v3474_v18  ;;  %v3353_v22 = vsel %vm2264_vm4, %v3342_v20, 0 }
 0x945   : > { %v9320_v23 = vpop.eup %9319  ;;  %v10111_v25 = vand.u32 4294901760, %v3353_v22  ;;  %v3953_v53 = vand.u32 4294901760, %v3952_v48 }
 0x946   : > { %8761 = vmatprep.subr.mxu1 %v3475_v21  ;;  %v3340_v28 = vmul.f32 %v9320_v23, %v9316_v62 }
 0x947   : > { %8762 = vmatpush3.msra.mxu1 %v3475_v21  ;;  %v3433_v29 = vsub.f32 %v3353_v22, %v10111_v25  ;;  %v3954_v55 = vsub.f32 %v3952_v48, %v3953_v53 }
 0x948   : > { %8763 = vmatprep.subr.mxu1 %v3482_v27  ;;  %v3350_v31 = vsel %vm2264_vm4, %v3340_v28, 0 }
 0x949   : > { %8764 = vmatpush3.msra.mxu1 %v3482_v27  ;;  %v3422_v33 = vand.u32 4294901760, %v3350_v31  ;;  %v3434_v34 = vand.u32 4294901760, %v3433_v29  ;;  %v3955_v57 = vand.u32 4294901760, %v3954_v55 }
 0x94a   : > { %8775 = vmatprep.subr.mxu1 %v3384_v7 }
 0x94b   : > { %8765 = vmatprep.mubr.f32.mxu1 %v3422_v33  ;;  %v3423_v37 = vsub.f32 %v3350_v31, %v3422_v33  ;;  %v3435_v43 = vsub.f32 %v3433_v29, %v3434_v34 }
 0x94c   : > { %8766 = vmatmul.mubr.f32.vlgmr.msra.gmra.mxu1 %v10111_v25 }
 0x94d   : > { %8776 = vmatpush3.msra.mxu1 %v3384_v7  ;;  %v3424_v38 = vand.u32 4294901760, %v3423_v37  ;;  %v3436_v50 = vand.u32 4294901760, %v3435_v43 }
 0x94e   : > { %8777 = vmatprep.subr.mxu1 %v10084_v2 }
 0x94f   : > { %8778 = vmatpush3.msra.mxu1 %v10084_v2  ;;  %8779 = vmatprep.mubr.f32.mxu1 %v3424_v38  ;;  %v3425_v44 = vsub.f32 %v3423_v37, %v3424_v38 }
 0x950   : > { %8789 = vmatprep.subr.mxu1 %v3384_v7  ;;  %8780 = vmatmul.mubr.f32.vlgmr.msra.gmra.mxu1 %v3434_v34 }
 0x951   : > { %8790 = vmatpush3.msra.mxu1 %v3384_v7  ;;  %8793 = vmatprep.mubr.f32.mxu1 %v3422_v33  ;;  %v3426_v46 = vand.u32 4294901760, %v3425_v44 }
 0x952   : > { %8791 = vmatprep.subr.mxu1 %v10084_v2 }
 0x953   : > { %8792 = vmatpush3.msra.mxu1 %v10084_v2  ;;  %8758 = vmatprep.mubr.f32.mxu0 %v3426_v46 }
 0x954   : > { %8803 = vmatprep.subr.mxu1 %v4004_v49  ;;  %8759 = vmatmul.mubr.f32.vlgmr.msra.gmra.mxu0 %v3436_v50 }
 0x955   : > { %8769 = vmatpush3.msra.mxu0 %v10090_v9  ;;  %8794 = vmatmul.mubr.f32.vlgmr.msra.gmra.mxu1 %v10111_v25 }
 0x956   : > { %8804 = vmatpush3.xpose.msra.mxu1 %v4004_v49  ;;  %8770 = vmatprep.subr.mxu0 %v10087_v5 }
 0x957   : > { %8772 = vmatprep.mubr.f32.mxu0 %v3423_v37  ;;  %8805 = vmatprep.subr.mxu1 %v4011_v52 }
 0x958   : > { %8807 = vmatprep.mubr.f32.mxu1 %v10129_v41  ;;  %8771 = vmatpush3.msra.mxu0 %v10087_v5 }
 0x959   : > { %8782 = vmatprep.subr.mxu0 %v10097_v14  ;;  %8773 = vmatmul.mubr.f32.vlgmr.msra.gmra.mxu0 %v3433_v29 }
 0x95a   : > { %8783 = vmatpush3.msra.mxu0 %v10097_v14  ;;  %8806 = vmatpush3.xpose.msra.mxu1 %v4011_v52 }
 0x95b   : > { %8784 = vmatprep.subr.mxu0 %v10093_v11  ;;  %8786 = vmatprep.mubr.f32.mxu0 %v3422_v33 }
 0x95c   : > { %8817 = vmatprep.subr.mxu1 %v10099_v16  ;;  %8785 = vmatpush3.msra.mxu0 %v10093_v11 }
 0x95d   : > { %8796 = vmatprep.subr.mxu0 %v10099_v16  ;;  %8808 = vmatmul.mubr.f32.vlgmr.msra.gmra.mxu1 %v3961_v51 }
 0x95e   : > { %8787 = vmatmul.mubr.f32.vlgmr.msra.gmra.mxu0 %v10111_v25  ;;  %8818 = vmatpush3.xpose.msra.mxu1 %v10099_v16 }
 0x95f   : > { %8797 = vmatpush3.xpose.msra.mxu0 %v10099_v16  ;;  %8821 = vmatprep.mubr.f32.mxu1 %v3953_v53 }
 0x960   : > { %8798 = vmatprep.subr.mxu0 %v10109_v24  ;;  %8800 = vmatprep.mubr.f32.mxu0 %v3955_v57 }
 0x961   : > { %8819 = vmatprep.subr.mxu1 %v10109_v24 }
 0x962   : > { %8820 = vmatpush3.xpose.msra.mxu1 %v10109_v24 }
 0x963   : > { %8799 = vmatpush3.xpose.msra.mxu0 %v10109_v24  ;;  %8831 = vmatprep.subr.mxu1 %v10099_v16 }
 0x964   : > { %8810 = vmatprep.subr.mxu0 %v10114_v26 }
 0x965   : > { %8822 = vmatmul.mubr.f32.vlgmr.msra.gmra.mxu1 %v3963_v56 }
 0x966   : > { %8801 = vmatmul.mubr.f32.vlgmr.msra.gmra.mxu0 %v3965_v59  ;;  %8832 = vmatpush3.xpose.msra.mxu1 %v10099_v16 }
 0x967   : > { %8811 = vmatpush3.xpose.msra.mxu0 %v10114_v26  ;;  %8814 = vmatprep.mubr.f32.mxu0 %v3952_v48 }
 0x968   : > { %8835 = vmatprep.mubr.f32.mxu1 %v10129_v41  ;;  %8812 = vmatprep.subr.mxu0 %v10119_v32 }
 0x969   : > { %8833 = vmatprep.subr.mxu1 %v10109_v24 }
 0x96a   : > { %8834 = vmatpush3.xpose.msra.mxu1 %v10109_v24 }
 0x96b   : > { %8813 = vmatpush3.xpose.msra.mxu0 %v10119_v32 }
 0x96c   : > { %8824 = vmatprep.subr.mxu0 %v10122_v35 }
 0x96d   : > { %8836 = vmatmul.mubr.f32.vlgmr.msra.gmra.mxu1 %v3961_v51 }
 0x96e   : > { %8815 = vmatmul.mubr.f32.vlgmr.msra.gmra.mxu0 %v3962_v54 }
 0x96f   : > { %8825 = vmatpush3.xpose.msra.mxu0 %v10122_v35  ;;  %8828 = vmatprep.mubr.f32.mxu0 %v10129_v41 }
 0x970   : > { %8826 = vmatprep.subr.mxu0 %v10127_v39 }
 0x973   : > { %8827 = vmatpush3.xpose.msra.mxu0 %v10127_v39 }
 0x976   : > { %8829 = vmatmul.mubr.f32.vlgmr.msra.gmra.mxu0 %v3961_v51 }
 0xa0c   : > { %v8767_v60 = vpop.f32.mrf.mxu1 }
 0xa0e   : > { %v3519_v61 = vpop.f32.mrf.mxu1 }
 0xa10   : > { %v8781_v0 = vpop.f32.mrf.mxu1 }
 0xa12   : > { %v3683_v4 = vpop.f32.mrf.mxu1 }
 0xa14   : > { %v8760_v62 = vpop.f32.mrf.mxu0 }
 0xa15   : > { %v3526_v63 = vadd.f32 %v8767_v60, %v8760_v62  ;;  %v8795_v9 = vpop.f32.mrf.mxu1 }
 0xa16   : > { %v3428_v1 = vpop.f32.mrf.mxu0 }
 0xa17   : > { %v3520_v2 = vadd.f32 %v3519_v61, %v3428_v1  ;;  %v3847_v18 = vpop.f32.mrf.mxu1 }
 0xa19   : > { %v8774_v3 = vpop.f32.mrf.mxu0 }
 0xa1a   : > { %v3609_v5 = vadd.f32 %v8774_v3, %v3526_v63 }
 0xa1b   : > { %v3601_v6 = vpop.f32.mrf.mxu0 }
 0xa1c   : > { %v3602_v7 = vadd.f32 %v3601_v6, %v3520_v2  ;;  %v3692_v8 = vadd.f32 %v8781_v0, %v3609_v5 }
 0xa1d   : > { %v8809_v21 = vpop.f32.mrf.mxu1 }
 0xa1e   : > { %v8788_v11 = vpop.f32.mrf.mxu0  ;;  %v3684_v12 = vadd.f32 %v3683_v4, %v3602_v7 }
 0xa1f   : > { %v3775_v14 = vadd.f32 %v8788_v11, %v3692_v8  ;;  %v4048_v23 = vpop.f32.mrf.mxu1 }
 0xa20   : > { %v3768_v15 = vpop.f32.mrf.mxu0 }
 0xa21   : > { %v10173_v16 = vadd.f32 %v8795_v9, %v3775_v14  ;;  %v3769_v17 = vadd.f32 %v3768_v15, %v3684_v12 }
 0xa23   : > { %v10175_v19 = vadd.f32 %v3847_v18, %v3769_v17 }
 0xa25   : > { %v8823_v26 = vpop.f32.mrf.mxu1 }
 0xa26   : > { %v8802_v20 = vpop.f32.mrf.mxu0 }
 0xa27   : > { %v4055_v25 = vadd.f32 %v8809_v21, %v8802_v20  ;;  %v4212_v31 = vpop.f32.mrf.mxu1 }
 0xa28   : > { %v3957_v22 = vpop.f32.mrf.mxu0 }
 0xa29   : > { %v4049_v28 = vadd.f32 %v4048_v23, %v3957_v22 }
 0xa2d   : > { %v8837_v33 = vpop.f32.mrf.mxu1 }
 0xa2e   : > { %v8816_v24 = vpop.f32.mrf.mxu0 }
 0xa2f   : > { %v4138_v29 = vadd.f32 %v8816_v24, %v4055_v25  ;;  %v4376_v40 = vpop.f32.mrf.mxu1 }
 0xa30   : > { %v4130_v27 = vpop.f32.mrf.mxu0 }
 0xa31   : > { %v4131_v30 = vadd.f32 %v4130_v27, %v4049_v28  ;;  %v4221_v32 = vadd.f32 %v8823_v26, %v4138_v29 }
 0xa33   : > { %v4213_v36 = vadd.f32 %v4212_v31, %v4131_v30 }
 0xa36   : > { %v8830_v34 = vpop.f32.mrf.mxu0 }
 0xa37   : > { %v4304_v35 = vadd.f32 %v8830_v34, %v4221_v32 }
 0xa38   : > { %v4297_v37 = vpop.f32.mrf.mxu0 }
 0xa39   : > { %v4298_v38 = vadd.f32 %v4297_v37, %v4213_v36  ;;  %v4383_v39 = vadd.f32 %v8837_v33, %v4304_v35 }
 0xa3b   : > { %v4389_v41 = vsel %vm2264_vm4, %v4383_v39, -inf  ;;  %v4377_v42 = vadd.f32 %v4376_v40, %v4298_v38 }
 0xa3c   : > { %4390 = vmax.xlane.f32.xlu1 %v4389_v41 }
 0xa3d   : > { %v4386_v43 = vsel %vm2264_vm4, %v4377_v42, -inf }
 0xa3e   : > { %4387 = vmax.xlane.f32.xlu0 %v4386_v43 }
 0xa4d   : > { %4408 = vrot.lane.b32.xlu1 %v9963_v13, %s9452_s27 }
 0xa51   : > { %4939 = vrot.lane.b32.xlu1 %v9961_v10, %s9453_s26 }
 0xa55   : > { %4937 = vrot.lane.b32.xlu1 %v9963_v13, %s9453_s26 }
 0xa59   : > { %4935 = vrot.lane.b32.xlu1 %v9961_v10, %s9454_s11 }
 0xac5   : > { %v4391_v44 = vpop.xlane.xlu1 %4390 }
 0xac6   : > { %v4393_v45 = vsub.f32 %v4383_v39, %v4391_v44 }
 0xac7   : > { %v4388_v46 = vpop.xlane.xlu0 %4387 }
 0xac8   : > { %v4396_v47 = vmul.f32 1.442695, %v4393_v45  ;;  %v4392_v48 = vsub.f32 %v4377_v42, %v4388_v46 }
 0xac9   : > { %v4409_v54 = vpop.permute.xlu1 %4408 }
 0xaca   : > { %9321 = vpow2.f32 %v4396_v47  ;;  %v4394_v49 = vmul.f32 1.442695, %v4392_v48  ;;  %v10187_v56 = vand.u32 4294901760, %v4409_v54 }
 0xacc   : > { %9323 = vpow2.f32 %v4394_v49  ;;  %v10190_v59 = vsub.f32 %v4409_v54, %v10187_v56 }
 0xacd   : > { %v4940_v58 = vpop.permute.xlu1 %4939 }
 0xace   : > { %v4947_v62 = vsel %vm1753_vm3, %v4940_v58, 0  ;;  %v10196_v0 = vand.u32 4294901760, %v10190_v59 }
 0xacf   : > { %v10202_v4 = vand.u32 4294901760, %v4947_v62 }
 0xad0   : > { %v4546_v7 = vsub.f32 %v10190_v59, %v10196_v0 }
 0xad1   : > { %v4938_v1 = vpop.permute.xlu1 %4937  ;;  %v10217_v17 = vsub.f32 %v4947_v62, %v10202_v4 }
 0xad2   : > { %v4945_v5 = vsel %vm1753_vm3, %v4938_v1, 0  ;;  %v4547_v18 = vand.u32 4294901760, %v4546_v7 }
 0xad3   : > { %v10212_v14 = vand.u32 4294901760, %v4945_v5  ;;  %v10225_v27 = vand.u32 4294901760, %v10217_v17 }
 0xad5   : > { %v10222_v24 = vsub.f32 %v4945_v5, %v10212_v14  ;;  %v4936_v32 = vpop.permute.xlu1 %4935  ;;  %v5068_v34 = vsub.f32 %v10217_v17, %v10225_v27 }
 0xad6   : > { %v4943_v37 = vsel %vm1753_vm3, %v4936_v32, 0 }
 0xad7   : > { %v9322_v50 = vpop.eup %9321  ;;  %v10230_v31 = vand.u32 4294901760, %v10222_v24  ;;  %v5069_v41 = vand.u32 4294901760, %v5068_v34  ;;  %v5026_v43 = vand.u32 4294901760, %v4943_v37 }
 0xad8   : > { %v4401_v51 = vsel %vm2264_vm4, %v9322_v50, 0.0 }
 0xad9   : > { %v9324_v52 = vpop.eup %9323  ;;  %4402 = vadd.xlane.f32.xlu0 %v4401_v51  ;;  %v5075_v39 = vsub.f32 %v10222_v24, %v10230_v31  ;;  %v5027_v46 = vsub.f32 %v4943_v37, %v5026_v43 }
 0xada   : > { %v4398_v53 = vsel %vm2264_vm4, %v9324_v52, 0.0 }
 0xadb   : > { %v5076_v44 = vand.u32 4294901760, %v5075_v39  ;;  %v5028_v48 = vand.u32 4294901760, %v5027_v46 }
 0xadd   : > { %4399 = vadd.xlane.f32.xlu0 %v4398_v53 }
 0xaf3   : > { %4410 = vrot.lane.b32.xlu0 %v9961_v10, %s9452_s27 }
 0xaf7   : > { %4933 = vrot.lane.b32.xlu0 %v9963_v13, %s9454_s11 }
 0xb62   : > { %v4403_v55 = vpop.xlane.xlu0 %4402 }
 0xb63   : > { %9325 = vrcp.f32 %v4403_v55 }
 0xb66   : > { %v4400_v57 = vpop.xlane.xlu0 %4399 }
 0xb67   : > { %9327 = vrcp.f32 %v4400_v57 }
 0xb6a   : > { %v4411_v60 = vpop.permute.xlu0 %4410 }
 0xb6b   : > { %v4449_v61 = vand.u32 4294901760, %v4411_v60 }
 0xb6d   : > { %v10193_v63 = vsub.f32 %v4411_v60, %v4449_v61  ;;  %8838 = vmatprep.subr.mxu0 %v4449_v61 }
 0xb6e   : > { %8839 = vmatpush3.msra.mxu0 %v4449_v61  ;;  %v4934_v22 = vpop.permute.xlu0 %4933 }
 0xb6f   : > { %8840 = vmatprep.subr.mxu0 %v10187_v56  ;;  %v10200_v2 = vand.u32 4294901760, %v10193_v63  ;;  %v4941_v28 = vsel %vm1753_vm3, %v4934_v22, 0 }
 0xb70   : > { %v9326_v3 = vpop.eup %9325  ;;  %8841 = vmatpush3.msra.mxu0 %v10187_v56  ;;  %v10232_v33 = vand.u32 4294901760, %v4941_v28 }
 0xb71   : > { %8852 = vmatprep.subr.mxu0 %v10193_v63  ;;  %v4539_v6 = vsub.f32 %v10193_v63, %v10200_v2  ;;  %v4407_v8 = vmul.f32 %v9326_v3, %v9322_v50  ;;  %v5029_v50 = vsub.f32 %v5027_v46, %v5028_v48 }
 0xb72   : > { %v5017_v40 = vsub.f32 %v4941_v28, %v10232_v33 }
 0xb73   : > { %v4540_v9 = vand.u32 4294901760, %v4539_v6  ;;  %v4418_v11 = vsel %vm2264_vm4, %v4407_v8, 0  ;;  %v5030_v51 = vand.u32 4294901760, %v5029_v50 }
 0xb74   : > { %v9328_v12 = vpop.eup %9327  ;;  %v10214_v15 = vand.u32 4294901760, %v4418_v11  ;;  %v5018_v45 = vand.u32 4294901760, %v5017_v40 }
 0xb75   : > { %8845 = vmatprep.subr.mxu1 %v4540_v9  ;;  %v4405_v20 = vmul.f32 %v9328_v12, %v9324_v52 }
 0xb76   : > { %8846 = vmatpush3.msra.mxu1 %v4540_v9  ;;  %v4498_v21 = vsub.f32 %v4418_v11, %v10214_v15  ;;  %v5019_v47 = vsub.f32 %v5017_v40, %v5018_v45 }
 0xb77   : > { %8847 = vmatprep.subr.mxu1 %v4547_v18  ;;  %v4415_v23 = vsel %vm2264_vm4, %v4405_v20, 0 }
 0xb78   : > { %8848 = vmatpush3.msra.mxu1 %v4547_v18  ;;  %v4487_v25 = vand.u32 4294901760, %v4415_v23  ;;  %v4499_v26 = vand.u32 4294901760, %v4498_v21  ;;  %v5020_v49 = vand.u32 4294901760, %v5019_v47 }
 0xb79   : > { %8859 = vmatprep.subr.mxu1 %v4449_v61 }
 0xb7a   : > { %8849 = vmatprep.mubr.f32.mxu1 %v4487_v25  ;;  %v4488_v29 = vsub.f32 %v4415_v23, %v4487_v25  ;;  %v4500_v35 = vsub.f32 %v4498_v21, %v4499_v26 }
 0xb7b   : > { %8850 = vmatmul.mubr.f32.vlgmr.msra.gmra.mxu1 %v10214_v15 }
 0xb7c   : > { %8860 = vmatpush3.msra.mxu1 %v4449_v61  ;;  %v4489_v30 = vand.u32 4294901760, %v4488_v29  ;;  %v4501_v42 = vand.u32 4294901760, %v4500_v35 }
 0xb7d   : > { %8861 = vmatprep.subr.mxu1 %v10187_v56 }
 0xb7e   : > { %8862 = vmatpush3.msra.mxu1 %v10187_v56  ;;  %8863 = vmatprep.mubr.f32.mxu1 %v4489_v30  ;;  %v4490_v36 = vsub.f32 %v4488_v29, %v4489_v30 }
 0xb7f   : > { %8873 = vmatprep.subr.mxu1 %v4449_v61  ;;  %8864 = vmatmul.mubr.f32.vlgmr.msra.gmra.mxu1 %v4499_v26 }
 0xb80   : > { %8874 = vmatpush3.msra.mxu1 %v4449_v61  ;;  %8877 = vmatprep.mubr.f32.mxu1 %v4487_v25  ;;  %v4491_v38 = vand.u32 4294901760, %v4490_v36 }
 0xb81   : > { %8875 = vmatprep.subr.mxu1 %v10187_v56 }
 0xb82   : > { %8876 = vmatpush3.msra.mxu1 %v10187_v56  ;;  %8842 = vmatprep.mubr.f32.mxu0 %v4491_v38 }
 0xb83   : > { %8887 = vmatprep.subr.mxu1 %v5069_v41  ;;  %8843 = vmatmul.mubr.f32.vlgmr.msra.gmra.mxu0 %v4501_v42 }
 0xb84   : > { %8853 = vmatpush3.msra.mxu0 %v10193_v63  ;;  %8878 = vmatmul.mubr.f32.vlgmr.msra.gmra.mxu1 %v10214_v15 }
 0xb85   : > { %8888 = vmatpush3.xpose.msra.mxu1 %v5069_v41  ;;  %8854 = vmatprep.subr.mxu0 %v10190_v59 }
 0xb86   : > { %8856 = vmatprep.mubr.f32.mxu0 %v4488_v29  ;;  %8889 = vmatprep.subr.mxu1 %v5076_v44 }
 0xb87   : > { %8891 = vmatprep.mubr.f32.mxu1 %v10232_v33  ;;  %8855 = vmatpush3.msra.mxu0 %v10190_v59 }
 0xb88   : > { %8866 = vmatprep.subr.mxu0 %v10200_v2  ;;  %8857 = vmatmul.mubr.f32.vlgmr.msra.gmra.mxu0 %v4498_v21 }
 0xb89   : > { %8867 = vmatpush3.msra.mxu0 %v10200_v2  ;;  %8890 = vmatpush3.xpose.msra.mxu1 %v5076_v44 }
 0xb8a   : > { %8868 = vmatprep.subr.mxu0 %v10196_v0  ;;  %8870 = vmatprep.mubr.f32.mxu0 %v4487_v25 }
 0xb8b   : > { %8901 = vmatprep.subr.mxu1 %v10202_v4  ;;  %8869 = vmatpush3.msra.mxu0 %v10196_v0 }
 0xb8c   : > { %8880 = vmatprep.subr.mxu0 %v10202_v4  ;;  %8892 = vmatmul.mubr.f32.vlgmr.msra.gmra.mxu1 %v5026_v43 }
 0xb8d   : > { %8871 = vmatmul.mubr.f32.vlgmr.msra.gmra.mxu0 %v10214_v15  ;;  %8902 = vmatpush3.xpose.msra.mxu1 %v10202_v4 }
 0xb8e   : > { %8881 = vmatpush3.xpose.msra.mxu0 %v10202_v4  ;;  %8905 = vmatprep.mubr.f32.mxu1 %v5018_v45 }
 0xb8f   : > { %8882 = vmatprep.subr.mxu0 %v10212_v14  ;;  %8884 = vmatprep.mubr.f32.mxu0 %v5020_v49 }
 0xb90   : > { %8903 = vmatprep.subr.mxu1 %v10212_v14 }
 0xb91   : > { %8904 = vmatpush3.xpose.msra.mxu1 %v10212_v14 }
 0xb92   : > { %8883 = vmatpush3.xpose.msra.mxu0 %v10212_v14  ;;  %8915 = vmatprep.subr.mxu1 %v10202_v4 }
 0xb93   : > { %8894 = vmatprep.subr.mxu0 %v10217_v17 }
 0xb94   : > { %8906 = vmatmul.mubr.f32.vlgmr.msra.gmra.mxu1 %v5028_v48 }
 0xb95   : > { %8885 = vmatmul.mubr.f32.vlgmr.msra.gmra.mxu0 %v5030_v51  ;;  %8916 = vmatpush3.xpose.msra.mxu1 %v10202_v4 }
 0xb96   : > { %8895 = vmatpush3.xpose.msra.mxu0 %v10217_v17  ;;  %8898 = vmatprep.mubr.f32.mxu0 %v5017_v40 }
 0xb97   : > { %8919 = vmatprep.mubr.f32.mxu1 %v10232_v33  ;;  %8896 = vmatprep.subr.mxu0 %v10222_v24 }
 0xb98   : > { %8917 = vmatprep.subr.mxu1 %v10212_v14 }
 0xb99   : > { %8918 = vmatpush3.xpose.msra.mxu1 %v10212_v14 }
 0xb9a   : > { %8897 = vmatpush3.xpose.msra.mxu0 %v10222_v24 }
 0xb9b   : > { %8908 = vmatprep.subr.mxu0 %v10225_v27 }
 0xb9c   : > { %8920 = vmatmul.mubr.f32.vlgmr.msra.gmra.mxu1 %v5026_v43 }
 0xb9d   : > { %8899 = vmatmul.mubr.f32.vlgmr.msra.gmra.mxu0 %v5027_v46 }
 0xb9e   : > { %8909 = vmatpush3.xpose.msra.mxu0 %v10225_v27  ;;  %8912 = vmatprep.mubr.f32.mxu0 %v10232_v33 }
 0xb9f   : > { %8910 = vmatprep.subr.mxu0 %v10230_v31 }
 0xba2   : > { %8911 = vmatpush3.xpose.msra.mxu0 %v10230_v31 }
 0xba5   : > { %8913 = vmatmul.mubr.f32.vlgmr.msra.gmra.mxu0 %v5026_v43 }
 0xc3b   : > { %v8851_v52 = vpop.f32.mrf.mxu1 }
 0xc3d   : > { %v4584_v53 = vpop.f32.mrf.mxu1 }
 0xc3f   : > { %v8865_v55 = vpop.f32.mrf.mxu1 }
 0xc41   : > { %v4748_v59 = vpop.f32.mrf.mxu1 }
 0xc43   : > { %v8844_v54 = vpop.f32.mrf.mxu0 }
 0xc44   : > { %v8879_v62 = vpop.f32.mrf.mxu1  ;;  %v4591_v33 = vadd.f32 %v8851_v52, %v8844_v54 }
 0xc45   : > { %v4493_v56 = vpop.f32.mrf.mxu0 }
 0xc46   : > { %v4585_v57 = vadd.f32 %v4584_v53, %v4493_v56  ;;  %v4912_v3 = vpop.f32.mrf.mxu1 }
 0xc48   : > { %v8858_v58 = vpop.f32.mrf.mxu0 }
 0xc49   : > { %v4674_v34 = vadd.f32 %v8858_v58, %v4591_v33 }
 0xc4a   : > { %v4666_v60 = vpop.f32.mrf.mxu0 }
 0xc4b   : > { %v4667_v61 = vadd.f32 %v4666_v60, %v4585_v57  ;;  %v4757_v35 = vadd.f32 %v8865_v55, %v4674_v34 }
 0xc4c   : > { %v8893_v6 = vpop.f32.mrf.mxu1 }
 0xc4d   : > { %v8872_v63 = vpop.f32.mrf.mxu0  ;;  %v4749_v0 = vadd.f32 %v4748_v59, %v4667_v61 }
 0xc4e   : > { %v5113_v8 = vpop.f32.mrf.mxu1  ;;  %v4840_v36 = vadd.f32 %v8872_v63, %v4757_v35 }
 0xc4f   : > { %v4833_v1 = vpop.f32.mrf.mxu0 }
 0xc50   : > { %v4834_v2 = vadd.f32 %v4833_v1, %v4749_v0  ;;  %v4919_v37 = vadd.f32 %v8879_v62, %v4840_v36 }
 0xc52   : > { %v4913_v4 = vadd.f32 %v4912_v3, %v4834_v2 }
 0xc54   : > { %v8907_v12 = vpop.f32.mrf.mxu1 }
 0xc55   : > { %v8886_v5 = vpop.f32.mrf.mxu0 }
 0xc56   : > { %v5120_v11 = vadd.f32 %v8893_v6, %v8886_v5  ;;  %v5277_v20 = vpop.f32.mrf.mxu1 }
 0xc57   : > { %v5022_v7 = vpop.f32.mrf.mxu0 }
 0xc58   : > { %v5114_v15 = vadd.f32 %v5113_v8, %v5022_v7 }
 0xc5c   : > { %v8921_v22 = vpop.f32.mrf.mxu1 }
 0xc5d   : > { %v8900_v9 = vpop.f32.mrf.mxu0 }
 0xc5e   : > { %v5203_v17 = vadd.f32 %v8900_v9, %v5120_v11  ;;  %v5441_v29 = vpop.f32.mrf.mxu1 }
 0xc5f   : > { %v5195_v14 = vpop.f32.mrf.mxu0 }
 0xc60   : > { %v5196_v18 = vadd.f32 %v5195_v14, %v5114_v15  ;;  %v5286_v21 = vadd.f32 %v8907_v12, %v5203_v17 }
 0xc62   : > { %v5278_v25 = vadd.f32 %v5277_v20, %v5196_v18  ;;  %v6003_v18 = vld [vmem:[%s9612_s10 + $0x18] sm:$0xff] }
 0xc65   : > { %v8914_v23 = vpop.f32.mrf.mxu0 }
 0xc66   : > { %v5369_v24 = vadd.f32 %v8914_v23, %v5286_v21  ;;  %v10293_v21 = vand.u32 4294901760, %v6003_v18 }
 0xc67   : > { %v5362_v26 = vpop.f32.mrf.mxu0 }
 0xc68   : > { %v5363_v27 = vadd.f32 %v5362_v26, %v5278_v25  ;;  %v5448_v28 = vadd.f32 %v8921_v22, %v5369_v24  ;;  %v6002_v22 = vld [vmem:[%s9612_s10 + $0x10] sm:$0xff]  ;;  %v10297_v23 = vsub.f32 %v6003_v18, %v10293_v21  ;;  %v6001_v25 = vld [vmem:[%s9612_s10 + $0x8] sm:$0xff] }
 0xc69   : > { %v10299_v24 = vand.u32 4294901760, %v6002_v22 }
 0xc6a   : > { %v5454_v30 = vsel %vm2264_vm4, %v5448_v28, -inf  ;;  %v5442_v31 = vadd.f32 %v5441_v29, %v5363_v27 }
 0xc6b   : > { %5455 = vmax.xlane.f32.xlu1 %v5454_v30  ;;  %v10308_v29 = vsub.f32 %v6002_v22, %v10299_v24  ;;  %v10310_v30 = vand.u32 4294901760, %v6001_v25 }
 0xc6c   : > { %v5451_v32 = vsel %vm2264_vm4, %v5442_v31, -inf }
 0xc6d   : > { %5452 = vmax.xlane.f32.xlu0 %v5451_v32  ;;  %v10318_v34 = vand.u32 4294901760, %v10308_v29  ;;  %v10321_v35 = vsub.f32 %v6001_v25, %v10310_v30 }
 0xc7c   : > { %5473 = vrot.lane.b32.xlu1 %v9963_v13, %s9455_s28 }
 0xc80   : > { %3859 = vrot.lane.b32.xlu1 %v10175_v19, %s9456_s30 }
 0xc84   : > { %3861 = vrot.lane.b32.xlu1 %v10173_v16, %s9456_s30 }
 0xc88   : > { %4926 = vrot.lane.b32.xlu1 %v4919_v37, %s9457_s19 }
 0xcf4   : > { %v5456_v38 = vpop.xlane.xlu1 %5455 }
 0xcf5   : > { %v5458_v39 = vsub.f32 %v5448_v28, %v5456_v38  ;;  %v10305_v28 = vand.u32 4294901760, %v10297_v23 }
 0xcf6   : > { %v5453_v40 = vpop.xlane.xlu0 %5452 }
 0xcf7   : > { %v5461_v41 = vmul.f32 1.442695, %v5458_v39  ;;  %v5457_v42 = vsub.f32 %v5442_v31, %v5453_v40  ;;  %v6000_v31 = vld [vmem:[%s9612_s10] sm:$0xff]  ;;  %v6127_v33 = vsub.f32 %v10297_v23, %v10305_v28  ;;  %s9458_s10 = smov 24  }
 0xcf8   : > { %v5474_v43 = vpop.permute.xlu1 %5473  ;;  %v10323_v36 = vand.u32 4294901760, %v6000_v31 }
 0xcf9   : > { %9329 = vpow2.f32 %v5461_v41  ;;  %v5459_v13 = vmul.f32 1.442695, %v5457_v42  ;;  %v5517_v50 = vand.u32 4294901760, %v5474_v43  ;;  %v6128_v40 = vand.u32 4294901760, %v6127_v33 }
 0xcfa   : > { %v6134_v41 = vsub.f32 %v10308_v29, %v10318_v34  ;;  %v10330_v42 = vand.u32 4294901760, %v10321_v35 }
 0xcfb   : > { %9331 = vpow2.f32 %v5459_v13  ;;  %v5609_v52 = vsub.f32 %v5474_v43, %v5517_v50  ;;  %v10333_v43 = vsub.f32 %v6000_v31, %v10323_v36 }
 0xcfc   : > { %v3860_v44 = vpop.permute.xlu1 %3859 }
 0xcfd   : > { %3866 = vst.msk [vmem:[#allocation3] sm:$0xff] %vm3865_vm5, %v3860_v44  ;;  %v5610_v56 = vand.u32 4294901760, %v5609_v52 }
 0xcff   : > { %v5611_v60 = vsub.f32 %v5609_v52, %v5610_v56 }
 0xd00   : > { %v3862_v19 = vpop.permute.xlu1 %3861 }
 0xd01   : > { %3867 = vst.msk [vmem:[#allocation3 + $0x8] sm:$0xff] %vm3865_vm5, %v3862_v19  ;;  %v5612_v2 = vand.u32 4294901760, %v5611_v60 }
 0xd04   : > { %v4927_v45 = vpop.permute.xlu1 %4926 }
 0xd05   : > { %4932 = vst.msk [vmem:[#allocation3 + $0x8] sm:$0xff] %vm4930_vm6, %v4927_v45  ;;  %v6135_v45 = vand.u32 4294901760, %v6134_v41  ;;  %v9346_v41 = vld [vmem:[#allocation2] sm:$0xff] }
 0xd06   : > { %v9330_v16 = vpop.eup %9329 }
 0xd07   : > { %v5466_v46 = vsel %vm2264_vm4, %v9330_v16, 0.0 }
 0xd08   : > { %v9332_v47 = vpop.eup %9331  ;;  %5467 = vadd.xlane.f32.xlu0 %v5466_v46  ;;  %v10340_v46 = vand.u32 4294901760, %v10333_v43 }
 0xd09   : > { %v5463_v48 = vsel %vm2264_vm4, %v9332_v47, 0.0 }
 0xd0c   : > { %5464 = vadd.xlane.f32.xlu0 %v5463_v48 }
 0xd22   : > { %5475 = vrot.lane.b32.xlu0 %v9961_v10, %s9455_s28 }
 0xd26   : > { %4924 = vrot.lane.b32.xlu0 %v4913_v4, %s9457_s19 }
 0xd91   : > { %v5468_v49 = vpop.xlane.xlu0 %5467 }
 0xd92   : > { %9333 = vrcp.f32 %v5468_v49 }
 0xd95   : > { %v5465_v51 = vpop.xlane.xlu0 %5464 }
 0xd96   : > { %9335 = vrcp.f32 %v5465_v51 }
 0xd99   : > { %v5476_v53 = vpop.permute.xlu0 %5475 }
 0xd9a   : > { %v5514_v54 = vand.u32 4294901760, %v5476_v53 }
 0xd9c   : > { %v5602_v55 = vsub.f32 %v5476_v53, %v5514_v54  ;;  %8922 = vmatprep.subr.mxu0 %v5514_v54 }
 0xd9d   : > { %8923 = vmatpush3.msra.mxu0 %v5514_v54  ;;  %v4925_v57 = vpop.permute.xlu0 %4924 }
 0xd9e   : > { %4931 = vst.msk [vmem:[#allocation3] sm:$0xff] %vm4930_vm6, %v4925_v57  ;;  %8924 = vmatprep.subr.mxu0 %v5517_v50  ;;  %v5603_v58 = vand.u32 4294901760, %v5602_v55 }
 0xd9f   : > { %v9334_v59 = vpop.eup %9333  ;;  %8925 = vmatpush3.msra.mxu0 %v5517_v50 }
 0xda0   : > { %8936 = vmatprep.subr.mxu0 %v5602_v55  ;;  %v5604_v10 = vsub.f32 %v5602_v55, %v5603_v58  ;;  %v5472_v61 = vmul.f32 %v9334_v59, %v9330_v16  ;;  %v6141_v16 = vsub.f32 %v10321_v35, %v10330_v42 }
 0xda2   : > { %v5605_v62 = vand.u32 4294901760, %v5604_v10  ;;  %v5483_v63 = vsel %vm2264_vm4, %v5472_v61, 0  ;;  %v6142_v51 = vand.u32 4294901760, %v6141_v16 }
 0xda3   : > { %v9336_v0 = vpop.eup %9335  ;;  %v5562_v1 = vand.u32 4294901760, %v5483_v63 }
 0xda4   : > { %8929 = vmatprep.subr.mxu1 %v5605_v62  ;;  %v5470_v3 = vmul.f32 %v9336_v0, %v9332_v47 }
 0xda5   : > { %8930 = vmatpush3.msra.mxu1 %v5605_v62  ;;  %v5563_v4 = vsub.f32 %v5483_v63, %v5562_v1 }
 0xda6   : > { %8931 = vmatprep.subr.mxu1 %v5612_v2  ;;  %v5480_v5 = vsel %vm2264_vm4, %v5470_v3, 0 }
 0xda7   : > { %8932 = vmatpush3.msra.mxu1 %v5612_v2  ;;  %v5552_v6 = vand.u32 4294901760, %v5480_v5  ;;  %v5564_v7 = vand.u32 4294901760, %v5563_v4 }
 0xda8   : > { %8943 = vmatprep.subr.mxu1 %v5514_v54 }
 0xda9   : > { %8933 = vmatprep.mubr.f32.mxu1 %v5552_v6  ;;  %v5553_v8 = vsub.f32 %v5480_v5, %v5552_v6  ;;  %v5565_v11 = vsub.f32 %v5563_v4, %v5564_v7 }
 0xdaa   : > { %8934 = vmatmul.mubr.f32.vlgmr.msra.gmra.mxu1 %v5562_v1 }
 0xdab   : > { %8944 = vmatpush3.msra.mxu1 %v5514_v54  ;;  %v5554_v9 = vand.u32 4294901760, %v5553_v8  ;;  %v5566_v15 = vand.u32 4294901760, %v5565_v11 }
 0xdac   : > { %8945 = vmatprep.subr.mxu1 %v5517_v50 }
 0xdad   : > { %8946 = vmatpush3.msra.mxu1 %v5517_v50  ;;  %8947 = vmatprep.mubr.f32.mxu1 %v5554_v9  ;;  %v5555_v12 = vsub.f32 %v5553_v8, %v5554_v9 }
 0xdae   : > { %8957 = vmatprep.subr.mxu1 %v5514_v54  ;;  %8948 = vmatmul.mubr.f32.vlgmr.msra.gmra.mxu1 %v5564_v7 }
 0xdaf   : > { %8958 = vmatpush3.msra.mxu1 %v5514_v54  ;;  %8961 = vmatprep.mubr.f32.mxu1 %v5552_v6  ;;  %v5556_v14 = vand.u32 4294901760, %v5555_v12 }
 0xdb0   : > { %8959 = vmatprep.subr.mxu1 %v5517_v50 }
 0xdb1   : > { %8960 = vmatpush3.msra.mxu1 %v5517_v50  ;;  %8926 = vmatprep.mubr.f32.mxu0 %v5556_v14 }
 0xdb2   : > { %8927 = vmatmul.mubr.f32.vlgmr.msra.gmra.mxu0 %v5566_v15  ;;  %8962 = vmatmul.mubr.f32.vlgmr.msra.gmra.mxu1 %v5562_v1 }
 0xdb3   : > { %8937 = vmatpush3.msra.mxu0 %v5602_v55  ;;  %8940 = vmatprep.mubr.f32.mxu0 %v5553_v8 }
 0xdb4   : > { %8938 = vmatprep.subr.mxu0 %v5609_v52  ;;  %8975 = vmatprep.subr.mxu1 %v6128_v40 }
 0xdb5   : > { %8939 = vmatpush3.msra.mxu0 %v5609_v52  ;;  %8976 = vmatpush3.msra.mxu1 %v6128_v40  ;;  %v6148_v52 = vsub.f32 %v10333_v43, %v10340_v46 }
 0xdb6   : > { %8950 = vmatprep.subr.mxu0 %v5603_v58  ;;  %8941 = vmatmul.mubr.f32.vlgmr.msra.gmra.mxu0 %v5563_v4 }
 0xdb7   : > { %8951 = vmatpush3.msra.mxu0 %v5603_v58  ;;  %8954 = vmatprep.mubr.f32.mxu0 %v5552_v6 }
 0xdb8   : > { %8952 = vmatprep.subr.mxu0 %v5610_v56  ;;  %8977 = vmatprep.subr.mxu1 %v6135_v45 }
 0xdb9   : > { %8953 = vmatpush3.msra.mxu0 %v5610_v56  ;;  %8978 = vmatpush3.msra.mxu1 %v6135_v45  ;;  %v6149_v56 = vand.u32 4294901760, %v6148_v52 }
 0xdba   : > { %8955 = vmatmul.mubr.f32.vlgmr.msra.gmra.mxu0 %v5562_v1  ;;  %8964 = vmatprep.subr.mxu0 %v10293_v21 }
 0xdbb   : > { %8965 = vmatpush3.msra.mxu0 %v10293_v21  ;;  %8979 = vmatprep.subr.mxu1 %v6142_v51 }
 0xdbc   : > { %8966 = vmatprep.subr.mxu0 %v10299_v24  ;;  %8980 = vmatpush3.msra.mxu1 %v6142_v51 }
 0xdbd   : > { %8967 = vmatpush3.msra.mxu0 %v10299_v24  ;;  %8981 = vmatprep.subr.mxu1 %v6149_v56 }
 0xdbe   : > { %8968 = vmatprep.subr.mxu0 %v10310_v30  ;;  %8982 = vmatpush3.msra.mxu1 %v6149_v56  ;;  %v6597_v56 = vld [vmem:[%s9617_s22 + $0x8] sm:$0xff] }
 0xdbf   : > { %8969 = vmatpush3.msra.mxu0 %v10310_v30  ;;  %8997 = vmatprep.subr.mxu1 %v10293_v21 }
 0xdc0   : > { %8970 = vmatprep.subr.mxu0 %v10323_v36 }
 0xdc1   : > { %8971 = vmatpush3.msra.mxu0 %v10323_v36 }
 0xdc2   : > { %8986 = vmatprep.subr.mxu0 %v10297_v23 }
 0xe6a   : > { %v8935_v17 = vpop.f32.mrf.mxu1 }
 0xe6c   : > { %v5649_v20 = vpop.f32.mrf.mxu1 }
 0xe6e   : > { %v8949_v26 = vpop.f32.mrf.mxu1 }
 0xe70   : > { %v5813_v38 = vpop.f32.mrf.mxu1 }
 0xe72   : > { %v8928_v27 = vpop.f32.mrf.mxu0  ;;  %v8963_v49 = vpop.f32.mrf.mxu1 }
 0xe73   : > { %v5656_v37 = vadd.f32 %v8935_v17, %v8928_v27 }
 0xe74   : > { %v5558_v32 = vpop.f32.mrf.mxu0  ;;  %v5977_v59 = vpop.f32.mrf.mxu1 }
 0xe75   : > { %v5650_v13 = vadd.f32 %v5649_v20, %v5558_v32 }
 0xe76   : > { %v8942_v39 = vpop.f32.mrf.mxu0 }
 0xe77   : > { %v5739_v44 = vadd.f32 %v8942_v39, %v5656_v37  ;;  %v8004_v37 = vld [vmem:[%s9633_s20 + $0x2] ss:$0 sm:$0xff] }
 0xe78   : > { %v5731_v19 = vpop.f32.mrf.mxu0 }
 0xe79   : > { %v5732_v47 = vadd.f32 %v5731_v19, %v5650_v13  ;;  %v5822_v48 = vadd.f32 %v8949_v26, %v5739_v44 }
 0xe7a   : > { %v8956_v50 = vpop.f32.mrf.mxu0 }
 0xe7b   : > { %v5905_v53 = vadd.f32 %v8956_v50, %v5822_v48  ;;  %v5814_v54 = vadd.f32 %v5813_v38, %v5732_v47  ;;  %v9345_v38 = vld [vmem:[#allocation2 + $0x8] sm:$0xff] }
 0xe7c   : > { %v5898_v55 = vpop.f32.mrf.mxu0 }
 0xe7d   : > { %v5984_v57 = vadd.f32 %v8963_v49, %v5905_v53  ;;  %v5899_v58 = vadd.f32 %v5898_v55, %v5814_v54  ;;  %v6599_v54 = vld [vmem:[%s9617_s22 + $0x18] sm:$0xff]  ;;  %v6598_v55 = vld [vmem:[%s9617_s22 + $0x10] sm:$0xff] }
 0xe7f   : > { %v5978_v10 = vadd.f32 %v5977_v59, %v5899_v58  ;;  %5991 = vrot.lane.b32.xlu1 %v5984_v57, %s9458_s10  ;;  %v10398_v57 = vand.u32 4294901760, %v6599_v54  ;;  %v10400_v58 = vand.u32 4294901760, %v6598_v55  ;;  %v10402_v59 = vand.u32 4294901760, %v6597_v56 }
 0xe81   : > { %5989 = vrot.lane.b32.xlu0 %v5978_v10, %s9458_s10  ;;  %v10405_v10 = vsub.f32 %v6599_v54, %v10398_v57 }
 0xef1   : > { %v5992_v60 = vpop.permute.xlu1 %5991 }
 0xef2   : > { %5997 = vst.msk [vmem:[#allocation3 + $0x8] sm:$0xff] %vm5995_vm7, %v5992_v60  ;;  %v10408_v60 = vsub.f32 %v6598_v55, %v10400_v58 }
 0xef3   : > { %v5990_v61 = vpop.permute.xlu0 %5989 }
 0xef4   : > { %5996 = vst.msk [vmem:[#allocation3] sm:$0xff] %vm5995_vm7, %v5990_v61  ;;  %v10411_v61 = vsub.f32 %v6597_v56, %v10402_v59 }
 0xef9   : > { %v5999_v62 = vld [vmem:[#allocation3 + $0x8] sm:$0xff] }
 0xefa   : > { %v6008_v63 = vsel %vm1158_vm2, %v5999_v62, 0  ;;  %v10416_v62 = vand.u32 4294901760, %v10405_v10 }
 0xefb   : > { %v5998_v0 = vld [vmem:[#allocation3] sm:$0xff]  ;;  %v6089_v1 = vand.u32 4294901760, %v6008_v63 }
 0xefc   : > { %v6005_v2 = vsel %vm1158_vm2, %v5998_v0, 0  ;;  %v10422_v0 = vand.u32 4294901760, %v10411_v61 }
 0xefd   : > { %v6079_v3 = vand.u32 4294901760, %v6005_v2  ;;  %v6090_v4 = vsub.f32 %v6008_v63, %v6089_v1  ;;  %v10419_v63 = vand.u32 4294901760, %v10408_v60 }
 0xeff   : > { %8983 = vmatprep.mubr.f32.mxu1 %v6079_v3  ;;  %v6080_v5 = vsub.f32 %v6005_v2, %v6079_v3  ;;  %v6091_v6 = vand.u32 4294901760, %v6090_v4  ;;  %v6737_v2 = vsub.f32 %v10408_v60, %v10419_v63 }
 0xf00   : > { %8984 = vmatmul.mubr.f32.vlgmr.msra.gmra.mxu1 %v6089_v1 }
 0xf01   : > { %8998 = vmatpush3.msra.mxu1 %v10293_v21  ;;  %v6081_v7 = vand.u32 4294901760, %v6080_v5  ;;  %v6092_v9 = vsub.f32 %v6090_v4, %v6091_v6 }
 0xf02   : > { %8999 = vmatprep.subr.mxu1 %v10299_v24 }
 0xf03   : > { %9000 = vmatpush3.msra.mxu1 %v10299_v24  ;;  %9005 = vmatprep.mubr.f32.mxu1 %v6081_v7  ;;  %v6082_v8 = vsub.f32 %v6080_v5, %v6081_v7  ;;  %v6093_v12 = vand.u32 4294901760, %v6092_v9 }
 0xf04   : > { %9001 = vmatprep.subr.mxu1 %v10310_v30 }
 0xf05   : > { %9002 = vmatpush3.msra.mxu1 %v10310_v30  ;;  %v6083_v11 = vand.u32 4294901760, %v6082_v8 }
 0xf06   : > { %9003 = vmatprep.subr.mxu1 %v10323_v36 }
 0xf07   : > { %9004 = vmatpush3.msra.mxu1 %v10323_v36  ;;  %8972 = vmatprep.mubr.f32.mxu0 %v6083_v11 }
 0xf08   : > { %9006 = vmatmul.mubr.f32.vlgmr.msra.gmra.mxu1 %v6091_v6  ;;  %9019 = vmatprep.subr.mxu1 %v10293_v21  ;;  %v6596_v6 = vld [vmem:[%s9617_s22] sm:$0xff] }
 0xf09   : > { %8973 = vmatmul.mubr.f32.vlgmr.msra.gmra.mxu0 %v6093_v12  ;;  %9020 = vmatpush3.msra.mxu1 %v10293_v21  ;;  %v10435_v7 = vand.u32 4294901760, %v6596_v6 }
 0xf0a   : > { %8987 = vmatpush3.msra.mxu0 %v10297_v23  ;;  %9027 = vmatprep.mubr.f32.mxu1 %v6079_v3 }
 0xf0b   : > { %8988 = vmatprep.subr.mxu0 %v10308_v29  ;;  %8994 = vmatprep.mubr.f32.mxu0 %v6080_v5  ;;  %v6738_v5 = vand.u32 4294901760, %v6737_v2  ;;  %v10438_v9 = vsub.f32 %v6596_v6, %v10435_v7 }
 0xf0c   : > { %9021 = vmatprep.subr.mxu1 %v10299_v24  ;;  %8989 = vmatpush3.msra.mxu0 %v10308_v29 }
 0xf0d   : > { %9022 = vmatpush3.msra.mxu1 %v10299_v24  ;;  %8990 = vmatprep.subr.mxu0 %v10321_v35  ;;  %v10443_v11 = vand.u32 4294901760, %v10438_v9 }
 0xf0e   : > { %9023 = vmatprep.subr.mxu1 %v10310_v30  ;;  %8991 = vmatpush3.msra.mxu0 %v10321_v35 }
 0xf0f   : > { %9024 = vmatpush3.msra.mxu1 %v10310_v30  ;;  %8992 = vmatprep.subr.mxu0 %v10333_v43  ;;  %v6751_v12 = vsub.f32 %v10438_v9, %v10443_v11 }
 0xf10   : > { %9025 = vmatprep.subr.mxu1 %v10323_v36  ;;  %8993 = vmatpush3.msra.mxu0 %v10333_v43 }
 0xf11   : > { %9026 = vmatpush3.msra.mxu1 %v10323_v36  ;;  %8995 = vmatmul.mubr.f32.vlgmr.msra.gmra.mxu0 %v6090_v4 }
 0xf12   : > { %9008 = vmatprep.subr.mxu0 %v10305_v28  ;;  %9028 = vmatmul.mubr.f32.vlgmr.msra.gmra.mxu1 %v6089_v1 }
 0xf13   : > { %9009 = vmatpush3.msra.mxu0 %v10305_v28  ;;  %9016 = vmatprep.mubr.f32.mxu0 %v6079_v3  ;;  %v6744_v3 = vsub.f32 %v10411_v61, %v10422_v0 }
 0xf14   : > { %9010 = vmatprep.subr.mxu0 %v10318_v34 }
 0xf15   : > { %9011 = vmatpush3.msra.mxu0 %v10318_v34  ;;  %v6745_v8 = vand.u32 4294901760, %v6744_v3 }
 0xf16   : > { %9012 = vmatprep.subr.mxu0 %v10330_v42 }
 0xf17   : > { %9013 = vmatpush3.msra.mxu0 %v10330_v42 }
 0xf18   : > { %9014 = vmatprep.subr.mxu0 %v10340_v46 }
 0xf19   : > { %9015 = vmatpush3.msra.mxu0 %v10340_v46 }
 0xf1a   : > { %9017 = vmatmul.mubr.f32.vlgmr.msra.gmra.mxu0 %v6089_v1  ;;  %9030 = vmatprep.subr.mxu0 %v10398_v57  ;;  %v6730_v1 = vsub.f32 %v10405_v10, %v10416_v62 }
 0xf1b   : > { %9031 = vmatpush3.msra.mxu0 %v10398_v57 }
 0xf1c   : > { %9032 = vmatprep.subr.mxu0 %v10400_v58  ;;  %v6731_v4 = vand.u32 4294901760, %v6730_v1 }
 0xf1d   : > { %9033 = vmatpush3.msra.mxu0 %v10400_v58 }
 0xf1e   : > { %9034 = vmatprep.subr.mxu0 %v10402_v59  ;;  %9041 = vmatprep.subr.mxu1 %v6731_v4 }
 0xf1f   : > { %9035 = vmatpush3.msra.mxu0 %v10402_v59  ;;  %9042 = vmatpush3.msra.mxu1 %v6731_v4 }
 0xf20   : > { %9036 = vmatprep.subr.mxu0 %v10435_v7  ;;  %9043 = vmatprep.subr.mxu1 %v6738_v5 }
 0xf21   : > { %9037 = vmatpush3.msra.mxu0 %v10435_v7  ;;  %9044 = vmatpush3.msra.mxu1 %v6738_v5  ;;  %v7152_v5 = vld [vmem:[%s9627_s15 + $0x8] sm:$0xff] }
 0xf22   : > { %9052 = vmatprep.subr.mxu0 %v10405_v10  ;;  %9045 = vmatprep.subr.mxu1 %v6745_v8 }
 0xf23   : > { %9046 = vmatpush3.msra.mxu1 %v6745_v8 }
 0xfc0   : > { %v8985_v15 = vpop.f32.mrf.mxu1 }
 0xfc2   : > { %v6186_v20 = vpop.f32.mrf.mxu1 }
 0xfc8   : > { %v9007_v22 = vpop.f32.mrf.mxu1 }
 0xfc9   : > { %v8974_v14 = vpop.f32.mrf.mxu0 }
 0xfca   : > { %v6193_v21 = vadd.f32 %v8985_v15, %v8974_v14  ;;  %v6356_v27 = vpop.f32.mrf.mxu1  ;;  %v6752_v14 = vand.u32 4294901760, %v6751_v12  ;;  %v7151_v12 = vld [vmem:[%s9627_s15] sm:$0xff] }
 0xfcb   : > { %v6085_v17 = vpop.f32.mrf.mxu0 }
 0xfcc   : > { %v6187_v24 = vadd.f32 %v6186_v20, %v6085_v17  ;;  %9047 = vmatprep.subr.mxu1 %v6752_v14 }
 0xfcd   : > { %9048 = vmatpush3.msra.mxu1 %v6752_v14 }
 0xfce   : > { %9063 = vmatprep.subr.mxu1 %v10398_v57 }
 0xfd1   : > { %v8996_v18 = vpop.f32.mrf.mxu0 }
 0xfd2   : > { %v6280_v25 = vadd.f32 %v8996_v18, %v6193_v21  ;;  %v9029_v29 = vpop.f32.mrf.mxu1 }
 0xfd3   : > { %v6272_v23 = vpop.f32.mrf.mxu0 }
 0xfd4   : > { %v6273_v26 = vadd.f32 %v6272_v23, %v6187_v24  ;;  %v6365_v28 = vadd.f32 %v9007_v22, %v6280_v25  ;;  %v6528_v36 = vpop.f32.mrf.mxu1  ;;  %v8007_v24 = vld [vmem:[%s9633_s20 + $0x3] ss:$0 sm:$0xff] }
 0xfd6   : > { %v6357_v32 = vadd.f32 %v6356_v27, %v6273_v26  ;;  %v8008_v26 = vld [vmem:[%s9633_s20 + $0x4] ss:$0 sm:$0xff] }
 0xfda   : > { %v9018_v30 = vpop.f32.mrf.mxu0 }
 0xfdb   : > { %v6454_v31 = vadd.f32 %v9018_v30, %v6365_v28 }
 0xfdc   : > { %v6447_v33 = vpop.f32.mrf.mxu0 }
 0xfdd   : > { %v6535_v34 = vadd.f32 %v9029_v29, %v6454_v31  ;;  %v6448_v35 = vadd.f32 %v6447_v33, %v6357_v32 }
 0xfdf   : > { %v6539_v39 = vadd.f32 %v9345_v38, %v6535_v34  ;;  %v6529_v40 = vadd.f32 %v6528_v36, %v6448_v35 }
 0xfe1   : > { %v6538_v42 = vadd.f32 %v9346_v41, %v6529_v40  ;;  %v10379_v43 = vadd.f32 %v8004_v37, %v6539_v39 }
 0xfe3   : > { %v6557_v13 = vsel %vm1158_vm2, %v10379_v43, 0.0  ;;  %v10383_v44 = vadd.f32 %v8004_v37, %v6538_v42 }
 0xfe4   : > { %6558 = vadd.xlane.f32.xlu1 %v6557_v13 }
 0xfe5   : > { %v6554_v19 = vsel %vm1158_vm2, %v10383_v44, 0.0 }
 0xfe6   : > { %6555 = vadd.xlane.f32.xlu0 %v6554_v19 }
0x106d   : > { %v6559_v45 = vpop.xlane.xlu1 %6558 }
0x106e   : > { %v6561_v16 = vmul.f32 0.03125, %v6559_v45  ;;  %v7158_v45 = vld [vmem:[%s9627_s15 + $0x38] sm:$0xff] }
0x106f   : > { %v6556_v46 = vpop.xlane.xlu0 %6555 }
0x1070   : > { %v6560_v47 = vmul.f32 0.03125, %v6556_v46  ;;  %v10388_v48 = vsub.f32 %v10379_v43, %v6561_v16  ;;  %v10485_v16 = vand.u32 4294901760, %v7158_v45  ;;  %v7157_v46 = vld [vmem:[%s9627_s15 + $0x30] sm:$0xff] }
0x1072   : > { %v6562_v49 = vsub.f32 %v10383_v44, %v6560_v47  ;;  %v6565_v52 = vmul.f32 %v10388_v48, %v10388_v48  ;;  %v10489_v47 = vsub.f32 %v7158_v45, %v10485_v16 }
0x1074   : > { %v6564_v50 = vmul.f32 %v6562_v49, %v6562_v49  ;;  %v6569_v53 = vsel %vm1158_vm2, %v6565_v52, 0.0 }
0x1076   : > { %v6566_v51 = vsel %vm1158_vm2, %v6564_v50, 0.0  ;;  %v10497_v50 = vand.u32 4294901760, %v10489_v47 }
0x1077   : > { %6567 = vadd.xlane.f32.xlu0 %v6566_v51 }
0x1078   : > { %v7279_v54 = vsub.f32 %v10489_v47, %v10497_v50 }
0x107b   : > { %6570 = vadd.xlane.f32.xlu0 %v6569_v53  ;;  %v7155_v53 = vld [vmem:[%s9627_s15 + $0x20] sm:$0xff] }
0x1100   : > { %v6568_v15 = vpop.xlane.xlu0 %6567 }
0x1101   : > { %v6572_v17 = vmul.f32 0.03125, %v6568_v15 }
0x1103   : > { %v6574_v18 = vadd.f32 1e-05, %v6572_v17 }
0x1104   : > { %v6571_v20 = vpop.xlane.xlu0 %6570 }
0x1105   : > { %9337 = vrsqrt.f32 %v6574_v18  ;;  %v6573_v21 = vmul.f32 0.03125, %v6571_v20  ;;  %v10564_v18 = vand.u32 4294901760, %v7151_v12 }
0x1107   : > { %v6575_v22 = vadd.f32 1e-05, %v6573_v21 }
0x1109   : > { %9339 = vrsqrt.f32 %v6575_v22 }
0x1112   : > { %v9338_v23 = vpop.eup %9337 }
0x1113   : > { %v6578_v25 = vmul.f32 %v9338_v23, %v6562_v49  ;;  %v7156_v49 = vld [vmem:[%s9627_s15 + $0x28] sm:$0xff]  ;;  %v10576_v23 = vsub.f32 %v7151_v12, %v10564_v18 }
0x1114   : > { %v10502_v52 = vand.u32 4294901760, %v7156_v49 }
0x1115   : > { %v6586_v27 = vmul.f32 %v8007_v24, %v6578_v25 }
0x1116   : > { %v9340_v28 = vpop.eup %9339  ;;  %v10513_v56 = vsub.f32 %v7156_v49, %v10502_v52 }
0x1117   : > { %v6594_v29 = vadd.f32 %v8008_v26, %v6586_v27  ;;  %v6579_v30 = vmul.f32 %v9340_v28, %v10388_v48  ;;  %v10491_v48 = vand.u32 4294901760, %v7157_v46  ;;  %v10583_v27 = vand.u32 4294901760, %v10576_v23 }
0x1119   : > { %v6608_v31 = vsel %vm1158_vm2, %v6594_v29, 0  ;;  %v6587_v32 = vmul.f32 %v8007_v24, %v6579_v30  ;;  %v10500_v51 = vsub.f32 %v7157_v46, %v10491_v48  ;;  %v7328_v29 = vsub.f32 %v10576_v23, %v10583_v27 }
0x111a   : > { %v6682_v33 = vand.u32 4294901760, %v6608_v31 }
0x111b   : > { %v6595_v34 = vadd.f32 %v8008_v26, %v6587_v32  ;;  %v10510_v55 = vand.u32 4294901760, %v10500_v51  ;;  %v7329_v30 = vand.u32 4294901760, %v7328_v29  ;;  %v8009_v32 = vld [vmem:[%s485_s18] ss:$0 sm:$0xff] }
0x111c   : > { %9049 = vmatprep.mubr.f32.mxu1 %v6682_v33  ;;  %v6683_v35 = vsub.f32 %v6608_v31, %v6682_v33 }
0x111d   : > { %v6611_v36 = vsel %vm1158_vm2, %v6595_v34, 0 }
0x111e   : > { %v6692_v37 = vand.u32 4294901760, %v6611_v36  ;;  %v6684_v38 = vand.u32 4294901760, %v6683_v35 }
0x1120   : > { %v6693_v39 = vsub.f32 %v6611_v36, %v6692_v37  ;;  %9050 = vmatmul.mubr.f32.vlgmr.msra.gmra.mxu1 %v6692_v37  ;;  %v6685_v40 = vsub.f32 %v6683_v35, %v6684_v38 }
0x1121   : > { %9064 = vmatpush3.msra.mxu1 %v10398_v57  ;;  %9071 = vmatprep.mubr.f32.mxu1 %v6684_v38 }
0x1122   : > { %9065 = vmatprep.subr.mxu1 %v10400_v58  ;;  %v6686_v41 = vand.u32 4294901760, %v6685_v40  ;;  %v6694_v42 = vand.u32 4294901760, %v6693_v39 }
0x1123   : > { %9066 = vmatpush3.msra.mxu1 %v10400_v58 }
0x1124   : > { %9067 = vmatprep.subr.mxu1 %v10402_v59  ;;  %9038 = vmatprep.mubr.f32.mxu0 %v6686_v41  ;;  %v6695_v13 = vsub.f32 %v6693_v39, %v6694_v42 }
0x1125   : > { %9068 = vmatpush3.msra.mxu1 %v10402_v59 }
0x1126   : > { %9069 = vmatprep.subr.mxu1 %v10435_v7  ;;  %v6696_v19 = vand.u32 4294901760, %v6695_v13 }
0x1127   : > { %9070 = vmatpush3.msra.mxu1 %v10435_v7 }
0x1128   : > { %9072 = vmatmul.mubr.f32.vlgmr.msra.gmra.mxu1 %v6694_v42  ;;  %9085 = vmatprep.subr.mxu1 %v10398_v57 }
0x1129   : > { %9039 = vmatmul.mubr.f32.vlgmr.msra.gmra.mxu0 %v6696_v19  ;;  %9086 = vmatpush3.msra.mxu1 %v10398_v57  ;;  %v10515_v57 = vand.u32 4294901760, %v7155_v53 }
0x112a   : > { %9053 = vmatpush3.msra.mxu0 %v10405_v10  ;;  %9093 = vmatprep.mubr.f32.mxu1 %v6682_v33  ;;  %v7286_v10 = vsub.f32 %v10500_v51, %v10510_v55 }
0x112b   : > { %9054 = vmatprep.subr.mxu0 %v10408_v60  ;;  %9060 = vmatprep.mubr.f32.mxu0 %v6683_v35 }
0x112c   : > { %9087 = vmatprep.subr.mxu1 %v10400_v58  ;;  %9055 = vmatpush3.msra.mxu0 %v10408_v60  ;;  %v10523_v60 = vand.u32 4294901760, %v10513_v56 }
0x112d   : > { %9088 = vmatpush3.msra.mxu1 %v10400_v58  ;;  %9056 = vmatprep.subr.mxu0 %v10411_v61  ;;  %v7154_v58 = vld [vmem:[%s9627_s15 + $0x18] sm:$0xff] }
0x112e   : > { %9089 = vmatprep.subr.mxu1 %v10402_v59  ;;  %9057 = vmatpush3.msra.mxu0 %v10411_v61  ;;  %v10526_v61 = vsub.f32 %v7155_v53, %v10515_v57  ;;  %v7293_v1 = vsub.f32 %v10513_v56, %v10523_v60 }
0x112f   : > { %9090 = vmatpush3.msra.mxu1 %v10402_v59  ;;  %9058 = vmatprep.subr.mxu0 %v10438_v9  ;;  %v7280_v59 = vand.u32 4294901760, %v7279_v54 }
0x1130   : > { %9091 = vmatprep.subr.mxu1 %v10435_v7  ;;  %9059 = vmatpush3.msra.mxu0 %v10438_v9  ;;  %v10536_v2 = vand.u32 4294901760, %v10526_v61  ;;  %v7294_v6 = vand.u32 4294901760, %v7293_v1  ;;  %v10550_v9 = vand.u32 4294901760, %v7152_v5 }
0x1131   : > { %9092 = vmatpush3.msra.mxu1 %v10435_v7  ;;  %9061 = vmatmul.mubr.f32.vlgmr.msra.gmra.mxu0 %v6693_v39 }
0x1132   : > { %9074 = vmatprep.subr.mxu0 %v10416_v62  ;;  %9094 = vmatmul.mubr.f32.vlgmr.msra.gmra.mxu1 %v6692_v37  ;;  %v7300_v7 = vsub.f32 %v10526_v61, %v10536_v2  ;;  %v10562_v17 = vsub.f32 %v7152_v5, %v10550_v9 }
0x1133   : > { %9075 = vmatpush3.msra.mxu0 %v10416_v62  ;;  %9082 = vmatprep.mubr.f32.mxu0 %v6682_v33  ;;  %v10529_v62 = vand.u32 4294901760, %v7154_v58 }
0x1134   : > { %9076 = vmatprep.subr.mxu0 %v10419_v63  ;;  %9115 = vmatprep.subr.mxu1 %v7280_v59  ;;  %v7301_v14 = vand.u32 4294901760, %v7300_v7  ;;  %v10573_v22 = vand.u32 4294901760, %v10562_v17 }
0x1135   : > { %9077 = vmatpush3.msra.mxu0 %v10419_v63  ;;  %v7153_v63 = vld [vmem:[%s9627_s15 + $0x10] sm:$0xff]  ;;  %9116 = vmatpush3.msra.mxu1 %v7280_v59  ;;  %v10541_v4 = vsub.f32 %v7154_v58, %v10529_v62 }
0x1136   : > { %9078 = vmatprep.subr.mxu0 %v10422_v0  ;;  %v10538_v3 = vand.u32 4294901760, %v7153_v63  ;;  %v7321_v26 = vsub.f32 %v10562_v17, %v10573_v22 }
0x1137   : > { %9079 = vmatpush3.msra.mxu0 %v10422_v0  ;;  %v7287_v0 = vand.u32 4294901760, %v7286_v10 }
0x1138   : > { %9080 = vmatprep.subr.mxu0 %v10443_v11  ;;  %v10548_v8 = vsub.f32 %v7153_v63, %v10538_v3  ;;  %v7322_v28 = vand.u32 4294901760, %v7321_v26 }
0x1139   : > { %9081 = vmatpush3.msra.mxu0 %v10443_v11  ;;  %9117 = vmatprep.subr.mxu1 %v7287_v0  ;;  %v10554_v11 = vand.u32 4294901760, %v10541_v4 }
0x113a   : > { %9083 = vmatmul.mubr.f32.vlgmr.msra.gmra.mxu0 %v6692_v37  ;;  %9096 = vmatprep.subr.mxu0 %v10485_v16  ;;  %v10559_v15 = vand.u32 4294901760, %v10548_v8 }
0x113b   : > { %9097 = vmatpush3.msra.mxu0 %v10485_v16  ;;  %9118 = vmatpush3.msra.mxu1 %v7287_v0  ;;  %v7307_v20 = vsub.f32 %v10541_v4, %v10554_v11 }
0x113c   : > { %9098 = vmatprep.subr.mxu0 %v10491_v48  ;;  %9119 = vmatprep.subr.mxu1 %v7294_v6  ;;  %v7314_v21 = vsub.f32 %v10548_v8, %v10559_v15 }
0x113d   : > { %9099 = vmatpush3.msra.mxu0 %v10491_v48  ;;  %9120 = vmatpush3.msra.mxu1 %v7294_v6  ;;  %v7308_v24 = vand.u32 4294901760, %v7307_v20 }
0x113e   : > { %9100 = vmatprep.subr.mxu0 %v10502_v52  ;;  %9121 = vmatprep.subr.mxu1 %v7301_v14  ;;  %v7315_v25 = vand.u32 4294901760, %v7314_v21 }
0x113f   : > { %9101 = vmatpush3.msra.mxu0 %v10502_v52  ;;  %9122 = vmatpush3.msra.mxu1 %v7301_v14 }
0x1140   : > { %9102 = vmatprep.subr.mxu0 %v10515_v57  ;;  %9123 = vmatprep.subr.mxu1 %v7308_v24 }
0x1141   : > { %9103 = vmatpush3.msra.mxu0 %v10515_v57  ;;  %9124 = vmatpush3.msra.mxu1 %v7308_v24 }
0x1142   : > { %9104 = vmatprep.subr.mxu0 %v10529_v62  ;;  %9125 = vmatprep.subr.mxu1 %v7315_v25 }
0x1143   : > { %9105 = vmatpush3.msra.mxu0 %v10529_v62  ;;  %9126 = vmatpush3.msra.mxu1 %v7315_v25 }
0x1144   : > { %9106 = vmatprep.subr.mxu0 %v10538_v3  ;;  %9127 = vmatprep.subr.mxu1 %v7322_v28 }
0x1145   : > { %9107 = vmatpush3.msra.mxu0 %v10538_v3  ;;  %9128 = vmatpush3.msra.mxu1 %v7322_v28 }
0x1146   : > { %9108 = vmatprep.subr.mxu0 %v10550_v9  ;;  %9129 = vmatprep.subr.mxu1 %v7329_v30 }
0x1147   : > { %9109 = vmatpush3.msra.mxu0 %v10550_v9  ;;  %9130 = vmatpush3.msra.mxu1 %v7329_v30 }
0x1148   : > { %9110 = vmatprep.subr.mxu0 %v10564_v18  ;;  %9153 = vmatprep.subr.mxu1 %v10485_v16 }
0x1149   : > { %9111 = vmatpush3.msra.mxu0 %v10564_v18 }
0x114a   : > { %9134 = vmatprep.subr.mxu0 %v10489_v47 }
0x11e0   : > { %v9051_v33 = vpop.f32.mrf.mxu1 }
0x11e2   : > { %v6789_v38 = vpop.f32.mrf.mxu1 }
0x11e8   : > { %v9073_v40 = vpop.f32.mrf.mxu1 }
0x11e9   : > { %v9040_v31 = vpop.f32.mrf.mxu0 }
0x11ea   : > { %v6699_v35 = vadd.f32 %v9040_v31, %v8009_v32  ;;  %v6959_v45 = vpop.f32.mrf.mxu1 }
0x11eb   : > { %v6688_v34 = vpop.f32.mrf.mxu0 }
0x11ec   : > { %v6689_v36 = vadd.f32 %v8009_v32, %v6688_v34  ;;  %v6796_v39 = vadd.f32 %v9051_v33, %v6699_v35 }
0x11ee   : > { %v6790_v13 = vadd.f32 %v6789_v38, %v6689_v36 }
0x11f1   : > { %v9062_v37 = vpop.f32.mrf.mxu0 }
0x11f2   : > { %v6883_v42 = vadd.f32 %v9062_v37, %v6796_v39  ;;  %v9095_v49 = vpop.f32.mrf.mxu1 }
0x11f3   : > { %v6875_v41 = vpop.f32.mrf.mxu0 }
0x11f4   : > { %v6876_v19 = vadd.f32 %v6875_v41, %v6790_v13  ;;  %v6968_v46 = vadd.f32 %v9073_v40, %v6883_v42  ;;  %v7131_v0 = vpop.f32.mrf.mxu1 }
0x11f6   : > { %v6960_v58 = vadd.f32 %v6959_v45, %v6876_v19 }
0x11fa   : > { %v9084_v53 = vpop.f32.mrf.mxu0 }
0x11fb   : > { %v7057_v54 = vadd.f32 %v9084_v53, %v6968_v46 }
0x11fc   : > { %v7050_v59 = vpop.f32.mrf.mxu0 }
0x11fd   : > { %v7138_v10 = vadd.f32 %v9095_v49, %v7057_v54  ;;  %v7051_v63 = vadd.f32 %v7050_v59, %v6960_v58 }
0x11ff   : > { %v7144_v1 = vmul.f32 0.70710677, %v7138_v10  ;;  %v7132_v5 = vadd.f32 %v7131_v0, %v7051_v63  ;;  %v7142_v12 = vmul.f32 0.5, %v7138_v10 }
0x1201   : > { %9341 = verf.f32 %v7144_v1  ;;  %v7143_v6 = vmul.f32 0.70710677, %v7132_v5  ;;  %v7141_v24 = vmul.f32 0.5, %v7132_v5 }
0x1203   : > { %9343 = verf.f32 %v7143_v6 }
0x120e   : > { %v9342_v7 = vpop.eup %9341 }
0x120f   : > { %v7148_v14 = vadd.f32 1.0, %v9342_v7 }
0x1210   : > { %v9344_v20 = vpop.eup %9343 }
0x1211   : > { %v7150_v21 = vmul.f32 %v7148_v14, %v7142_v12  ;;  %v7147_v25 = vadd.f32 1.0, %v9344_v20 }
0x1213   : > { %v7149_v26 = vmul.f32 %v7147_v25, %v7141_v24  ;;  %v7164_v28 = vsel %vm7159_vm8, %v7150_v21, 0 }
0x1214   : > { %v10595_v29 = vand.u32 4294901760, %v7164_v28 }
0x1215   : > { %v7161_v30 = vsel %vm7159_vm8, %v7149_v26, 0 }
0x1216   : > { %v7239_v31 = vand.u32 4294901760, %v7161_v30  ;;  %v7250_v32 = vsub.f32 %v7164_v28, %v10595_v29 }
0x1218   : > { %9131 = vmatprep.mubr.f32.mxu1 %v7239_v31  ;;  %v7240_v33 = vsub.f32 %v7161_v30, %v7239_v31  ;;  %v7251_v34 = vand.u32 4294901760, %v7250_v32 }
0x1219   : > { %9132 = vmatmul.mubr.f32.vlgmr.msra.gmra.mxu1 %v10595_v29 }
0x121a   : > { %9154 = vmatpush3.msra.mxu1 %v10485_v16  ;;  %v7241_v35 = vand.u32 4294901760, %v7240_v33  ;;  %v7252_v36 = vsub.f32 %v7250_v32, %v7251_v34 }
0x121b   : > { %9155 = vmatprep.subr.mxu1 %v10491_v48 }
0x121c   : > { %9156 = vmatpush3.msra.mxu1 %v10491_v48  ;;  %9169 = vmatprep.mubr.f32.mxu1 %v7241_v35  ;;  %v7242_v37 = vsub.f32 %v7240_v33, %v7241_v35  ;;  %v7253_v39 = vand.u32 4294901760, %v7252_v36 }
0x121d   : > { %9157 = vmatprep.subr.mxu1 %v10502_v52 }
0x121e   : > { %9158 = vmatpush3.msra.mxu1 %v10502_v52  ;;  %v7243_v38 = vand.u32 4294901760, %v7242_v37 }
0x121f   : > { %9159 = vmatprep.subr.mxu1 %v10515_v57 }
0x1220   : > { %9160 = vmatpush3.msra.mxu1 %v10515_v57  ;;  %9112 = vmatprep.mubr.f32.mxu0 %v7243_v38 }
0x1221   : > { %9161 = vmatprep.subr.mxu1 %v10529_v62  ;;  %9113 = vmatmul.mubr.f32.vlgmr.msra.gmra.mxu0 %v7253_v39 }
0x1222   : > { %9135 = vmatpush3.msra.mxu0 %v10489_v47  ;;  %9162 = vmatpush3.msra.mxu1 %v10529_v62 }
0x1223   : > { %9136 = vmatprep.subr.mxu0 %v10500_v51  ;;  %9150 = vmatprep.mubr.f32.mxu0 %v7240_v33 }
0x1224   : > { %9163 = vmatprep.subr.mxu1 %v10538_v3  ;;  %9137 = vmatpush3.msra.mxu0 %v10500_v51 }
0x1225   : > { %9164 = vmatpush3.msra.mxu1 %v10538_v3  ;;  %9138 = vmatprep.subr.mxu0 %v10513_v56 }
0x1226   : > { %9165 = vmatprep.subr.mxu1 %v10550_v9  ;;  %9139 = vmatpush3.msra.mxu0 %v10513_v56 }
0x1227   : > { %9166 = vmatpush3.msra.mxu1 %v10550_v9  ;;  %9140 = vmatprep.subr.mxu0 %v10526_v61 }
0x1228   : > { %9167 = vmatprep.subr.mxu1 %v10564_v18  ;;  %9141 = vmatpush3.msra.mxu0 %v10526_v61 }
0x1229   : > { %9168 = vmatpush3.msra.mxu1 %v10564_v18  ;;  %9142 = vmatprep.subr.mxu0 %v10541_v4 }
0x122a   : > { %9170 = vmatmul.mubr.f32.vlgmr.msra.gmra.mxu1 %v7251_v34  ;;  %9191 = vmatprep.subr.mxu1 %v10485_v16 }
0x122b   : > { %9143 = vmatpush3.msra.mxu0 %v10541_v4  ;;  %9192 = vmatpush3.msra.mxu1 %v10485_v16 }
0x122c   : > { %9207 = vmatprep.mubr.f32.mxu1 %v7239_v31  ;;  %9144 = vmatprep.subr.mxu0 %v10548_v8 }
0x122d   : > { %9193 = vmatprep.subr.mxu1 %v10491_v48  ;;  %9145 = vmatpush3.msra.mxu0 %v10548_v8 }
0x122e   : > { %9194 = vmatpush3.msra.mxu1 %v10491_v48  ;;  %9146 = vmatprep.subr.mxu0 %v10562_v17 }
0x122f   : > { %9195 = vmatprep.subr.mxu1 %v10502_v52  ;;  %9147 = vmatpush3.msra.mxu0 %v10562_v17 }
0x1230   : > { %9196 = vmatpush3.msra.mxu1 %v10502_v52  ;;  %9148 = vmatprep.subr.mxu0 %v10576_v23 }
0x1231   : > { %9197 = vmatprep.subr.mxu1 %v10515_v57  ;;  %9149 = vmatpush3.msra.mxu0 %v10576_v23 }
0x1232   : > { %9198 = vmatpush3.msra.mxu1 %v10515_v57  ;;  %9151 = vmatmul.mubr.f32.vlgmr.msra.gmra.mxu0 %v7250_v32 }
0x1233   : > { %9172 = vmatprep.subr.mxu0 %v10497_v50  ;;  %9199 = vmatprep.subr.mxu1 %v10529_v62 }
0x1234   : > { %9173 = vmatpush3.msra.mxu0 %v10497_v50  ;;  %9188 = vmatprep.mubr.f32.mxu0 %v7239_v31 }
0x1235   : > { %9200 = vmatpush3.msra.mxu1 %v10529_v62  ;;  %9174 = vmatprep.subr.mxu0 %v10510_v55 }
0x1236   : > { %9201 = vmatprep.subr.mxu1 %v10538_v3  ;;  %9175 = vmatpush3.msra.mxu0 %v10510_v55 }
0x1237   : > { %9202 = vmatpush3.msra.mxu1 %v10538_v3  ;;  %9176 = vmatprep.subr.mxu0 %v10523_v60 }
0x1238   : > { %9203 = vmatprep.subr.mxu1 %v10550_v9  ;;  %9177 = vmatpush3.msra.mxu0 %v10523_v60 }
0x1239   : > { %9204 = vmatpush3.msra.mxu1 %v10550_v9  ;;  %9178 = vmatprep.subr.mxu0 %v10536_v2 }
0x123a   : > { %9205 = vmatprep.subr.mxu1 %v10564_v18  ;;  %9179 = vmatpush3.msra.mxu0 %v10536_v2 }
0x123b   : > { %9206 = vmatpush3.msra.mxu1 %v10564_v18  ;;  %9180 = vmatprep.subr.mxu0 %v10554_v11 }
0x123c   : > { %9208 = vmatmul.mubr.f32.vlgmr.msra.gmra.mxu1 %v10595_v29  ;;  %9181 = vmatpush3.msra.mxu0 %v10554_v11 }
0x123d   : > { %9182 = vmatprep.subr.mxu0 %v10559_v15 }
0x123e   : > { %9183 = vmatpush3.msra.mxu0 %v10559_v15 }
0x123f   : > { %9184 = vmatprep.subr.mxu0 %v10573_v22 }
0x1240   : > { %9185 = vmatpush3.msra.mxu0 %v10573_v22  ;;  %v8011_v22 = vld [vmem:[%s9633_s20 + $0x5] ss:$0 sm:$0xff] }
0x1241   : > { %9186 = vmatprep.subr.mxu0 %v10583_v27 }
0x1242   : > { %9187 = vmatpush3.msra.mxu0 %v10583_v27 }
0x1243   : > { %9189 = vmatmul.mubr.f32.vlgmr.msra.gmra.mxu0 %v10595_v29 }
0x12d9   : > { %v9133_v47 = vpop.f32.mrf.mxu1 }
0x12db   : > { %v7366_v51 = vpop.f32.mrf.mxu1 }
0x12e1   : > { %v9114_v16 = vpop.f32.mrf.mxu0 }
0x12e2   : > { %v7373_v52 = vadd.f32 %v9133_v47, %v9114_v16 }
0x12e3   : > { %v7245_v48 = vpop.f32.mrf.mxu0 }
0x12e4   : > { %v7367_v57 = vadd.f32 %v7366_v51, %v7245_v48 }
0x12ea   : > { %v9171_v55 = vpop.f32.mrf.mxu1 }
0x12ec   : > { %v7548_v62 = vpop.f32.mrf.mxu1 }
0x12f2   : > { %v9152_v50 = vpop.f32.mrf.mxu0 }
0x12f3   : > { %v7468_v60 = vadd.f32 %v9152_v50, %v7373_v52 }
0x12f4   : > { %v7460_v56 = vpop.f32.mrf.mxu0 }
0x12f5   : > { %v7461_v61 = vadd.f32 %v7460_v56, %v7367_v57  ;;  %v7557_v2 = vadd.f32 %v9171_v55, %v7468_v60 }
0x12f7   : > { %v7549_v9 = vadd.f32 %v7548_v62, %v7461_v61 }
0x12fc   : > { %v9209_v3 = vpop.f32.mrf.mxu1 }
0x12fe   : > { %v7736_v18 = vpop.f32.mrf.mxu1 }
0x1303   : > { %v9190_v4 = vpop.f32.mrf.mxu0 }
0x1304   : > { %v7658_v8 = vadd.f32 %v9190_v4, %v7557_v2 }
0x1305   : > { %v7651_v11 = vpop.f32.mrf.mxu0 }
0x1306   : > { %v7743_v15 = vadd.f32 %v9209_v3, %v7658_v8  ;;  %v7652_v17 = vadd.f32 %v7651_v11, %v7549_v9 }
0x1308   : > { %v7747_v23 = vadd.f32 %v7743_v15, %v10379_v43  ;;  %v7737_v27 = vadd.f32 %v7736_v18, %v7652_v17 }
0x130a   : > { %v7757_v40 = vadd.f32 %v8011_v22, %v7747_v23  ;;  %v7746_v41 = vadd.f32 %v7737_v27, %v10383_v44  ;;  %7763 = sbr.rel (%p8012_p1) target bundleno = 5192 (0x1448), region = 68 }
0x130c   : > { %7759 = vst.msk [vmem:[#allocation2 + $0x8] sm:$0xff] %vm1158_vm2, %v7757_v40  ;;  %v7756_v42 = vadd.f32 %v8011_v22, %v7746_v41 }
0x130e   : > { %7758 = vst.msk [vmem:[#allocation2] sm:$0xff] %vm1158_vm2, %v7756_v42 }
0x130f   : > { %v7768_v13 = vsel %vm1158_vm2, %v7756_v42, 0.0  ;;  %v7771_v19 = vsel %vm1158_vm2, %v7757_v40, 0.0  ;;  %v8015_v14 = vld [vmem:[%s10748_s2 + $0x3] ss:$0 sm:$0xff]  ;;  %v8016_v21 = vld [vmem:[%s10748_s2 + $0x4] ss:$0 sm:$0xff] }
0x1310   : > { %7769 = vadd.xlane.f32.xlu0 %v7768_v13 }
0x1314   : > { %7772 = vadd.xlane.f32.xlu0 %v7771_v19 }
0x1399   : > { %v7770_v45 = vpop.xlane.xlu0 %7769 }
0x139a   : > { %v7774_v43 = vmul.f32 0.03125, %v7770_v45 }
0x139c   : > { %v7776_v46 = vsub.f32 %v7756_v42, %v7774_v43 }
0x139d   : > { %v7773_v49 = vpop.xlane.xlu0 %7772 }
0x139e   : > { %v7775_v53 = vmul.f32 0.03125, %v7773_v49  ;;  %v7778_v44 = vmul.f32 %v7776_v46, %v7776_v46 }
0x13a0   : > { %v7777_v54 = vsub.f32 %v7757_v40, %v7775_v53  ;;  %v7780_v58 = vsel %vm1158_vm2, %v7778_v44, 0.0 }
0x13a1   : > { %7781 = vadd.xlane.f32.xlu1 %v7780_v58 }
0x13a2   : > { %v7779_v59 = vmul.f32 %v7777_v54, %v7777_v54 }
0x13a4   : > { %v7783_v10 = vsel %vm1158_vm2, %v7779_v59, 0.0 }
0x13a5   : > { %7784 = vadd.xlane.f32.xlu1 %v7783_v10 }
0x142a   : > { %v7782_v63 = vpop.xlane.xlu1 %7781 }
0x142b   : > { %v7786_v0 = vmul.f32 0.03125, %v7782_v63 }
0x142d   : > { %v7788_v1 = vadd.f32 1e-05, %v7786_v0 }
0x142e   : > { %v7785_v5 = vpop.xlane.xlu1 %7784 }
0x142f   : > { %9347 = vrsqrt.f32 %v7788_v1  ;;  %v7787_v6 = vmul.f32 0.03125, %v7785_v5 }
0x1431   : > { %v7789_v7 = vadd.f32 1e-05, %v7787_v6 }
0x1433   : > { %9349 = vrsqrt.f32 %v7789_v7 }
0x143c   : > { %v9348_v12 = vpop.eup %9347 }
0x143d   : > { %v7792_v20 = vmul.f32 %v9348_v12, %v7776_v46 }
0x143f   : > { %v7800_v24 = vmul.f32 %v8015_v14, %v7792_v20 }
0x1440   : > { %v9350_v25 = vpop.eup %9349 }
0x1441   : > { %v7808_v26 = vadd.f32 %v8016_v21, %v7800_v24  ;;  %v7793_v28 = vmul.f32 %v9350_v25, %v7777_v54 }
0x1443   : > { %7810 = vst.msk [vmem:[%s9635_s5] sm:$0xff] %vm1158_vm2, %v7808_v26  ;;  %v7801_v29 = vmul.f32 %v8015_v14, %v7793_v28 }
0x1445   : > { %v7809_v30 = vadd.f32 %v8016_v21, %v7801_v29 }
0x1447   : > { %7811 = vst.msk [vmem:[%s9635_s5 + $0x8] sm:$0xff] %vm1158_vm2, %v7809_v30 }
0x1448 PF: > { %s8027_s13 = sshll.u32 %s9431_s17, 8  ;;  %s10790_s12 = sld [smem:[#allocation20_spill]] }
0x1449   : > { %s7826_s24 = sshll.u32 %s9635_s5, 4  ;;  %s10791_s3 = sand.u32 1, %s9419_s14   ;;  %s10690_s24 = int_to_ptr.vmem [resolvable:$true] %s7826_s24 }
0x144a   : > { %s10694_s27 = scalar_lea.sflag [#allocation5], %s10791_s3  ;;  %s9351_s26 = scalar_lea.vmem %s10690_s24, 256 }
0x144b   : > { %p9352_p2 = scmp.ne.s32.totalorder %s10690_s24, %s9351_s26  ;;  %s9459_s17 = smov [#allocation4]  }
0x144c   : > { %s9355_s11 = sshll.u32 %s9459_s17, 4  ;;  %s9356_s11 = int_to_ptr.vmem [resolvable:$false] %s9355_s11 }
0x144d   : > { %p9353_p4 = pnand %p9352_p2, %p9565_p3  ;;  %s9357_s28 = scalar_lea.vmem %s9356_s11, 512 }
0x144e   : > { %s10687_s0 = scalar_lea.hbm %s10790_s12, %s8027_s13  ;;  %p9358_p6 = scmp.lt.s32.totalorder %s10690_s24, %s9356_s11 }
0x144f   : > { %p9354_p5 = pneg %p9353_p4  ;;  %p9359_p7 = scmp.lt.s32.totalorder %s9357_s28, %s9351_s26 }
0x1451   : > { %p9360_p8 = por %p9359_p7, %p9358_p6 }
0x1453   : > { %p9361_p10 = pnand %p9360_p8, %p9354_p5 }
0x1455   : > { %9364 = shalt.err (!%p9361_p10)
}
0x1456   : > { %s9365_s5 = scalar_lea.hbm %s10687_s0, 256  ;;  %s9369_s22 = scalar_lea.hbm %s10790_s12, 512 }
0x1457   : > { %p9366_p11 = scmp.ne.s32.totalorder %s10687_s0, %s9365_s5  ;;  %p9370_p0 = scmp.lt.s32.totalorder %s10687_s0, %s10790_s12 }
0x1458   : > { %p9371_p1 = scmp.lt.s32.totalorder %s9369_s22, %s9365_s5 }
0x1459   : > { %p9367_p12 = pnand %p9366_p11, %p9565_p3 }
0x145a   : > { %p9372_p2 = por %p9371_p1, %p9370_p0 }
0x145b   : > { %p9368_p13 = pneg %p9367_p12 }
0x145d   : > { %p9373_p4 = pnand %p9372_p2, %p9368_p13 }
0x145f   : > { %9376 = shalt.err (!%p9373_p4)
}
0x1460   : > { %s9460_s21 = smov 128  }
0x1461   : > { %9211 = dma.vmem_to_hbm [thread:$0]  (%p9565_p3), %s10690_s24, 256, %s10687_s0, %s10694_s27, %s9460_s21, %s9460_s21, %s9456_s30  }
0x1462 PF: > { %s10792_s18 = sld [smem:[#allocation11_spill]] }
0x1463   : > { %s10793_s20 = sld [smem:[#allocation7_spill]] }
0x1468   : > { %p9217_p5 = scmp.ge.s32.totalorder %s10792_s18, 2 }
0x1469   : > { %s7841_s23 = sand.u32 1, %s10793_s20  }
0x146a   : > { %p9214_p6 = pnand %p9217_p5, %p9575_p9  ;;  %s7842_s25 = scalar_lea.sflag [#allocation5], %s7841_s23 }
0x146c   : > { %p9215_p7 = pneg %p9214_p6 }
0x146e   : > { %9410 = dma.done.wait (%p9215_p7), %s7842_s25, 256  }
0x146f   : > { %9412 = vsyncadd (%p9215_p7), %s7842_s25, 4294967040  ;;  %s23_s20 = sadd.s32 1, %s10792_s18   ;;  %s10795_s29 = sld [smem:[#allocation8_spill]] }
0x1470   : > { %p20_p8 = scmp.ge.s32.totalorder %s23_s20, 10   ;;  %s10796_s15 = sld [smem:[#allocation16_spill]] }
0x1471   : > { %s10797_s16 = sld [smem:[#allocation9_spill]]  ;;  %s10801_s13 = smov %s9419_s14 }
0x1472   : > { %s10798_s17 = sld [smem:[#allocation10_spill]]  ;;  %22 = sbr.rel (!%p20_p8) target bundleno = 10 (0xa), region = 133 }
0x1473   : > { %s10799_s18 = sld [smem:[#allocation12_spill]] }
0x1474   : > { %s10800_s19 = sld [smem:[#allocation14_spill]] }
0x1475   : > { %s10802_s14 = smov %s10795_s29 }
0x1477   :  { %7847 = vsyncpa [#allocation5], 1 }
0x1478   :  { %7849 = vsyncpa [#allocation5 + $0x1], 1 }

</bundles_post_ra>
